<compile_context>
chip_gen: v7x
topology: tpu7x:2x2x1
jax: 0.10.0
libtpu: 0.0.40
codegen_flags: <defaults>
</compile_context>

<pallas_src>
import functools

import jax
import jax.numpy as jnp
from jax.experimental import pallas as pl
from jax.experimental.pallas import tpu as pltpu

# ---- model configuration (mirrors the CRNN.__init__ arguments) ----
OUT_DIM = 8
CNN_SETTING = [(1, 4, 3, 1, 1)]       # (in_ch, out_ch, kernel, stride, padding)
POOLING_SETTING = [(2, 2)]            # (kernel, stride)
RNN_SETTING = [(32, 16, 1, False)]    # (in_dim, hid_dim, layers, bidirectional)
DNN_SETTING = 32
DROPOUT_RATE = 0.5                    # eval-mode dropout == identity
CNN2RNN = "concat"
RNN2DNN = "L-concat"


# --------------------------------------------------------------------------
# Fused kernel: conv3x3 + ReLU + maxpool2x2  ->  LSTM  ->  DNN head + softmax
# --------------------------------------------------------------------------
def crnn_kernel(x_ref, cw_ref, cb_ref, wih_ref, whh_ref, blstm_ref,
                w1_ref, b1_ref, w2_ref, b2_ref, *rest,
                apply_transfer, bn, cout, k, hin, pk, hid):
    # Ref order is (inputs..., outputs...).
    if apply_transfer:
        wt_ref, bt_ref, o_ref = rest
    else:
        (o_ref,) = rest

    hc = hin                    # conv output spatial size (k=3, pad=1, stride=1)
    hp = hc // pk               # pooled spatial size
    T = hp                      # LSTM sequence length (== pooled width)

    # ---- hoisted conv scalar splats (weights + biases).  JAX does not CSE
    #      broadcasts, so each splat is materialized exactly once here,
    #      outside the batch / channel loops (36 + 4 instead of 72 + 8). ----
    zero_tile = jnp.zeros((hc, hc), jnp.float32)
    cw_splat = [[zero_tile + cw_ref[co, t] for t in range(k * k)]
                for co in range(cout)]
    cb_splat = [zero_tile + cb_ref[co] for co in range(cout)]

    # ---- Stage 1a: conv 3x3 on the (w, h)-transposed, zero-padded input.
    #      The 9 shifted windows depend only on the tap (kh, kw) and are
    #      hoisted out of the channel loop (9 per batch instead of 36). ----
    rows = []
    for b in range(bn):
        xb = x_ref[b]                                        # (hin+2, hin+2)
        # input is (w, h)-transposed -> tap (kh, kw) reads window (kw, kh)
        win = [[xb[kw:kw + hc, kh:kh + hc] for kw in range(k)]
               for kh in range(k)]
        chans = []
        for co in range(cout):
            acc = cb_splat[co]
            for kh in range(k):
                for kw in range(k):
                    acc = acc + cw_splat[co][kh * k + kw] * win[kh][kw]
            chans.append(acc)                                # (hc, hc)
        rows.append(jnp.concatenate(chans, axis=1))          # (hc, cout*hc)
    big = jnp.concatenate(rows, axis=0)                      # (bn*hc, cout*hc)

    # ---- Stage 1b: ReLU + a SINGLE 2x2 max-pool over the whole
    #      batch+channel concat (one relayout instead of bn*cout of them).
    #      Row pairs never cross batch blocks (hc even) and column pairs never
    #      cross channel blocks, so the pooled result IS the batch-major
    #      sequence tensor seq[b*T + t, co*hp + h']. ----
    big = jnp.maximum(big, 0.0)
    p4 = big.reshape(bn * T, pk, cout * hp, pk)
    p4 = jnp.max(p4, axis=3)
    seq = jnp.max(p4, axis=1)                                # (bn*T, cout*hp)

    # ---- Stage 1c: hoisted LSTM input projection -- ONE matmul for all
    #      batches and all time steps:  gx = seq @ Wih^T + (b_ih + b_hh). ----
    gx = jnp.dot(seq, wih_ref[...], preferred_element_type=jnp.float32)
    gx = gx + blstm_ref[...]                                 # (bn*T, 4H)

    # Per-step (bn, 4H) gate-input slices, gathered once up-front so the
    # serial recurrence below never touches VMEM or does cross-sublane
    # extraction on its critical path.
    gx_t = [jnp.concatenate([gx[b * T + t:b * T + t + 1, :] for b in range(bn)],
                            axis=0)
            for t in range(T)]

    # ---- Stage 2: LSTM recurrence.  h / c live in vregs; Whh is loaded from
    #      VMEM exactly once (loop-invariant).  Only the last hidden state is
    #      kept ('L-concat').
    # TODO(synk): stage Whh in MXU weight registers across steps via
    #             pltpu.matmul_push_rhs / matmul_acc_lhs / matmul_pop once the
    #             raw MXU primitives accept these sub-tile (2,16)x(16,64) shapes.
    whh = whh_ref[...]
    h = jnp.zeros((bn, hid), jnp.float32)
    c = jnp.zeros((bn, hid), jnp.float32)
    for t in range(T):
        g = gx_t[t] + jnp.dot(h, whh, preferred_element_type=jnp.float32)
        # gate column order is [i, f, o, g]: one sigmoid for 3H, one tanh for H
        ifo = jax.nn.sigmoid(g[:, :3 * hid])
        gg = jnp.tanh(g[:, 3 * hid:])
        c = ifo[:, hid:2 * hid] * c + ifo[:, :hid] * gg
        h = ifo[:, 2 * hid:3 * hid] * jnp.tanh(c)

    # ---- Stage 3: DNN head: Linear -> ReLU -> (dropout == id) -> Linear
    #      -> optional transfer -> softmax(dim=1). ----
    z = jnp.maximum(jnp.dot(h, w1_ref[...], preferred_element_type=jnp.float32)
                    + b1_ref[...], 0.0)
    # TODO(synk): training-mode dropout (random mask) not implemented;
    #             eval-mode dropout is the identity, which is what we compute.
    y = jnp.dot(z, w2_ref[...], preferred_element_type=jnp.float32) + b2_ref[...]
    if apply_transfer:  # mode == 'query'
        y = jnp.dot(y, wt_ref[...], preferred_element_type=jnp.float32) + bt_ref[...]
    m = jnp.max(y, axis=1, keepdims=True)
    e = jnp.exp(y - m)
    o_ref[...] = e / jnp.sum(e, axis=1, keepdims=True)


# --------------------------------------------------------------------------
# Parameters: synthetic init in PyTorch layout + one-time packing to kernel layout
# --------------------------------------------------------------------------
def init_params(key):
    """Deterministic synthetic parameters in the PyTorch module's native layout."""
    cin, cout, k, _, _ = CNN_SETTING[0]
    in_dim, hid, _, bi = RNN_SETTING[0]
    base_dim = hid * (1 + int(bi))
    ks = jax.random.split(key, 12)

    def rnd(i, shape, s=0.2):
        return s * jax.random.normal(ks[i], shape, jnp.float32)

    return {
        "conv.weight": rnd(0, (cout, cin, k, k)),
        "conv.bias": rnd(1, (cout,), 0.1),
        "lstm.weight_ih": rnd(2, (4 * hid, in_dim)),     # PyTorch gate order [i,f,g,o]
        "lstm.weight_hh": rnd(3, (4 * hid, hid)),
        "lstm.bias_ih": rnd(4, (4 * hid,), 0.1),
        "lstm.bias_hh": rnd(5, (4 * hid,), 0.1),
        "dnn1.weight": rnd(6, (DNN_SETTING, base_dim)),
        "dnn1.bias": rnd(7, (DNN_SETTING,), 0.1),
        "dnn2.weight": rnd(8, (OUT_DIM, DNN_SETTING)),
        "dnn2.bias": rnd(9, (OUT_DIM,), 0.1),
        "transfer.weight": rnd(10, (OUT_DIM, OUT_DIM)),
        "transfer.bias": rnd(11, (OUT_DIM,), 0.1),
    }


def pack_params(p):
    """One-time conversion from PyTorch layout to the kernel layout.

    LSTM gate rows are permuted from PyTorch's [i, f, g, o] to [i, f, o, g]
    (so one sigmoid covers 3H contiguous columns), weights are pre-transposed
    for x @ W^T, and b_ih + b_hh are summed into a single bias row.
    """
    cin, cout, k, _, _ = CNN_SETTING[0]
    _, hid, _, _ = RNN_SETTING[0]
    perm = jnp.concatenate([jnp.arange(0, 2 * hid),          # i, f
                            jnp.arange(3 * hid, 4 * hid),    # o
                            jnp.arange(2 * hid, 3 * hid)])   # g
    return {
        "conv_w": p["conv.weight"].reshape(cout, cin * k * k),
        "conv_b": p["conv.bias"],
        "wih_t": p["lstm.weight_ih"][perm].T,                # (in_dim, 4H)
        "whh_t": p["lstm.weight_hh"][perm].T,                # (hid, 4H)
        "b_lstm": (p["lstm.bias_ih"] + p["lstm.bias_hh"])[perm][None, :],
        "w1": p["dnn1.weight"].T, "b1": p["dnn1.bias"][None, :],
        "w2": p["dnn2.weight"].T, "b2": p["dnn2.bias"][None, :],
        "wt": p["transfer.weight"].T, "bt": p["transfer.bias"][None, :],
    }


# --------------------------------------------------------------------------
# Forward pass: one tiny XLA pre-op (transpose + pad of the 2 KiB input),
# then one fused Pallas kernel.  No grid: at B=2 the serial recurrence is the
# critical path; for large batch add a leading "parallel" batch grid axis
# (v7x 2-TC sharding).
# --------------------------------------------------------------------------
def crnn_forward(feature, params, mode="query"):
    # feature: (B, H, W) -- PyTorch's 3-D path does unsqueeze(1), i.e. C == 1.
    assert feature.ndim == 3
    bn, hin, win = feature.shape
    cin, cout, k, stride, pad = CNN_SETTING[0]
    pk, ps = POOLING_SETTING[0]
    in_dim, hid, layers, bidi = RNN_SETTING[0]
    assert cin == 1 and stride == 1 and pk == ps and layers == 1 and not bidi
    assert hin == win and hin % pk == 0 and in_dim == cout * (hin // pk)

    # H<->W transpose (so the pooled conv output lands directly in the
    # (B, T=W, F=C*H) layout the LSTM consumes) fused with the 1-pixel zero
    # pad, as one tiny XLA op on the raw input.
    xt = jnp.swapaxes(feature.astype(jnp.float32), 1, 2)
    xt = jnp.pad(xt, ((0, 0), (pad, pad), (pad, pad)))

    apply_transfer = (mode == "query")
    kern = functools.partial(crnn_kernel, apply_transfer=apply_transfer,
                             bn=bn, cout=cout, k=k, hin=hin, pk=pk, hid=hid)

    vmem = pl.BlockSpec(memory_space=pltpu.MemorySpace.VMEM)
    smem = pl.BlockSpec(memory_space=pltpu.MemorySpace.SMEM)
    args = [xt, params["conv_w"], params["conv_b"], params["wih_t"],
            params["whh_t"], params["b_lstm"], params["w1"], params["b1"],
            params["w2"], params["b2"]]
    in_specs = [vmem, smem, smem] + [vmem] * 7
    if apply_transfer:  # don't DMA dead transfer weights when mode != 'query'
        args += [params["wt"], params["bt"]]
        in_specs += [vmem, vmem]

    return pl.pallas_call(
        kern,
        out_shape=jax.ShapeDtypeStruct((bn, OUT_DIM), jnp.float32),
        in_specs=in_specs,
        out_specs=vmem,
    )(*args)


if __name__ == "__main__":
    key = jax.random.PRNGKey(0)
    pkey, fkey = jax.random.split(key)
    params = pack_params(init_params(pkey))
    feature = jax.random.normal(fkey, (2, 16, 16), jnp.float32)  # (B, H, W)

    fwd = jax.jit(functools.partial(crnn_forward, mode="query"))
    out = jax.block_until_ready(fwd(feature, params))

    assert out.shape == (2, OUT_DIM)
    # softmax rows sum to ~1
    assert bool(jnp.all(jnp.abs(jnp.sum(out, axis=1) - 1.0) < 1e-4))
    print("KERNEL_OK")
</pallas_src>

<mosaic_0001>
module attributes {stable_mosaic.version = 11 : i64} {
  func.func @crnn_kernel(%arg0: memref<2x18x18xf32, #tpu.memory_space<vmem>>, %arg1: memref<4x9xf32, #tpu.memory_space<smem>>, %arg2: memref<4xf32, #tpu.memory_space<smem>>, %arg3: memref<32x64xf32, #tpu.memory_space<vmem>>, %arg4: memref<16x64xf32, #tpu.memory_space<vmem>>, %arg5: memref<1x64xf32, #tpu.memory_space<vmem>>, %arg6: memref<16x32xf32, #tpu.memory_space<vmem>>, %arg7: memref<1x32xf32, #tpu.memory_space<vmem>>, %arg8: memref<32x8xf32, #tpu.memory_space<vmem>>, %arg9: memref<1x8xf32, #tpu.memory_space<vmem>>, %arg10: memref<8x8xf32, #tpu.memory_space<vmem>>, %arg11: memref<1x8xf32, #tpu.memory_space<vmem>>, %arg12: memref<2x8xf32, #tpu.memory_space<vmem>>) attributes {dimension_semantics = [], scalar_prefetch = 0 : i64, scratch_operands = 0 : i64, tpu.core_type = #tpu.core_type<tc>} {
    %cst = arith.constant 0.000000e+00 : f32
    %0 = vector.broadcast %cst : f32 to vector<16x16xf32>
    %c0 = arith.constant 0 : index
    %c0_0 = arith.constant 0 : index
    %1 = memref.load %arg1[%c0, %c0_0] : memref<4x9xf32, #tpu.memory_space<smem>>
    %2 = vector.broadcast %1 : f32 to vector<16x16xf32>
    %3 = arith.addf %0, %2 : vector<16x16xf32>
    %c0_1 = arith.constant 0 : index
    %c1 = arith.constant 1 : index
    %4 = memref.load %arg1[%c0_1, %c1] : memref<4x9xf32, #tpu.memory_space<smem>>
    %5 = vector.broadcast %4 : f32 to vector<16x16xf32>
    %6 = arith.addf %0, %5 : vector<16x16xf32>
    %c0_2 = arith.constant 0 : index
    %c2 = arith.constant 2 : index
    %7 = memref.load %arg1[%c0_2, %c2] : memref<4x9xf32, #tpu.memory_space<smem>>
    %8 = vector.broadcast %7 : f32 to vector<16x16xf32>
    %9 = arith.addf %0, %8 : vector<16x16xf32>
    %c0_3 = arith.constant 0 : index
    %c3 = arith.constant 3 : index
    %10 = memref.load %arg1[%c0_3, %c3] : memref<4x9xf32, #tpu.memory_space<smem>>
    %11 = vector.broadcast %10 : f32 to vector<16x16xf32>
    %12 = arith.addf %0, %11 : vector<16x16xf32>
    %c0_4 = arith.constant 0 : index
    %c4 = arith.constant 4 : index
    %13 = memref.load %arg1[%c0_4, %c4] : memref<4x9xf32, #tpu.memory_space<smem>>
    %14 = vector.broadcast %13 : f32 to vector<16x16xf32>
    %15 = arith.addf %0, %14 : vector<16x16xf32>
    %c0_5 = arith.constant 0 : index
    %c5 = arith.constant 5 : index
    %16 = memref.load %arg1[%c0_5, %c5] : memref<4x9xf32, #tpu.memory_space<smem>>
    %17 = vector.broadcast %16 : f32 to vector<16x16xf32>
    %18 = arith.addf %0, %17 : vector<16x16xf32>
    %c0_6 = arith.constant 0 : index
    %c6 = arith.constant 6 : index
    %19 = memref.load %arg1[%c0_6, %c6] : memref<4x9xf32, #tpu.memory_space<smem>>
    %20 = vector.broadcast %19 : f32 to vector<16x16xf32>
    %21 = arith.addf %0, %20 : vector<16x16xf32>
    %c0_7 = arith.constant 0 : index
    %c7 = arith.constant 7 : index
    %22 = memref.load %arg1[%c0_7, %c7] : memref<4x9xf32, #tpu.memory_space<smem>>
    %23 = vector.broadcast %22 : f32 to vector<16x16xf32>
    %24 = arith.addf %0, %23 : vector<16x16xf32>
    %c0_8 = arith.constant 0 : index
    %c8 = arith.constant 8 : index
    %25 = memref.load %arg1[%c0_8, %c8] : memref<4x9xf32, #tpu.memory_space<smem>>
    %26 = vector.broadcast %25 : f32 to vector<16x16xf32>
    %27 = arith.addf %0, %26 : vector<16x16xf32>
    %c1_9 = arith.constant 1 : index
    %c0_10 = arith.constant 0 : index
    %28 = memref.load %arg1[%c1_9, %c0_10] : memref<4x9xf32, #tpu.memory_space<smem>>
    %29 = vector.broadcast %28 : f32 to vector<16x16xf32>
    %30 = arith.addf %0, %29 : vector<16x16xf32>
    %c1_11 = arith.constant 1 : index
    %c1_12 = arith.constant 1 : index
    %31 = memref.load %arg1[%c1_11, %c1_12] : memref<4x9xf32, #tpu.memory_space<smem>>
    %32 = vector.broadcast %31 : f32 to vector<16x16xf32>
    %33 = arith.addf %0, %32 : vector<16x16xf32>
    %c1_13 = arith.constant 1 : index
    %c2_14 = arith.constant 2 : index
    %34 = memref.load %arg1[%c1_13, %c2_14] : memref<4x9xf32, #tpu.memory_space<smem>>
    %35 = vector.broadcast %34 : f32 to vector<16x16xf32>
    %36 = arith.addf %0, %35 : vector<16x16xf32>
    %c1_15 = arith.constant 1 : index
    %c3_16 = arith.constant 3 : index
    %37 = memref.load %arg1[%c1_15, %c3_16] : memref<4x9xf32, #tpu.memory_space<smem>>
    %38 = vector.broadcast %37 : f32 to vector<16x16xf32>
    %39 = arith.addf %0, %38 : vector<16x16xf32>
    %c1_17 = arith.constant 1 : index
    %c4_18 = arith.constant 4 : index
    %40 = memref.load %arg1[%c1_17, %c4_18] : memref<4x9xf32, #tpu.memory_space<smem>>
    %41 = vector.broadcast %40 : f32 to vector<16x16xf32>
    %42 = arith.addf %0, %41 : vector<16x16xf32>
    %c1_19 = arith.constant 1 : index
    %c5_20 = arith.constant 5 : index
    %43 = memref.load %arg1[%c1_19, %c5_20] : memref<4x9xf32, #tpu.memory_space<smem>>
    %44 = vector.broadcast %43 : f32 to vector<16x16xf32>
    %45 = arith.addf %0, %44 : vector<16x16xf32>
    %c1_21 = arith.constant 1 : index
    %c6_22 = arith.constant 6 : index
    %46 = memref.load %arg1[%c1_21, %c6_22] : memref<4x9xf32, #tpu.memory_space<smem>>
    %47 = vector.broadcast %46 : f32 to vector<16x16xf32>
    %48 = arith.addf %0, %47 : vector<16x16xf32>
    %c1_23 = arith.constant 1 : index
    %c7_24 = arith.constant 7 : index
    %49 = memref.load %arg1[%c1_23, %c7_24] : memref<4x9xf32, #tpu.memory_space<smem>>
    %50 = vector.broadcast %49 : f32 to vector<16x16xf32>
    %51 = arith.addf %0, %50 : vector<16x16xf32>
    %c1_25 = arith.constant 1 : index
    %c8_26 = arith.constant 8 : index
    %52 = memref.load %arg1[%c1_25, %c8_26] : memref<4x9xf32, #tpu.memory_space<smem>>
    %53 = vector.broadcast %52 : f32 to vector<16x16xf32>
    %54 = arith.addf %0, %53 : vector<16x16xf32>
    %c2_27 = arith.constant 2 : index
    %c0_28 = arith.constant 0 : index
    %55 = memref.load %arg1[%c2_27, %c0_28] : memref<4x9xf32, #tpu.memory_space<smem>>
    %56 = vector.broadcast %55 : f32 to vector<16x16xf32>
    %57 = arith.addf %0, %56 : vector<16x16xf32>
    %c2_29 = arith.constant 2 : index
    %c1_30 = arith.constant 1 : index
    %58 = memref.load %arg1[%c2_29, %c1_30] : memref<4x9xf32, #tpu.memory_space<smem>>
    %59 = vector.broadcast %58 : f32 to vector<16x16xf32>
    %60 = arith.addf %0, %59 : vector<16x16xf32>
    %c2_31 = arith.constant 2 : index
    %c2_32 = arith.constant 2 : index
    %61 = memref.load %arg1[%c2_31, %c2_32] : memref<4x9xf32, #tpu.memory_space<smem>>
    %62 = vector.broadcast %61 : f32 to vector<16x16xf32>
    %63 = arith.addf %0, %62 : vector<16x16xf32>
    %c2_33 = arith.constant 2 : index
    %c3_34 = arith.constant 3 : index
    %64 = memref.load %arg1[%c2_33, %c3_34] : memref<4x9xf32, #tpu.memory_space<smem>>
    %65 = vector.broadcast %64 : f32 to vector<16x16xf32>
    %66 = arith.addf %0, %65 : vector<16x16xf32>
    %c2_35 = arith.constant 2 : index
    %c4_36 = arith.constant 4 : index
    %67 = memref.load %arg1[%c2_35, %c4_36] : memref<4x9xf32, #tpu.memory_space<smem>>
    %68 = vector.broadcast %67 : f32 to vector<16x16xf32>
    %69 = arith.addf %0, %68 : vector<16x16xf32>
    %c2_37 = arith.constant 2 : index
    %c5_38 = arith.constant 5 : index
    %70 = memref.load %arg1[%c2_37, %c5_38] : memref<4x9xf32, #tpu.memory_space<smem>>
    %71 = vector.broadcast %70 : f32 to vector<16x16xf32>
    %72 = arith.addf %0, %71 : vector<16x16xf32>
    %c2_39 = arith.constant 2 : index
    %c6_40 = arith.constant 6 : index
    %73 = memref.load %arg1[%c2_39, %c6_40] : memref<4x9xf32, #tpu.memory_space<smem>>
    %74 = vector.broadcast %73 : f32 to vector<16x16xf32>
    %75 = arith.addf %0, %74 : vector<16x16xf32>
    %c2_41 = arith.constant 2 : index
    %c7_42 = arith.constant 7 : index
    %76 = memref.load %arg1[%c2_41, %c7_42] : memref<4x9xf32, #tpu.memory_space<smem>>
    %77 = vector.broadcast %76 : f32 to vector<16x16xf32>
    %78 = arith.addf %0, %77 : vector<16x16xf32>
    %c2_43 = arith.constant 2 : index
    %c8_44 = arith.constant 8 : index
    %79 = memref.load %arg1[%c2_43, %c8_44] : memref<4x9xf32, #tpu.memory_space<smem>>
    %80 = vector.broadcast %79 : f32 to vector<16x16xf32>
    %81 = arith.addf %0, %80 : vector<16x16xf32>
    %c3_45 = arith.constant 3 : index
    %c0_46 = arith.constant 0 : index
    %82 = memref.load %arg1[%c3_45, %c0_46] : memref<4x9xf32, #tpu.memory_space<smem>>
    %83 = vector.broadcast %82 : f32 to vector<16x16xf32>
    %84 = arith.addf %0, %83 : vector<16x16xf32>
    %c3_47 = arith.constant 3 : index
    %c1_48 = arith.constant 1 : index
    %85 = memref.load %arg1[%c3_47, %c1_48] : memref<4x9xf32, #tpu.memory_space<smem>>
    %86 = vector.broadcast %85 : f32 to vector<16x16xf32>
    %87 = arith.addf %0, %86 : vector<16x16xf32>
    %c3_49 = arith.constant 3 : index
    %c2_50 = arith.constant 2 : index
    %88 = memref.load %arg1[%c3_49, %c2_50] : memref<4x9xf32, #tpu.memory_space<smem>>
    %89 = vector.broadcast %88 : f32 to vector<16x16xf32>
    %90 = arith.addf %0, %89 : vector<16x16xf32>
    %c3_51 = arith.constant 3 : index
    %c3_52 = arith.constant 3 : index
    %91 = memref.load %arg1[%c3_51, %c3_52] : memref<4x9xf32, #tpu.memory_space<smem>>
    %92 = vector.broadcast %91 : f32 to vector<16x16xf32>
    %93 = arith.addf %0, %92 : vector<16x16xf32>
    %c3_53 = arith.constant 3 : index
    %c4_54 = arith.constant 4 : index
    %94 = memref.load %arg1[%c3_53, %c4_54] : memref<4x9xf32, #tpu.memory_space<smem>>
    %95 = vector.broadcast %94 : f32 to vector<16x16xf32>
    %96 = arith.addf %0, %95 : vector<16x16xf32>
    %c3_55 = arith.constant 3 : index
    %c5_56 = arith.constant 5 : index
    %97 = memref.load %arg1[%c3_55, %c5_56] : memref<4x9xf32, #tpu.memory_space<smem>>
    %98 = vector.broadcast %97 : f32 to vector<16x16xf32>
    %99 = arith.addf %0, %98 : vector<16x16xf32>
    %c3_57 = arith.constant 3 : index
    %c6_58 = arith.constant 6 : index
    %100 = memref.load %arg1[%c3_57, %c6_58] : memref<4x9xf32, #tpu.memory_space<smem>>
    %101 = vector.broadcast %100 : f32 to vector<16x16xf32>
    %102 = arith.addf %0, %101 : vector<16x16xf32>
    %c3_59 = arith.constant 3 : index
    %c7_60 = arith.constant 7 : index
    %103 = memref.load %arg1[%c3_59, %c7_60] : memref<4x9xf32, #tpu.memory_space<smem>>
    %104 = vector.broadcast %103 : f32 to vector<16x16xf32>
    %105 = arith.addf %0, %104 : vector<16x16xf32>
    %c3_61 = arith.constant 3 : index
    %c8_62 = arith.constant 8 : index
    %106 = memref.load %arg1[%c3_61, %c8_62] : memref<4x9xf32, #tpu.memory_space<smem>>
    %107 = vector.broadcast %106 : f32 to vector<16x16xf32>
    %108 = arith.addf %0, %107 : vector<16x16xf32>
    %c0_63 = arith.constant 0 : index
    %109 = memref.load %arg2[%c0_63] : memref<4xf32, #tpu.memory_space<smem>>
    %110 = vector.broadcast %109 : f32 to vector<16x16xf32>
    %111 = arith.addf %0, %110 : vector<16x16xf32>
    %c1_64 = arith.constant 1 : index
    %112 = memref.load %arg2[%c1_64] : memref<4xf32, #tpu.memory_space<smem>>
    %113 = vector.broadcast %112 : f32 to vector<16x16xf32>
    %114 = arith.addf %0, %113 : vector<16x16xf32>
    %c2_65 = arith.constant 2 : index
    %115 = memref.load %arg2[%c2_65] : memref<4xf32, #tpu.memory_space<smem>>
    %116 = vector.broadcast %115 : f32 to vector<16x16xf32>
    %117 = arith.addf %0, %116 : vector<16x16xf32>
    %c3_66 = arith.constant 3 : index
    %118 = memref.load %arg2[%c3_66] : memref<4xf32, #tpu.memory_space<smem>>
    %119 = vector.broadcast %118 : f32 to vector<16x16xf32>
    %120 = arith.addf %0, %119 : vector<16x16xf32>
    %c0_67 = arith.constant 0 : index
    %c0_68 = arith.constant 0 : index
    %c0_69 = arith.constant 0 : index
    %121 = vector.load %arg0[%c0_67, %c0_68, %c0_69] : memref<2x18x18xf32, #tpu.memory_space<vmem>>, vector<1x18x18xf32>
    %122 = vector.shape_cast %121 : vector<1x18x18xf32> to vector<18x18xf32>
    %123 = vector.extract_strided_slice %122 {offsets = [0, 0], sizes = [16, 16], strides = [1, 1]} : vector<18x18xf32> to vector<16x16xf32>
    %124 = vector.extract_strided_slice %122 {offsets = [1, 0], sizes = [16, 16], strides = [1, 1]} : vector<18x18xf32> to vector<16x16xf32>
    %125 = vector.extract_strided_slice %122 {offsets = [2, 0], sizes = [16, 16], strides = [1, 1]} : vector<18x18xf32> to vector<16x16xf32>
    %126 = vector.extract_strided_slice %122 {offsets = [0, 1], sizes = [16, 16], strides = [1, 1]} : vector<18x18xf32> to vector<16x16xf32>
    %127 = vector.extract_strided_slice %122 {offsets = [1, 1], sizes = [16, 16], strides = [1, 1]} : vector<18x18xf32> to vector<16x16xf32>
    %128 = vector.extract_strided_slice %122 {offsets = [2, 1], sizes = [16, 16], strides = [1, 1]} : vector<18x18xf32> to vector<16x16xf32>
    %129 = vector.extract_strided_slice %122 {offsets = [0, 2], sizes = [16, 16], strides = [1, 1]} : vector<18x18xf32> to vector<16x16xf32>
    %130 = vector.extract_strided_slice %122 {offsets = [1, 2], sizes = [16, 16], strides = [1, 1]} : vector<18x18xf32> to vector<16x16xf32>
    %131 = vector.extract_strided_slice %122 {offsets = [2, 2], sizes = [16, 16], strides = [1, 1]} : vector<18x18xf32> to vector<16x16xf32>
    %132 = arith.mulf %3, %123 : vector<16x16xf32>
    %133 = arith.addf %111, %132 : vector<16x16xf32>
    %134 = arith.mulf %6, %124 : vector<16x16xf32>
    %135 = arith.addf %133, %134 : vector<16x16xf32>
    %136 = arith.mulf %9, %125 : vector<16x16xf32>
    %137 = arith.addf %135, %136 : vector<16x16xf32>
    %138 = arith.mulf %12, %126 : vector<16x16xf32>
    %139 = arith.addf %137, %138 : vector<16x16xf32>
    %140 = arith.mulf %15, %127 : vector<16x16xf32>
    %141 = arith.addf %139, %140 : vector<16x16xf32>
    %142 = arith.mulf %18, %128 : vector<16x16xf32>
    %143 = arith.addf %141, %142 : vector<16x16xf32>
    %144 = arith.mulf %21, %129 : vector<16x16xf32>
    %145 = arith.addf %143, %144 : vector<16x16xf32>
    %146 = arith.mulf %24, %130 : vector<16x16xf32>
    %147 = arith.addf %145, %146 : vector<16x16xf32>
    %148 = arith.mulf %27, %131 : vector<16x16xf32>
    %149 = arith.addf %147, %148 : vector<16x16xf32>
    %150 = arith.mulf %30, %123 : vector<16x16xf32>
    %151 = arith.addf %114, %150 : vector<16x16xf32>
    %152 = arith.mulf %33, %124 : vector<16x16xf32>
    %153 = arith.addf %151, %152 : vector<16x16xf32>
    %154 = arith.mulf %36, %125 : vector<16x16xf32>
    %155 = arith.addf %153, %154 : vector<16x16xf32>
    %156 = arith.mulf %39, %126 : vector<16x16xf32>
    %157 = arith.addf %155, %156 : vector<16x16xf32>
    %158 = arith.mulf %42, %127 : vector<16x16xf32>
    %159 = arith.addf %157, %158 : vector<16x16xf32>
    %160 = arith.mulf %45, %128 : vector<16x16xf32>
    %161 = arith.addf %159, %160 : vector<16x16xf32>
    %162 = arith.mulf %48, %129 : vector<16x16xf32>
    %163 = arith.addf %161, %162 : vector<16x16xf32>
    %164 = arith.mulf %51, %130 : vector<16x16xf32>
    %165 = arith.addf %163, %164 : vector<16x16xf32>
    %166 = arith.mulf %54, %131 : vector<16x16xf32>
    %167 = arith.addf %165, %166 : vector<16x16xf32>
    %168 = arith.mulf %57, %123 : vector<16x16xf32>
    %169 = arith.addf %117, %168 : vector<16x16xf32>
    %170 = arith.mulf %60, %124 : vector<16x16xf32>
    %171 = arith.addf %169, %170 : vector<16x16xf32>
    %172 = arith.mulf %63, %125 : vector<16x16xf32>
    %173 = arith.addf %171, %172 : vector<16x16xf32>
    %174 = arith.mulf %66, %126 : vector<16x16xf32>
    %175 = arith.addf %173, %174 : vector<16x16xf32>
    %176 = arith.mulf %69, %127 : vector<16x16xf32>
    %177 = arith.addf %175, %176 : vector<16x16xf32>
    %178 = arith.mulf %72, %128 : vector<16x16xf32>
    %179 = arith.addf %177, %178 : vector<16x16xf32>
    %180 = arith.mulf %75, %129 : vector<16x16xf32>
    %181 = arith.addf %179, %180 : vector<16x16xf32>
    %182 = arith.mulf %78, %130 : vector<16x16xf32>
    %183 = arith.addf %181, %182 : vector<16x16xf32>
    %184 = arith.mulf %81, %131 : vector<16x16xf32>
    %185 = arith.addf %183, %184 : vector<16x16xf32>
    %186 = arith.mulf %84, %123 : vector<16x16xf32>
    %187 = arith.addf %120, %186 : vector<16x16xf32>
    %188 = arith.mulf %87, %124 : vector<16x16xf32>
    %189 = arith.addf %187, %188 : vector<16x16xf32>
    %190 = arith.mulf %90, %125 : vector<16x16xf32>
    %191 = arith.addf %189, %190 : vector<16x16xf32>
    %192 = arith.mulf %93, %126 : vector<16x16xf32>
    %193 = arith.addf %191, %192 : vector<16x16xf32>
    %194 = arith.mulf %96, %127 : vector<16x16xf32>
    %195 = arith.addf %193, %194 : vector<16x16xf32>
    %196 = arith.mulf %99, %128 : vector<16x16xf32>
    %197 = arith.addf %195, %196 : vector<16x16xf32>
    %198 = arith.mulf %102, %129 : vector<16x16xf32>
    %199 = arith.addf %197, %198 : vector<16x16xf32>
    %200 = arith.mulf %105, %130 : vector<16x16xf32>
    %201 = arith.addf %199, %200 : vector<16x16xf32>
    %202 = arith.mulf %108, %131 : vector<16x16xf32>
    %203 = arith.addf %201, %202 : vector<16x16xf32>
    %204 = tpu.concatenate %149, %167, %185, %203 in 1 : vector<16x16xf32>, vector<16x16xf32>, vector<16x16xf32>, vector<16x16xf32> -> vector<16x64xf32>
    %c1_70 = arith.constant 1 : index
    %c0_71 = arith.constant 0 : index
    %c0_72 = arith.constant 0 : index
    %205 = vector.load %arg0[%c1_70, %c0_71, %c0_72] : memref<2x18x18xf32, #tpu.memory_space<vmem>>, vector<1x18x18xf32>
    %206 = vector.shape_cast %205 : vector<1x18x18xf32> to vector<18x18xf32>
    %207 = vector.extract_strided_slice %206 {offsets = [0, 0], sizes = [16, 16], strides = [1, 1]} : vector<18x18xf32> to vector<16x16xf32>
    %208 = vector.extract_strided_slice %206 {offsets = [1, 0], sizes = [16, 16], strides = [1, 1]} : vector<18x18xf32> to vector<16x16xf32>
    %209 = vector.extract_strided_slice %206 {offsets = [2, 0], sizes = [16, 16], strides = [1, 1]} : vector<18x18xf32> to vector<16x16xf32>
    %210 = vector.extract_strided_slice %206 {offsets = [0, 1], sizes = [16, 16], strides = [1, 1]} : vector<18x18xf32> to vector<16x16xf32>
    %211 = vector.extract_strided_slice %206 {offsets = [1, 1], sizes = [16, 16], strides = [1, 1]} : vector<18x18xf32> to vector<16x16xf32>
    %212 = vector.extract_strided_slice %206 {offsets = [2, 1], sizes = [16, 16], strides = [1, 1]} : vector<18x18xf32> to vector<16x16xf32>
    %213 = vector.extract_strided_slice %206 {offsets = [0, 2], sizes = [16, 16], strides = [1, 1]} : vector<18x18xf32> to vector<16x16xf32>
    %214 = vector.extract_strided_slice %206 {offsets = [1, 2], sizes = [16, 16], strides = [1, 1]} : vector<18x18xf32> to vector<16x16xf32>
    %215 = vector.extract_strided_slice %206 {offsets = [2, 2], sizes = [16, 16], strides = [1, 1]} : vector<18x18xf32> to vector<16x16xf32>
    %216 = arith.mulf %3, %207 : vector<16x16xf32>
    %217 = arith.addf %111, %216 : vector<16x16xf32>
    %218 = arith.mulf %6, %208 : vector<16x16xf32>
    %219 = arith.addf %217, %218 : vector<16x16xf32>
    %220 = arith.mulf %9, %209 : vector<16x16xf32>
    %221 = arith.addf %219, %220 : vector<16x16xf32>
    %222 = arith.mulf %12, %210 : vector<16x16xf32>
    %223 = arith.addf %221, %222 : vector<16x16xf32>
    %224 = arith.mulf %15, %211 : vector<16x16xf32>
    %225 = arith.addf %223, %224 : vector<16x16xf32>
    %226 = arith.mulf %18, %212 : vector<16x16xf32>
    %227 = arith.addf %225, %226 : vector<16x16xf32>
    %228 = arith.mulf %21, %213 : vector<16x16xf32>
    %229 = arith.addf %227, %228 : vector<16x16xf32>
    %230 = arith.mulf %24, %214 : vector<16x16xf32>
    %231 = arith.addf %229, %230 : vector<16x16xf32>
    %232 = arith.mulf %27, %215 : vector<16x16xf32>
    %233 = arith.addf %231, %232 : vector<16x16xf32>
    %234 = arith.mulf %30, %207 : vector<16x16xf32>
    %235 = arith.addf %114, %234 : vector<16x16xf32>
    %236 = arith.mulf %33, %208 : vector<16x16xf32>
    %237 = arith.addf %235, %236 : vector<16x16xf32>
    %238 = arith.mulf %36, %209 : vector<16x16xf32>
    %239 = arith.addf %237, %238 : vector<16x16xf32>
    %240 = arith.mulf %39, %210 : vector<16x16xf32>
    %241 = arith.addf %239, %240 : vector<16x16xf32>
    %242 = arith.mulf %42, %211 : vector<16x16xf32>
    %243 = arith.addf %241, %242 : vector<16x16xf32>
    %244 = arith.mulf %45, %212 : vector<16x16xf32>
    %245 = arith.addf %243, %244 : vector<16x16xf32>
    %246 = arith.mulf %48, %213 : vector<16x16xf32>
    %247 = arith.addf %245, %246 : vector<16x16xf32>
    %248 = arith.mulf %51, %214 : vector<16x16xf32>
    %249 = arith.addf %247, %248 : vector<16x16xf32>
    %250 = arith.mulf %54, %215 : vector<16x16xf32>
    %251 = arith.addf %249, %250 : vector<16x16xf32>
    %252 = arith.mulf %57, %207 : vector<16x16xf32>
    %253 = arith.addf %117, %252 : vector<16x16xf32>
    %254 = arith.mulf %60, %208 : vector<16x16xf32>
    %255 = arith.addf %253, %254 : vector<16x16xf32>
    %256 = arith.mulf %63, %209 : vector<16x16xf32>
    %257 = arith.addf %255, %256 : vector<16x16xf32>
    %258 = arith.mulf %66, %210 : vector<16x16xf32>
    %259 = arith.addf %257, %258 : vector<16x16xf32>
    %260 = arith.mulf %69, %211 : vector<16x16xf32>
    %261 = arith.addf %259, %260 : vector<16x16xf32>
    %262 = arith.mulf %72, %212 : vector<16x16xf32>
    %263 = arith.addf %261, %262 : vector<16x16xf32>
    %264 = arith.mulf %75, %213 : vector<16x16xf32>
    %265 = arith.addf %263, %264 : vector<16x16xf32>
    %266 = arith.mulf %78, %214 : vector<16x16xf32>
    %267 = arith.addf %265, %266 : vector<16x16xf32>
    %268 = arith.mulf %81, %215 : vector<16x16xf32>
    %269 = arith.addf %267, %268 : vector<16x16xf32>
    %270 = arith.mulf %84, %207 : vector<16x16xf32>
    %271 = arith.addf %120, %270 : vector<16x16xf32>
    %272 = arith.mulf %87, %208 : vector<16x16xf32>
    %273 = arith.addf %271, %272 : vector<16x16xf32>
    %274 = arith.mulf %90, %209 : vector<16x16xf32>
    %275 = arith.addf %273, %274 : vector<16x16xf32>
    %276 = arith.mulf %93, %210 : vector<16x16xf32>
    %277 = arith.addf %275, %276 : vector<16x16xf32>
    %278 = arith.mulf %96, %211 : vector<16x16xf32>
    %279 = arith.addf %277, %278 : vector<16x16xf32>
    %280 = arith.mulf %99, %212 : vector<16x16xf32>
    %281 = arith.addf %279, %280 : vector<16x16xf32>
    %282 = arith.mulf %102, %213 : vector<16x16xf32>
    %283 = arith.addf %281, %282 : vector<16x16xf32>
    %284 = arith.mulf %105, %214 : vector<16x16xf32>
    %285 = arith.addf %283, %284 : vector<16x16xf32>
    %286 = arith.mulf %108, %215 : vector<16x16xf32>
    %287 = arith.addf %285, %286 : vector<16x16xf32>
    %288 = tpu.concatenate %233, %251, %269, %287 in 1 : vector<16x16xf32>, vector<16x16xf32>, vector<16x16xf32>, vector<16x16xf32> -> vector<16x64xf32>
    %289 = tpu.concatenate %204, %288 in 0 : vector<16x64xf32>, vector<16x64xf32> -> vector<32x64xf32>
    %cst_73 = arith.constant 0.000000e+00 : f32
    %290 = vector.broadcast %cst_73 : f32 to vector<32x64xf32>
    %291 = arith.maximumf %289, %290 : vector<32x64xf32>
    %292 = vector.shape_cast %291 : vector<32x64xf32> to vector<16x2x32x2xf32>
    %cst_74 = arith.constant dense<0xFF800000> : vector<16x2x32xf32>
    %293 = vector.multi_reduction <maximumf>, %292, %cst_74 [3] : vector<16x2x32x2xf32> to vector<16x2x32xf32>
    %cst_75 = arith.constant dense<0xFF800000> : vector<16x32xf32>
    %294 = vector.multi_reduction <maximumf>, %293, %cst_75 [1] : vector<16x2x32xf32> to vector<16x32xf32>
    %c0_76 = arith.constant 0 : index
    %c0_77 = arith.constant 0 : index
    %295 = vector.load %arg3[%c0_76, %c0_77] : memref<32x64xf32, #tpu.memory_space<vmem>>, vector<32x64xf32>
    %cst_78 = arith.constant dense<0.000000e+00> : vector<16x64xf32>
    %296 = tpu.matmul %294, %295, %cst_78 {dimension_numbers = #tpu.dot_dimension_numbers<[1], [0], [0], [1], [0, 0, 1, 1], [], []>} : vector<16x32xf32>, vector<32x64xf32>, vector<16x64xf32> -> vector<16x64xf32>
    %c0_79 = arith.constant 0 : index
    %c0_80 = arith.constant 0 : index
    %297 = vector.load %arg5[%c0_79, %c0_80] : memref<1x64xf32, #tpu.memory_space<vmem>>, vector<1x64xf32>
    %298 = vector.broadcast %297 : vector<1x64xf32> to vector<16x64xf32>
    %299 = arith.addf %296, %298 : vector<16x64xf32>
    %300 = vector.extract_strided_slice %299 {offsets = [0, 0], sizes = [1, 64], strides = [1, 1]} : vector<16x64xf32> to vector<1x64xf32>
    %301 = vector.extract_strided_slice %299 {offsets = [8, 0], sizes = [1, 64], strides = [1, 1]} : vector<16x64xf32> to vector<1x64xf32>
    %302 = tpu.concatenate %300, %301 in 0 : vector<1x64xf32>, vector<1x64xf32> -> vector<2x64xf32>
    %303 = vector.extract_strided_slice %299 {offsets = [1, 0], sizes = [1, 64], strides = [1, 1]} : vector<16x64xf32> to vector<1x64xf32>
    %304 = vector.extract_strided_slice %299 {offsets = [9, 0], sizes = [1, 64], strides = [1, 1]} : vector<16x64xf32> to vector<1x64xf32>
    %305 = tpu.concatenate %303, %304 in 0 : vector<1x64xf32>, vector<1x64xf32> -> vector<2x64xf32>
    %306 = vector.extract_strided_slice %299 {offsets = [2, 0], sizes = [1, 64], strides = [1, 1]} : vector<16x64xf32> to vector<1x64xf32>
    %307 = vector.extract_strided_slice %299 {offsets = [10, 0], sizes = [1, 64], strides = [1, 1]} : vector<16x64xf32> to vector<1x64xf32>
    %308 = tpu.concatenate %306, %307 in 0 : vector<1x64xf32>, vector<1x64xf32> -> vector<2x64xf32>
    %309 = vector.extract_strided_slice %299 {offsets = [3, 0], sizes = [1, 64], strides = [1, 1]} : vector<16x64xf32> to vector<1x64xf32>
    %310 = vector.extract_strided_slice %299 {offsets = [11, 0], sizes = [1, 64], strides = [1, 1]} : vector<16x64xf32> to vector<1x64xf32>
    %311 = tpu.concatenate %309, %310 in 0 : vector<1x64xf32>, vector<1x64xf32> -> vector<2x64xf32>
    %312 = vector.extract_strided_slice %299 {offsets = [4, 0], sizes = [1, 64], strides = [1, 1]} : vector<16x64xf32> to vector<1x64xf32>
    %313 = vector.extract_strided_slice %299 {offsets = [12, 0], sizes = [1, 64], strides = [1, 1]} : vector<16x64xf32> to vector<1x64xf32>
    %314 = tpu.concatenate %312, %313 in 0 : vector<1x64xf32>, vector<1x64xf32> -> vector<2x64xf32>
    %315 = vector.extract_strided_slice %299 {offsets = [5, 0], sizes = [1, 64], strides = [1, 1]} : vector<16x64xf32> to vector<1x64xf32>
    %316 = vector.extract_strided_slice %299 {offsets = [13, 0], sizes = [1, 64], strides = [1, 1]} : vector<16x64xf32> to vector<1x64xf32>
    %317 = tpu.concatenate %315, %316 in 0 : vector<1x64xf32>, vector<1x64xf32> -> vector<2x64xf32>
    %318 = vector.extract_strided_slice %299 {offsets = [6, 0], sizes = [1, 64], strides = [1, 1]} : vector<16x64xf32> to vector<1x64xf32>
    %319 = vector.extract_strided_slice %299 {offsets = [14, 0], sizes = [1, 64], strides = [1, 1]} : vector<16x64xf32> to vector<1x64xf32>
    %320 = tpu.concatenate %318, %319 in 0 : vector<1x64xf32>, vector<1x64xf32> -> vector<2x64xf32>
    %321 = vector.extract_strided_slice %299 {offsets = [7, 0], sizes = [1, 64], strides = [1, 1]} : vector<16x64xf32> to vector<1x64xf32>
    %322 = vector.extract_strided_slice %299 {offsets = [15, 0], sizes = [1, 64], strides = [1, 1]} : vector<16x64xf32> to vector<1x64xf32>
    %323 = tpu.concatenate %321, %322 in 0 : vector<1x64xf32>, vector<1x64xf32> -> vector<2x64xf32>
    %c0_81 = arith.constant 0 : index
    %c0_82 = arith.constant 0 : index
    %324 = vector.load %arg4[%c0_81, %c0_82] : memref<16x64xf32, #tpu.memory_space<vmem>>, vector<16x64xf32>
    %cst_83 = arith.constant 0.000000e+00 : f32
    %325 = vector.broadcast %cst_83 : f32 to vector<2x16xf32>
    %cst_84 = arith.constant 0.000000e+00 : f32
    %326 = vector.broadcast %cst_84 : f32 to vector<2x16xf32>
    %cst_85 = arith.constant dense<0.000000e+00> : vector<2x64xf32>
    %327 = tpu.matmul %325, %324, %cst_85 {dimension_numbers = #tpu.dot_dimension_numbers<[1], [0], [0], [1], [0, 0, 1, 1], [], []>} : vector<2x16xf32>, vector<16x64xf32>, vector<2x64xf32> -> vector<2x64xf32>
    %328 = arith.addf %302, %327 : vector<2x64xf32>
    %329 = vector.extract_strided_slice %328 {offsets = [0, 0], sizes = [2, 48], strides = [1, 1]} : vector<2x64xf32> to vector<2x48xf32>
    %330 = arith.negf %329 : vector<2x48xf32>
    %331 = math.exp %330 : vector<2x48xf32>
    %cst_86 = arith.constant 1.000000e+00 : f32
    %332 = vector.broadcast %cst_86 : f32 to vector<2x48xf32>
    %333 = arith.addf %332, %331 : vector<2x48xf32>
    %334 = arith.divf %332, %333 : vector<2x48xf32>
    %335 = vector.extract_strided_slice %328 {offsets = [0, 48], sizes = [2, 16], strides = [1, 1]} : vector<2x64xf32> to vector<2x16xf32>
    %336 = math.tanh %335 : vector<2x16xf32>
    %337 = vector.extract_strided_slice %334 {offsets = [0, 16], sizes = [2, 16], strides = [1, 1]} : vector<2x48xf32> to vector<2x16xf32>
    %338 = arith.mulf %337, %326 : vector<2x16xf32>
    %339 = vector.extract_strided_slice %334 {offsets = [0, 0], sizes = [2, 16], strides = [1, 1]} : vector<2x48xf32> to vector<2x16xf32>
    %340 = arith.mulf %339, %336 : vector<2x16xf32>
    %341 = arith.addf %338, %340 : vector<2x16xf32>
    %342 = vector.extract_strided_slice %334 {offsets = [0, 32], sizes = [2, 16], strides = [1, 1]} : vector<2x48xf32> to vector<2x16xf32>
    %343 = math.tanh %341 : vector<2x16xf32>
    %344 = arith.mulf %342, %343 : vector<2x16xf32>
    %cst_87 = arith.constant dense<0.000000e+00> : vector<2x64xf32>
    %345 = tpu.matmul %344, %324, %cst_87 {dimension_numbers = #tpu.dot_dimension_numbers<[1], [0], [0], [1], [0, 0, 1, 1], [], []>} : vector<2x16xf32>, vector<16x64xf32>, vector<2x64xf32> -> vector<2x64xf32>
    %346 = arith.addf %305, %345 : vector<2x64xf32>
    %347 = vector.extract_strided_slice %346 {offsets = [0, 0], sizes = [2, 48], strides = [1, 1]} : vector<2x64xf32> to vector<2x48xf32>
    %348 = arith.negf %347 : vector<2x48xf32>
    %349 = math.exp %348 : vector<2x48xf32>
    %cst_88 = arith.constant 1.000000e+00 : f32
    %350 = vector.broadcast %cst_88 : f32 to vector<2x48xf32>
    %351 = arith.addf %350, %349 : vector<2x48xf32>
    %352 = arith.divf %350, %351 : vector<2x48xf32>
    %353 = vector.extract_strided_slice %346 {offsets = [0, 48], sizes = [2, 16], strides = [1, 1]} : vector<2x64xf32> to vector<2x16xf32>
    %354 = math.tanh %353 : vector<2x16xf32>
    %355 = vector.extract_strided_slice %352 {offsets = [0, 16], sizes = [2, 16], strides = [1, 1]} : vector<2x48xf32> to vector<2x16xf32>
    %356 = arith.mulf %355, %341 : vector<2x16xf32>
    %357 = vector.extract_strided_slice %352 {offsets = [0, 0], sizes = [2, 16], strides = [1, 1]} : vector<2x48xf32> to vector<2x16xf32>
    %358 = arith.mulf %357, %354 : vector<2x16xf32>
    %359 = arith.addf %356, %358 : vector<2x16xf32>
    %360 = vector.extract_strided_slice %352 {offsets = [0, 32], sizes = [2, 16], strides = [1, 1]} : vector<2x48xf32> to vector<2x16xf32>
    %361 = math.tanh %359 : vector<2x16xf32>
    %362 = arith.mulf %360, %361 : vector<2x16xf32>
    %cst_89 = arith.constant dense<0.000000e+00> : vector<2x64xf32>
    %363 = tpu.matmul %362, %324, %cst_89 {dimension_numbers = #tpu.dot_dimension_numbers<[1], [0], [0], [1], [0, 0, 1, 1], [], []>} : vector<2x16xf32>, vector<16x64xf32>, vector<2x64xf32> -> vector<2x64xf32>
    %364 = arith.addf %308, %363 : vector<2x64xf32>
    %365 = vector.extract_strided_slice %364 {offsets = [0, 0], sizes = [2, 48], strides = [1, 1]} : vector<2x64xf32> to vector<2x48xf32>
    %366 = arith.negf %365 : vector<2x48xf32>
    %367 = math.exp %366 : vector<2x48xf32>
    %cst_90 = arith.constant 1.000000e+00 : f32
    %368 = vector.broadcast %cst_90 : f32 to vector<2x48xf32>
    %369 = arith.addf %368, %367 : vector<2x48xf32>
    %370 = arith.divf %368, %369 : vector<2x48xf32>
    %371 = vector.extract_strided_slice %364 {offsets = [0, 48], sizes = [2, 16], strides = [1, 1]} : vector<2x64xf32> to vector<2x16xf32>
    %372 = math.tanh %371 : vector<2x16xf32>
    %373 = vector.extract_strided_slice %370 {offsets = [0, 16], sizes = [2, 16], strides = [1, 1]} : vector<2x48xf32> to vector<2x16xf32>
    %374 = arith.mulf %373, %359 : vector<2x16xf32>
    %375 = vector.extract_strided_slice %370 {offsets = [0, 0], sizes = [2, 16], strides = [1, 1]} : vector<2x48xf32> to vector<2x16xf32>
    %376 = arith.mulf %375, %372 : vector<2x16xf32>
    %377 = arith.addf %374, %376 : vector<2x16xf32>
    %378 = vector.extract_strided_slice %370 {offsets = [0, 32], sizes = [2, 16], strides = [1, 1]} : vector<2x48xf32> to vector<2x16xf32>
    %379 = math.tanh %377 : vector<2x16xf32>
    %380 = arith.mulf %378, %379 : vector<2x16xf32>
    %cst_91 = arith.constant dense<0.000000e+00> : vector<2x64xf32>
    %381 = tpu.matmul %380, %324, %cst_91 {dimension_numbers = #tpu.dot_dimension_numbers<[1], [0], [0], [1], [0, 0, 1, 1], [], []>} : vector<2x16xf32>, vector<16x64xf32>, vector<2x64xf32> -> vector<2x64xf32>
    %382 = arith.addf %311, %381 : vector<2x64xf32>
    %383 = vector.extract_strided_slice %382 {offsets = [0, 0], sizes = [2, 48], strides = [1, 1]} : vector<2x64xf32> to vector<2x48xf32>
    %384 = arith.negf %383 : vector<2x48xf32>
    %385 = math.exp %384 : vector<2x48xf32>
    %cst_92 = arith.constant 1.000000e+00 : f32
    %386 = vector.broadcast %cst_92 : f32 to vector<2x48xf32>
    %387 = arith.addf %386, %385 : vector<2x48xf32>
    %388 = arith.divf %386, %387 : vector<2x48xf32>
    %389 = vector.extract_strided_slice %382 {offsets = [0, 48], sizes = [2, 16], strides = [1, 1]} : vector<2x64xf32> to vector<2x16xf32>
    %390 = math.tanh %389 : vector<2x16xf32>
    %391 = vector.extract_strided_slice %388 {offsets = [0, 16], sizes = [2, 16], strides = [1, 1]} : vector<2x48xf32> to vector<2x16xf32>
    %392 = arith.mulf %391, %377 : vector<2x16xf32>
    %393 = vector.extract_strided_slice %388 {offsets = [0, 0], sizes = [2, 16], strides = [1, 1]} : vector<2x48xf32> to vector<2x16xf32>
    %394 = arith.mulf %393, %390 : vector<2x16xf32>
    %395 = arith.addf %392, %394 : vector<2x16xf32>
    %396 = vector.extract_strided_slice %388 {offsets = [0, 32], sizes = [2, 16], strides = [1, 1]} : vector<2x48xf32> to vector<2x16xf32>
    %397 = math.tanh %395 : vector<2x16xf32>
    %398 = arith.mulf %396, %397 : vector<2x16xf32>
    %cst_93 = arith.constant dense<0.000000e+00> : vector<2x64xf32>
    %399 = tpu.matmul %398, %324, %cst_93 {dimension_numbers = #tpu.dot_dimension_numbers<[1], [0], [0], [1], [0, 0, 1, 1], [], []>} : vector<2x16xf32>, vector<16x64xf32>, vector<2x64xf32> -> vector<2x64xf32>
    %400 = arith.addf %314, %399 : vector<2x64xf32>
    %401 = vector.extract_strided_slice %400 {offsets = [0, 0], sizes = [2, 48], strides = [1, 1]} : vector<2x64xf32> to vector<2x48xf32>
    %402 = arith.negf %401 : vector<2x48xf32>
    %403 = math.exp %402 : vector<2x48xf32>
    %cst_94 = arith.constant 1.000000e+00 : f32
    %404 = vector.broadcast %cst_94 : f32 to vector<2x48xf32>
    %405 = arith.addf %404, %403 : vector<2x48xf32>
    %406 = arith.divf %404, %405 : vector<2x48xf32>
    %407 = vector.extract_strided_slice %400 {offsets = [0, 48], sizes = [2, 16], strides = [1, 1]} : vector<2x64xf32> to vector<2x16xf32>
    %408 = math.tanh %407 : vector<2x16xf32>
    %409 = vector.extract_strided_slice %406 {offsets = [0, 16], sizes = [2, 16], strides = [1, 1]} : vector<2x48xf32> to vector<2x16xf32>
    %410 = arith.mulf %409, %395 : vector<2x16xf32>
    %411 = vector.extract_strided_slice %406 {offsets = [0, 0], sizes = [2, 16], strides = [1, 1]} : vector<2x48xf32> to vector<2x16xf32>
    %412 = arith.mulf %411, %408 : vector<2x16xf32>
    %413 = arith.addf %410, %412 : vector<2x16xf32>
    %414 = vector.extract_strided_slice %406 {offsets = [0, 32], sizes = [2, 16], strides = [1, 1]} : vector<2x48xf32> to vector<2x16xf32>
    %415 = math.tanh %413 : vector<2x16xf32>
    %416 = arith.mulf %414, %415 : vector<2x16xf32>
    %cst_95 = arith.constant dense<0.000000e+00> : vector<2x64xf32>
    %417 = tpu.matmul %416, %324, %cst_95 {dimension_numbers = #tpu.dot_dimension_numbers<[1], [0], [0], [1], [0, 0, 1, 1], [], []>} : vector<2x16xf32>, vector<16x64xf32>, vector<2x64xf32> -> vector<2x64xf32>
    %418 = arith.addf %317, %417 : vector<2x64xf32>
    %419 = vector.extract_strided_slice %418 {offsets = [0, 0], sizes = [2, 48], strides = [1, 1]} : vector<2x64xf32> to vector<2x48xf32>
    %420 = arith.negf %419 : vector<2x48xf32>
    %421 = math.exp %420 : vector<2x48xf32>
    %cst_96 = arith.constant 1.000000e+00 : f32
    %422 = vector.broadcast %cst_96 : f32 to vector<2x48xf32>
    %423 = arith.addf %422, %421 : vector<2x48xf32>
    %424 = arith.divf %422, %423 : vector<2x48xf32>
    %425 = vector.extract_strided_slice %418 {offsets = [0, 48], sizes = [2, 16], strides = [1, 1]} : vector<2x64xf32> to vector<2x16xf32>
    %426 = math.tanh %425 : vector<2x16xf32>
    %427 = vector.extract_strided_slice %424 {offsets = [0, 16], sizes = [2, 16], strides = [1, 1]} : vector<2x48xf32> to vector<2x16xf32>
    %428 = arith.mulf %427, %413 : vector<2x16xf32>
    %429 = vector.extract_strided_slice %424 {offsets = [0, 0], sizes = [2, 16], strides = [1, 1]} : vector<2x48xf32> to vector<2x16xf32>
    %430 = arith.mulf %429, %426 : vector<2x16xf32>
    %431 = arith.addf %428, %430 : vector<2x16xf32>
    %432 = vector.extract_strided_slice %424 {offsets = [0, 32], sizes = [2, 16], strides = [1, 1]} : vector<2x48xf32> to vector<2x16xf32>
    %433 = math.tanh %431 : vector<2x16xf32>
    %434 = arith.mulf %432, %433 : vector<2x16xf32>
    %cst_97 = arith.constant dense<0.000000e+00> : vector<2x64xf32>
    %435 = tpu.matmul %434, %324, %cst_97 {dimension_numbers = #tpu.dot_dimension_numbers<[1], [0], [0], [1], [0, 0, 1, 1], [], []>} : vector<2x16xf32>, vector<16x64xf32>, vector<2x64xf32> -> vector<2x64xf32>
    %436 = arith.addf %320, %435 : vector<2x64xf32>
    %437 = vector.extract_strided_slice %436 {offsets = [0, 0], sizes = [2, 48], strides = [1, 1]} : vector<2x64xf32> to vector<2x48xf32>
    %438 = arith.negf %437 : vector<2x48xf32>
    %439 = math.exp %438 : vector<2x48xf32>
    %cst_98 = arith.constant 1.000000e+00 : f32
    %440 = vector.broadcast %cst_98 : f32 to vector<2x48xf32>
    %441 = arith.addf %440, %439 : vector<2x48xf32>
    %442 = arith.divf %440, %441 : vector<2x48xf32>
    %443 = vector.extract_strided_slice %436 {offsets = [0, 48], sizes = [2, 16], strides = [1, 1]} : vector<2x64xf32> to vector<2x16xf32>
    %444 = math.tanh %443 : vector<2x16xf32>
    %445 = vector.extract_strided_slice %442 {offsets = [0, 16], sizes = [2, 16], strides = [1, 1]} : vector<2x48xf32> to vector<2x16xf32>
    %446 = arith.mulf %445, %431 : vector<2x16xf32>
    %447 = vector.extract_strided_slice %442 {offsets = [0, 0], sizes = [2, 16], strides = [1, 1]} : vector<2x48xf32> to vector<2x16xf32>
    %448 = arith.mulf %447, %444 : vector<2x16xf32>
    %449 = arith.addf %446, %448 : vector<2x16xf32>
    %450 = vector.extract_strided_slice %442 {offsets = [0, 32], sizes = [2, 16], strides = [1, 1]} : vector<2x48xf32> to vector<2x16xf32>
    %451 = math.tanh %449 : vector<2x16xf32>
    %452 = arith.mulf %450, %451 : vector<2x16xf32>
    %cst_99 = arith.constant dense<0.000000e+00> : vector<2x64xf32>
    %453 = tpu.matmul %452, %324, %cst_99 {dimension_numbers = #tpu.dot_dimension_numbers<[1], [0], [0], [1], [0, 0, 1, 1], [], []>} : vector<2x16xf32>, vector<16x64xf32>, vector<2x64xf32> -> vector<2x64xf32>
    %454 = arith.addf %323, %453 : vector<2x64xf32>
    %455 = vector.extract_strided_slice %454 {offsets = [0, 0], sizes = [2, 48], strides = [1, 1]} : vector<2x64xf32> to vector<2x48xf32>
    %456 = arith.negf %455 : vector<2x48xf32>
    %457 = math.exp %456 : vector<2x48xf32>
    %cst_100 = arith.constant 1.000000e+00 : f32
    %458 = vector.broadcast %cst_100 : f32 to vector<2x48xf32>
    %459 = arith.addf %458, %457 : vector<2x48xf32>
    %460 = arith.divf %458, %459 : vector<2x48xf32>
    %461 = vector.extract_strided_slice %454 {offsets = [0, 48], sizes = [2, 16], strides = [1, 1]} : vector<2x64xf32> to vector<2x16xf32>
    %462 = math.tanh %461 : vector<2x16xf32>
    %463 = vector.extract_strided_slice %460 {offsets = [0, 16], sizes = [2, 16], strides = [1, 1]} : vector<2x48xf32> to vector<2x16xf32>
    %464 = arith.mulf %463, %449 : vector<2x16xf32>
    %465 = vector.extract_strided_slice %460 {offsets = [0, 0], sizes = [2, 16], strides = [1, 1]} : vector<2x48xf32> to vector<2x16xf32>
    %466 = arith.mulf %465, %462 : vector<2x16xf32>
    %467 = arith.addf %464, %466 : vector<2x16xf32>
    %468 = vector.extract_strided_slice %460 {offsets = [0, 32], sizes = [2, 16], strides = [1, 1]} : vector<2x48xf32> to vector<2x16xf32>
    %469 = math.tanh %467 : vector<2x16xf32>
    %470 = arith.mulf %468, %469 : vector<2x16xf32>
    %c0_101 = arith.constant 0 : index
    %c0_102 = arith.constant 0 : index
    %471 = vector.load %arg6[%c0_101, %c0_102] : memref<16x32xf32, #tpu.memory_space<vmem>>, vector<16x32xf32>
    %cst_103 = arith.constant dense<0.000000e+00> : vector<2x32xf32>
    %472 = tpu.matmul %470, %471, %cst_103 {dimension_numbers = #tpu.dot_dimension_numbers<[1], [0], [0], [1], [0, 0, 1, 1], [], []>} : vector<2x16xf32>, vector<16x32xf32>, vector<2x32xf32> -> vector<2x32xf32>
    %c0_104 = arith.constant 0 : index
    %c0_105 = arith.constant 0 : index
    %473 = vector.load %arg7[%c0_104, %c0_105] : memref<1x32xf32, #tpu.memory_space<vmem>>, vector<1x32xf32>
    %474 = vector.broadcast %473 : vector<1x32xf32> to vector<2x32xf32>
    %475 = arith.addf %472, %474 : vector<2x32xf32>
    %cst_106 = arith.constant 0.000000e+00 : f32
    %476 = vector.broadcast %cst_106 : f32 to vector<2x32xf32>
    %477 = arith.maximumf %475, %476 : vector<2x32xf32>
    %c0_107 = arith.constant 0 : index
    %c0_108 = arith.constant 0 : index
    %478 = vector.load %arg8[%c0_107, %c0_108] : memref<32x8xf32, #tpu.memory_space<vmem>>, vector<32x8xf32>
    %cst_109 = arith.constant dense<0.000000e+00> : vector<2x8xf32>
    %479 = tpu.matmul %477, %478, %cst_109 {dimension_numbers = #tpu.dot_dimension_numbers<[1], [0], [0], [1], [0, 0, 1, 1], [], []>} : vector<2x32xf32>, vector<32x8xf32>, vector<2x8xf32> -> vector<2x8xf32>
    %c0_110 = arith.constant 0 : index
    %c0_111 = arith.constant 0 : index
    %480 = vector.load %arg9[%c0_110, %c0_111] : memref<1x8xf32, #tpu.memory_space<vmem>>, vector<1x8xf32>
    %481 = vector.broadcast %480 : vector<1x8xf32> to vector<2x8xf32>
    %482 = arith.addf %479, %481 : vector<2x8xf32>
    %c0_112 = arith.constant 0 : index
    %c0_113 = arith.constant 0 : index
    %483 = vector.load %arg10[%c0_112, %c0_113] : memref<8x8xf32, #tpu.memory_space<vmem>>, vector<8x8xf32>
    %cst_114 = arith.constant dense<0.000000e+00> : vector<2x8xf32>
    %484 = tpu.matmul %482, %483, %cst_114 {dimension_numbers = #tpu.dot_dimension_numbers<[1], [0], [0], [1], [0, 0, 1, 1], [], []>} : vector<2x8xf32>, vector<8x8xf32>, vector<2x8xf32> -> vector<2x8xf32>
    %c0_115 = arith.constant 0 : index
    %c0_116 = arith.constant 0 : index
    %485 = vector.load %arg11[%c0_115, %c0_116] : memref<1x8xf32, #tpu.memory_space<vmem>>, vector<1x8xf32>
    %486 = vector.broadcast %485 : vector<1x8xf32> to vector<2x8xf32>
    %487 = arith.addf %484, %486 : vector<2x8xf32>
    %cst_117 = arith.constant dense<0xFF800000> : vector<2xf32>
    %488 = vector.multi_reduction <maximumf>, %487, %cst_117 [1] : vector<2x8xf32> to vector<2xf32>
    %489 = vector.shape_cast %488 : vector<2xf32> to vector<2x1xf32>
    %490 = vector.broadcast %489 : vector<2x1xf32> to vector<2x8xf32>
    %491 = arith.subf %487, %490 : vector<2x8xf32>
    %492 = math.exp %491 : vector<2x8xf32>
    %cst_118 = arith.constant dense<0.000000e+00> : vector<2xf32>
    %493 = vector.multi_reduction <add>, %492, %cst_118 [1] : vector<2x8xf32> to vector<2xf32>
    %494 = vector.shape_cast %493 : vector<2xf32> to vector<2x1xf32>
    %495 = vector.broadcast %494 : vector<2x1xf32> to vector<2x8xf32>
    %496 = arith.divf %492, %495 : vector<2x8xf32>
    %c0_119 = arith.constant 0 : index
    %c0_120 = arith.constant 0 : index
    %497 = vector.load %arg12[%c0_119, %c0_120] : memref<2x8xf32, #tpu.memory_space<vmem>>, vector<2x8xf32>
    tpu.vector_store %arg12[%c0_119, %c0_120], %496 {strides = array<i32>} : memref<2x8xf32, #tpu.memory_space<vmem>>, vector<2x8xf32>,
    return
  }
}

</mosaic_0001>

<bundles_post_ra>
// kernel: crnn_forward.1
= control target key start
LH: loop header
LB: loop body
LE: loop exit
PB: predicated region body
PF: predicated region fallthrough
CT: control target
= control target key end

     0   :  { %17 = vsyncpa [#allocation4], 0  ;;  %s9691_s0 = inlined_call_operand.vmem [shape: f32[2,18,18], index: 0, kind: input, shape index: {}]   ;;  %s9692_s1 = inlined_call_operand.vmem [shape: f32[4,9], index: 1, kind: input, shape index: {}]   ;;  %s9693_s2 = inlined_call_operand.vmem [shape: f32[4], index: 2, kind: input, shape index: {}]   ;;  %s9694_s3 = inlined_call_operand.vmem [shape: f32[32,64], index: 3, kind: input, shape index: {}]   ;;  %s9695_s4 = inlined_call_operand.vmem [shape: f32[16,64], index: 4, kind: input, shape index: {}]   ;;  %s9696_s5 = inlined_call_operand.vmem [shape: f32[1,64], index: 5, kind: input, shape index: {}]   ;;  %s9697_s6 = inlined_call_operand.vmem [shape: f32[16,32], index: 6, kind: input, shape index: {}]   ;;  %s9698_s7 = inlined_call_operand.vmem [shape: f32[1,32], index: 7, kind: input, shape index: {}]   ;;  %s9699_s8 = inlined_call_operand.vmem [shape: f32[32,8], index: 8, kind: input, shape index: {}]   ;;  %s9700_s9 = inlined_call_operand.vmem [shape: f32[1,8], index: 9, kind: input, shape index: {}]   ;;  %s9701_s10 = inlined_call_operand.vmem [shape: f32[8,8], index: 10, kind: input, shape index: {}]   ;;  %s9702_s11 = inlined_call_operand.vmem [shape: f32[1,8], index: 11, kind: input, shape index: {}]   ;;  %s9703_s12 = inlined_call_operand.hbm [shape: f32[2,8], index: 12, kind: output, shape index: {}]  }
   0x1   :  { %18 = vsyncpa [#allocation6], 0 }
   0x2   :  { %19 = vsyncpa [#allocation3], 0  ;;  %s28_s23 = sshll.u32 %s9692_s1, 4  ;;  %s38_s26 = sshll.u32 %s9693_s2, 4  ;;  %s29_s23 = int_to_ptr.vmem [resolvable:$true] %s28_s23  ;;  %s39_s26 = int_to_ptr.vmem [resolvable:$true] %s38_s26 }
   0x3   :  { %s6295_s27 = scalar_lea.vmem %s29_s23, 64  ;;  %p6300_p1 = scmp.lt.s32.totalorder %s29_s23, %s29_s23 }
   0x4   :  { %p6296_p0 = scmp.ne.s32.totalorder %s29_s23, %s6295_s27  ;;  %p6301_p2 = scmp.lt.s32.totalorder %s6295_s27, %s6295_s27 }
   0x6   :  { %p6302_p3 = por %p6301_p2, %p6300_p1 }
   0x8   :  { %p6303_p4 = pnand %p6302_p3, %p6296_p0 }
   0xa   :  { %6306 = shalt.err (!%p6303_p4)
}
   0xb   :  { %s6347_s28 = smov [#allocation2]   ;;  %s6307_s29 = scalar_lea.vmem %s39_s26, 16 }
   0xc   :  { %31 = dma.vmem_to_smem %s29_s23, 64, %s6347_s28, [#allocation4]  }
   0xd   :  { %p6308_p5 = scmp.ne.s32.totalorder %s39_s26, %s6307_s29  ;;  %p6312_p6 = scmp.lt.s32.totalorder %s39_s26, %s39_s26 }
   0xe   :  { %p6313_p7 = scmp.lt.s32.totalorder %s6307_s29, %s6307_s29 }
  0x10   :  { %p6314_p8 = por %p6313_p7, %p6312_p6 }
  0x12   :  { %p6315_p9 = pnand %p6314_p8, %p6308_p5 }
  0x14   :  { %6318 = shalt.err (!%p6315_p9)
}
  0x15   :  { %s6348_s1 = smov [#allocation5]  }
  0x16   :  { %41 = dma.vmem_to_smem %s39_s26, 16, %s6348_s1, [#allocation6]  }
  0x17   :  { %6341 = dma.done.wait [#allocation4], 64  }
  0x18   :  { %6342 = vsyncadd [#allocation4], 4294967232 }
  0x19   :  { %6343 = dma.done.wait [#allocation6], 16  }
  0x1a   :  { %6344 = vsyncadd [#allocation6], 4294967280 }
  0x1b   :  { %66 = sfence }
  0x1c   :  { %s5953_s2 = sld [smem:[#allocation2 + $0x83]]  ;;  %s5954_s13 = sld [smem:[#allocation2 + $0x84]]  ;;  %v6464_v0 = vld [vmem:[%s9691_s0 + $0x18] sm:$0xff]  ;;  %v6469_v1 = vld [vmem:[%s9691_s0] sm:$0xff]  ;;  %v6474_v2 = vld [vmem:[%s9691_s0 + $0x8] sm:$0xff]  ;;  %vm200_vm0 = vcmask 1046528  }
  0x1d   :  { %s5962_s30 = sld [smem:[#allocation2 + $0x103]]  ;;  %s5963_s15 = sld [smem:[#allocation2 + $0x104]]  ;;  %v6508_v17 = vld [vmem:[%s9691_s0 + $0x20] sm:$0xff]  ;;  %v6561_v39 = vld [vmem:[%s9691_s0 + $0x10] sm:$0x3]  ;;  %vm216_vm1 = vcmask 1045504  }
  0x1e   :  { %s5971_s14 = sld [smem:[#allocation2 + $0x183]]  ;;  %s5955_s22 = sld [smem:[#allocation2 + $0x85]]  ;;  %vm752_vm2 = vcmask 130048   ;;  %vm755_vm3 = vcmask 261120   ;;  %vm758_vm4 = vcmask 392192   ;;  %vm3887_vm5 = vcmask 15360  }
  0x1f   :  { %s6349_s23 = smov 127   ;;  %s5972_s26 = sld [smem:[#allocation2 + $0x184]]  ;;  %vm4422_vm6 = vcmask 130112   ;;  %vm4429_vm7 = vcmask 195712   ;;  %vm4436_vm8 = vcmask 261312   ;;  %vm4723_vm9 = vcmask 1041409  }
  0x20   :  { %s5964_s27 = sld [smem:[#allocation2 + $0x105]]  ;;  %s5957_s16 = sld [smem:[#allocation2 + $0x87]]  ;;  %vm4725_vm10 = vcmask 1042434   ;;  %vm6387_vm11 = vmmov 0   ;;  %vm4727_vm12 = vcmask 1043459   ;;  %vm4729_vm13 = vcmask 1044484  }
  0x21   :  { %s5973_s1 = sld [smem:[#allocation2 + $0x185]]  ;;  %s5974_s17 = sld [smem:[#allocation2 + $0x186]]  ;;  %vm4731_vm14 = vcmask 1045509   ;;  %vm4733_vm15 = vcmask 1046534  }
  0x22   :  { %v6476_v3 = vstv %s5953_s2  ;;  %v6484_v7 = vstv %s5954_s13  ;;  %s5956_s2 = sld [smem:[#allocation2 + $0x86]]  ;;  %s5966_s18 = sld [smem:[#allocation2 + $0x107]] }
  0x23   :  { %v933_v4 = vmul.f32 %v6464_v0, %v6476_v3  ;;  %v360_v5 = vmul.f32 %v6469_v1, %v6476_v3  ;;  %v6482_v6 = vstv %s5962_s30  ;;  %v372_v8 = vmul.f32 %v6469_v1, %v6484_v7  ;;  %s5958_s19 = sld [smem:[#allocation2 + $0x88]]  ;;  %s5975_s20 = sld [smem:[#allocation2 + $0x187]] }
  0x24   :  { %v6490_v9 = vmul.f32 %v6474_v2, %v6484_v7  ;;  %v1067_v10 = vmul.f32 %v6464_v0, %v6482_v6  ;;  %v494_v11 = vmul.f32 %v6469_v1, %v6482_v6  ;;  %v6498_v12 = vstv %s5963_s15  ;;  %s5965_s15 = sld [smem:[#allocation2 + $0x106]]  ;;  %s5967_s21 = sld [smem:[#allocation2 + $0x108]] }
  0x25   :  { %937 = vrot.lane.b32.xlu1 %v933_v4, %s6349_s23  ;;  %364 = vrot.lane.b32.xlu0 %v360_v5, %s6349_s23  ;;  %v378_v13 = vrot.slane %v372_v8, 1  ;;  %v6501_v15 = vstv %s5971_s14  ;;  %v506_v16 = vmul.f32 %v6469_v1, %v6498_v12  ;;  %v6512_v18 = vmul.f32 %v6474_v2, %v6498_v12  ;;  %s6350_s14 = smov 126   ;;  %s5945_s24 = sld [smem:[#allocation2 + $0x4]] }
  0x26   :  { %v379_v14 = vrot.slane %v6490_v9, 1  ;;  %v628_v19 = vmul.f32 %v6469_v1, %v6501_v15  ;;  %v945_v20 = vmul.f32 %v6464_v0, %v6484_v7  ;;  %v6522_v21 = vmul.f32 %v6508_v17, %v6484_v7  ;;  %s5946_s25 = sld [smem:[#allocation2 + $0x5]]  ;;  %s5943_s28 = sld [smem:[#allocation2 + $0x2]] }
  0x27   :  { %v512_v23 = vrot.slane %v506_v16, 1  ;;  %v513_v24 = vrot.slane %v6512_v18, 1  ;;  %v6526_v25 = vstv %s5955_s22  ;;  %v361_v26 = vmul.f32 %v6474_v2, %v6476_v3  ;;  %s5976_s22 = sld [smem:[#allocation2 + $0x188]]  ;;  %s7105_s30 = sld [smem:[#allocation2 + $0x7]] }
  0x28   :  { %v380_v22 = vsel %vm200_vm0, %v378_v13, %v379_v14  ;;  %v951_v27 = vrot.slane %v945_v20, 1  ;;  %v952_v28 = vrot.slane %v6522_v21, 1  ;;  %v391_v30 = vmul.f32 %v6469_v1, %v6526_v25  ;;  %s67_s29 = sld [smem:[#allocation2]] }
  0x29   :  { %1071 = vrot.lane.b32.xlu1 %v1067_v10, %s6349_s23  ;;  %498 = vrot.lane.b32.xlu0 %v494_v11, %s6349_s23  ;;  %v514_v29 = vsel %vm200_vm0, %v512_v23, %v513_v24  ;;  %v6540_v31 = vmul.f32 %v6474_v2, %v6526_v25  ;;  %v6542_v32 = vstv %s5972_s26  ;;  %v1201_v33 = vmul.f32 %v6464_v0, %v6501_v15  ;;  %s5944_s26 = sld [smem:[#allocation2 + $0x3]]  ;;  %s5949_s13 = sld [smem:[#allocation2 + $0x8]] }
  0x2a   :  { %v953_v34 = vsel %vm200_vm0, %v951_v27, %v952_v28  ;;  %v397_v35 = vrot.slane %v391_v30, 2  ;;  %v640_v37 = vmul.f32 %v6469_v1, %v6542_v32  ;;  %v6556_v38 = vmul.f32 %v6474_v2, %v6542_v32 }
  0x2b   :  { %v398_v36 = vrot.slane %v6540_v31, 2  ;;  %v495_v40 = vmul.f32 %v6474_v2, %v6482_v6  ;;  %v374_v41 = vmul.f32 %v6561_v39, %v6484_v7  ;;  %v1079_v42 = vmul.f32 %v6464_v0, %v6498_v12 }
  0x2c   :  { %v646_v44 = vrot.slane %v640_v37, 1  ;;  %v647_v45 = vrot.slane %v6556_v38, 1  ;;  %v6577_v46 = vmul.f32 %v6508_v17, %v6498_v12  ;;  %v6579_v47 = vstv %s5964_s27  ;;  %s5942_s27 = sld [smem:[#allocation2 + $0x1]] }
  0x2d   :  { %383 = vrot.lane.b32.xlu1 %v380_v22, %s6349_s23  ;;  %632 = vrot.lane.b32.xlu0 %v628_v19, %s6349_s23  ;;  %v399_v43 = vsel %vm216_vm1, %v397_v35, %v398_v36  ;;  %v934_v48 = vmul.f32 %v6508_v17, %v6476_v3  ;;  %v381_v49 = vrot.slane %v374_v41, 1  ;;  %v1085_v50 = vrot.slane %v1079_v42, 1 }
  0x2e   :  { %v648_v51 = vsel %vm200_vm0, %v646_v44, %v647_v45  ;;  %v1086_v52 = vrot.slane %v6577_v46, 1  ;;  %v525_v53 = vmul.f32 %v6469_v1, %v6579_v47  ;;  %v6593_v54 = vmul.f32 %v6474_v2, %v6579_v47 }
  0x2f   :  { %v964_v55 = vmul.f32 %v6464_v0, %v6526_v25  ;;  %v6601_v56 = vmul.f32 %v6508_v17, %v6526_v25  ;;  %v382_v57 = vsel %vm200_vm0, %v379_v14, %v381_v49  ;;  %v629_v61 = vmul.f32 %v6474_v2, %v6501_v15 }
  0x30   :  { %v1087_v58 = vsel %vm200_vm0, %v1085_v50, %v1086_v52  ;;  %v531_v59 = vrot.slane %v525_v53, 2  ;;  %v532_v60 = vrot.slane %v6593_v54, 2  ;;  %v1213_v4 = vmul.f32 %v6464_v0, %v6542_v32 }
  0x31   :  { %517 = vrot.lane.b32.xlu1 %v514_v29, %s6349_s23  ;;  %366 = vrot.lane.b32.xlu0 %v361_v26, %s6349_s23  ;;  %v970_v62 = vrot.slane %v964_v55, 2  ;;  %v971_v63 = vrot.slane %v6601_v56, 2  ;;  %v6620_v5 = vmul.f32 %v6508_v17, %v6542_v32  ;;  %v6622_v8 = vstv %s5973_s1  ;;  %s7016_s1 = sld [smem:[#allocation5]] }
  0x32   :  { %v533_v3 = vsel %vm216_vm1, %v531_v59, %v532_v60  ;;  %v1068_v9 = vmul.f32 %v6508_v17, %v6482_v6  ;;  %v6628_v10 = vstv %s5956_s2  ;;  %v659_v11 = vmul.f32 %v6469_v1, %v6622_v8  ;;  %v6645_v6 = vld [vmem:[%s9691_s0 + $0x28] sm:$0x3]  ;;  %s7084_s2 = sld [smem:[#allocation2 + $0x6]] }
  0x33   :  { %v6634_v13 = vmul.f32 %v6474_v2, %v6622_v8  ;;  %v972_v14 = vsel %vm216_vm1, %v970_v62, %v971_v63  ;;  %v1219_v16 = vrot.slane %v1213_v4, 1  ;;  %v1220_v19 = vrot.slane %v6620_v5, 1 }
  0x34   :  { %v508_v20 = vmul.f32 %v6561_v39, %v6498_v12  ;;  %v410_v22 = vmul.f32 %v6469_v1, %v6628_v10  ;;  %v665_v23 = vrot.slane %v659_v11, 2  ;;  %v1098_v27 = vmul.f32 %v6464_v0, %v6579_v47 }
  0x35   :  { %1205 = vrot.lane.b32.xlu1 %v1201_v33, %s6349_s23  ;;  %956 = vrot.lane.b32.xlu0 %v953_v34, %s6349_s23  ;;  %v666_v26 = vrot.slane %v6634_v13, 2  ;;  %v1221_v29 = vsel %vm200_vm0, %v1219_v16, %v1220_v19  ;;  %v6659_v33 = vmul.f32 %v6508_v17, %v6579_v47  ;;  %v947_v34 = vmul.f32 %v6645_v6, %v6484_v7 }
  0x36   :  { %v515_v30 = vrot.slane %v508_v20, 1  ;;  %v1104_v35 = vrot.slane %v1098_v27, 2  ;;  %v393_v37 = vmul.f32 %v6561_v39, %v6526_v25  ;;  %v1081_v49 = vmul.f32 %v6645_v6, %v6498_v12 }
  0x37   :  { %v1105_v42 = vrot.slane %v6659_v33, 2  ;;  %v954_v7 = vrot.slane %v947_v34, 1  ;;  %v1232_v55 = vmul.f32 %v6464_v0, %v6622_v8  ;;  %v6729_v46 = vstv %s5974_s17  ;;  %s5952_s17 = sld [smem:[#allocation2 + $0x82]] }
  0x38   :  { %v516_v41 = vsel %vm200_vm0, %v513_v24, %v515_v30  ;;  %v400_v18 = vrot.slane %v393_v37, 2  ;;  %v642_v24 = vmul.f32 %v6561_v39, %v6542_v32  ;;  %v966_v11 = vmul.f32 %v6645_v6, %v6526_v25 }
  0x39   :  { %500 = vrot.lane.b32.xlu1 %v495_v40, %s6349_s23  ;;  %402 = vrot.lane.b32.xlu0 %v399_v43, %s6349_s23  ;;  %v667_v40 = vsel %vm216_vm1, %v665_v23, %v666_v26  ;;  %v1106_v43 = vsel %vm216_vm1, %v1104_v35, %v1105_v42  ;;  %v955_v44 = vsel %vm200_vm0, %v952_v28, %v954_v7  ;;  %v6693_v28 = vstv %s5965_s15  ;;  %s5951_s15 = sld [smem:[#allocation2 + $0x81]] }
  0x3a   :  { %v401_v21 = vsel %vm216_vm1, %v398_v36, %v400_v18  ;;  %v649_v50 = vrot.slane %v642_v24, 1  ;;  %v544_v53 = vmul.f32 %v6469_v1, %v6693_v28  ;;  %v1238_v62 = vrot.slane %v1232_v55, 2 }
  0x3b   :  { %v973_v20 = vrot.slane %v966_v11, 2  ;;  %v6748_v23 = vstv %s5966_s18  ;;  %v1117_v25 = vmul.f32 %v6464_v0, %v6693_v28  ;;  %v661_v27 = vmul.f32 %v6561_v39, %v6622_v8  ;;  %s5977_s18 = sld [smem:[#allocation5 + $0x1]] }
  0x3c   :  { %v650_v31 = vsel %vm200_vm0, %v647_v45, %v649_v50  ;;  %v983_v45 = vmul.f32 %v6464_v0, %v6628_v10  ;;  %v411_v30 = vmul.f32 %v6474_v2, %v6628_v10  ;;  %v1100_v56 = vmul.f32 %v6645_v6, %v6579_v47 }
  0x3d   :  { %939 = vrot.lane.b32.xlu1 %v934_v48, %s6349_s23  ;;  %651 = vrot.lane.b32.xlu0 %v648_v51, %s6349_s23  ;;  %v1202_v48 = vmul.f32 %v6508_v17, %v6501_v15  ;;  %v6695_v51 = vstv %s5957_s16  ;;  %v1088_v15 = vrot.slane %v1081_v49, 1  ;;  %v974_v54 = vsel %vm216_vm1, %v971_v63, %v973_v20  ;;  %s5950_s16 = sld [smem:[#allocation2 + $0x80]] }
  0x3e   :  { %v422_v12 = vmul.f32 %v6469_v1, %v6695_v51  ;;  %v6708_v36 = vmul.f32 %v6474_v2, %v6695_v51  ;;  %v995_v63 = vmul.f32 %v6464_v0, %v6695_v51  ;;  %v6775_v34 = vmul.f32 %v6508_v17, %v6695_v51 }
  0x3f   :  { %v1089_v38 = vsel %vm200_vm0, %v1086_v52, %v1088_v15  ;;  %v668_v37 = vrot.slane %v661_v27, 2  ;;  %v6781_v7 = vstv %s5958_s19  ;;  %v1251_v33 = vmul.f32 %v6464_v0, %v6729_v46  ;;  %s5959_s19 = sld [smem:[#allocation2 + $0x100]] }
  0x40   :  { %v428_v59 = vrot.slane %v422_v12, 1  ;;  %v441_v18 = vmul.f32 %v6469_v1, %v6781_v7  ;;  %v6796_v24 = vmul.f32 %v6474_v2, %v6781_v7  ;;  %v6827_v55 = vmul.f32 %v6508_v17, %v6748_v23 }
  0x41   :  { %385 = vrot.lane.b32.xlu1 %v382_v57, %s6349_s23  ;;  %1090 = vrot.lane.b32.xlu0 %v1087_v58, %s6349_s23  ;;  %v6714_v57 = vmul.f32 %v6508_v17, %v6622_v8  ;;  %v527_v58 = vmul.f32 %v6561_v39, %v6579_v47  ;;  %v1107_v47 = vrot.slane %v1100_v56, 2  ;;  %v669_v5 = vsel %vm216_vm1, %v666_v26, %v668_v37 }
  0x42   :  { %v447_v49 = vrot.slane %v441_v18, 2 }
  0x43   :  { %v1108_v13 = vsel %vm216_vm1, %v1105_v42, %v1107_v47  ;;  %v1129_v42 = vmul.f32 %v6464_v0, %v6748_v23 }
  0x45   :  { %634 = vrot.lane.b32.xlu1 %v629_v61, %s6349_s23  ;;  %536 = vrot.lane.b32.xlu0 %v533_v3, %s6349_s23  ;;  %v429_v61 = vrot.slane %v6708_v36, 1  ;;  %v1239_v3 = vrot.slane %v6714_v57, 2  ;;  %v558_v36 = vmul.f32 %v6561_v39, %v6748_v23 }
  0x47   :  { %v430_v52 = vsel %vm200_vm0, %v428_v59, %v429_v61  ;;  %v1240_v4 = vsel %vm216_vm1, %v1238_v62, %v1239_v3  ;;  %v1135_v59 = vrot.slane %v1129_v42, 1  ;;  %v1136_v62 = vrot.slane %v6827_v55, 1 }
  0x49   :  { %1073 = vrot.lane.b32.xlu1 %v1068_v9, %s6349_s23  ;;  %975 = vrot.lane.b32.xlu0 %v972_v14, %s6349_s23  ;;  %v534_v9 = vrot.slane %v527_v58, 2  ;;  %v678_v14 = vmul.f32 %v6469_v1, %v6729_v46 }
  0x4b   :  { %v535_v16 = vsel %vm216_vm1, %v532_v60, %v534_v9  ;;  %v984_v9 = vmul.f32 %v6508_v17, %v6628_v10  ;;  %v1014_v10 = vmul.f32 %v6464_v0, %v6781_v7 }
  0x4d   :  { %414 = vrot.lane.b32.xlu1 %v410_v22, %s6350_s14  ;;  %1224 = vrot.lane.b32.xlu0 %v1221_v29, %s6349_s23  ;;  %v1215_v22 = vmul.f32 %v6645_v6, %v6542_v32  ;;  %v556_v32 = vmul.f32 %v6469_v1, %v6748_v23  ;;  %v6763_v29 = vmul.f32 %v6474_v2, %v6748_v23 }
  0x4f   :  { %v1222_v60 = vrot.slane %v1215_v22, 1  ;;  %v6862_v22 = vmul.f32 %v6508_v17, %v6781_v7 }
  0x51   :  { %670 = vrot.lane.b32.xlu1 %v667_v40, %s6349_s23  ;;  %519 = vrot.lane.b32.xlu0 %v516_v41, %s6349_s23  ;;  %v1223_v35 = vsel %vm200_vm0, %v1220_v19, %v1222_v60  ;;  %v562_v40 = vrot.slane %v556_v32, 1  ;;  %v563_v41 = vrot.slane %v6763_v29, 1  ;;  %v679_v32 = vmul.f32 %v6474_v2, %v6729_v46 }
  0x52   :  { %v1021_v56 = vrot.slane %v6862_v22, 2 }
  0x53   :  { %v564_v19 = vsel %vm200_vm0, %v562_v40, %v563_v41  ;;  %v565_v40 = vrot.slane %v558_v36, 1 }
  0x55   :  { %1109 = vrot.lane.b32.xlu1 %v1106_v43, %s6349_s23  ;;  %958 = vrot.lane.b32.xlu0 %v955_v44, %s6349_s23  ;;  %v1001_v43 = vrot.slane %v995_v63, 1  ;;  %v1002_v44 = vrot.slane %v6775_v34, 1  ;;  %v6887_v63 = vstv %s5976_s22  ;;  %s6355_s22 = smov 120  }
  0x56   :  { %v6903_v18 = vmul.f32 %v6474_v2, %v6887_v63 }
  0x57   :  { %v1003_v26 = vsel %vm200_vm0, %v1001_v43, %v1002_v44 }
  0x59   :  { %404 = vrot.lane.b32.xlu1 %v401_v21, %s6349_s23  ;;  %1207 = vrot.lane.b32.xlu0 %v1202_v48, %s6349_s23  ;;  %v6798_v48 = vstv %s5975_s20  ;;  %v448_v21 = vrot.slane %v6796_v24, 2  ;;  %s5961_s20 = sld [smem:[#allocation2 + $0x102]] }
  0x5a   :  { %v690_v50 = vmul.f32 %v6469_v1, %v6798_v48  ;;  %v1263_v57 = vmul.f32 %v6464_v0, %v6798_v48  ;;  %v692_v42 = vmul.f32 %v6561_v39, %v6798_v48 }
  0x5b   :  { %v449_v15 = vsel %vm216_vm1, %v447_v49, %v448_v21 }
  0x5c   :  { %v696_v12 = vrot.slane %v690_v50, 1  ;;  %v1269_v47 = vrot.slane %v1263_v57, 1  ;;  %v1265_v57 = vmul.f32 %v6645_v6, %v6798_v48 }
  0x5d   :  { %653 = vrot.lane.b32.xlu1 %v650_v31, %s6349_s23  ;;  %548 = vrot.lane.b32.xlu0 %v544_v53, %s6350_s14  ;;  %v6813_v53 = vmul.f32 %v6474_v2, %v6798_v48 }
  0x5f   :  { %v697_v31 = vrot.slane %v6813_v53, 1 }
  0x61   :  { %1092 = vrot.lane.b32.xlu1 %v1089_v38, %s6349_s23  ;;  %987 = vrot.lane.b32.xlu0 %v983_v45, %s6350_s14  ;;  %v545_v38 = vmul.f32 %v6474_v2, %v6693_v28  ;;  %v424_v45 = vmul.f32 %v6561_v39, %v6695_v51  ;;  %v698_v58 = vsel %vm200_vm0, %v696_v12, %v697_v31 }
  0x63   :  { %v431_v11 = vrot.slane %v424_v45, 1 }
  0x65   :  { %433 = vrot.lane.b32.xlu1 %v430_v52, %s6350_s14  ;;  %1243 = vrot.lane.b32.xlu0 %v1240_v4, %s6349_s23  ;;  %v1234_v52 = vmul.f32 %v6645_v6, %v6622_v8  ;;  %v6841_v4 = vstv %s5967_s21  ;;  %s5978_s21 = sld [smem:[#allocation5 + $0x2]] }
  0x66   :  { %v575_v20 = vmul.f32 %v6469_v1, %v6841_v4  ;;  %v6854_v8 = vmul.f32 %v6474_v2, %v6841_v4 }
  0x68   :  { %v582_v60 = vrot.slane %v6854_v8, 2  ;;  %v7000_v8 = vstv %s5945_s24  ;;  %s6356_s24 = smov 122  }
  0x69   :  { %682 = vrot.lane.b32.xlu1 %v678_v14, %s6350_s14  ;;  %538 = vrot.lane.b32.xlu0 %v535_v16, %s6349_s23  ;;  %v1137_v14 = vsel %vm200_vm0, %v1135_v59, %v1136_v62  ;;  %v1241_v16 = vrot.slane %v1234_v52, 2  ;;  %v1252_v59 = vmul.f32 %v6508_v17, %v6729_v46 }
  0x6b   :  { %v1242_v27 = vsel %vm216_vm1, %v1239_v3, %v1241_v16  ;;  %v6885_v3 = vmul.f32 %v6508_v17, %v6798_v48  ;;  %v1284_v48 = vmul.f32 %v6645_v6, %v6887_v63 }
  0x6d   :  { %1121 = vrot.lane.b32.xlu1 %v1117_v25, %s6350_s14  ;;  %977 = vrot.lane.b32.xlu0 %v974_v54, %s6349_s23  ;;  %v432_v25 = vsel %vm200_vm0, %v429_v61, %v431_v11  ;;  %v581_v54 = vrot.slane %v575_v20, 2  ;;  %v1270_v43 = vrot.slane %v6885_v3, 1  ;;  %v1283_v11 = vmul.f32 %v6508_v17, %v6887_v63 }
  0x6e   :  { %v7020_v3 = vstv %s5946_s25  ;;  %s7315_s25 = sld [smem:[#allocation2 + $0x181]] }
  0x6f   :  { %v583_v61 = vsel %vm216_vm1, %v581_v54, %v582_v60  ;;  %v1289_v54 = vrot.slane %v1283_v11, 2  ;;  %v7061_v11 = vstv %s67_s29  ;;  %s9753_s29 = smov 108  }
  0x70   :  { %9854 = vst [vmem:[#allocation18_spill] sm:$0xff] %v7061_v11 }
  0x71   :  { %416 = vrot.lane.b32.xlu1 %v411_v30, %s6350_s14  ;;  %1226 = vrot.lane.b32.xlu0 %v1223_v35, %s6349_s23  ;;  %v1020_v30 = vrot.slane %v1014_v10, 2  ;;  %v1118_v35 = vmul.f32 %v6508_v17, %v6693_v28  ;;  %v566_v28 = vsel %vm200_vm0, %v563_v41, %v565_v40  ;;  %v1016_v10 = vmul.f32 %v6645_v6, %v6781_v7 }
  0x72   :  { %v1272_v40 = vrot.slane %v1265_v57, 1 }
  0x73   :  { %v1022_v37 = vsel %vm216_vm1, %v1020_v30, %v1021_v56  ;;  %v1023_v53 = vrot.slane %v1016_v10, 2 }
  0x75   :  { %672 = vrot.lane.b32.xlu1 %v669_v5, %s6349_s23  ;;  %567 = vrot.lane.b32.xlu0 %v564_v19, %s6350_s14  ;;  %v997_v5 = vmul.f32 %v6645_v6, %v6695_v51  ;;  %v709_v19 = vmul.f32 %v6469_v1, %v6887_v63  ;;  %v6914_v51 = vmul.f32 %v6508_v17, %v6841_v4 }
  0x76   :  { %v1024_v55 = vsel %vm216_vm1, %v1021_v56, %v1023_v53  ;;  %v7076_v53 = vstv %s7016_s1  ;;  %s7342_s1 = sld [smem:[#allocation2 + $0x182]] }
  0x77   :  { %v1004_v49 = vrot.slane %v997_v5, 1  ;;  %v715_v50 = vrot.slane %v709_v19, 2  ;;  %v1155_v41 = vrot.slane %v6914_v51, 2  ;;  %9857 = vst [vmem:[#allocation21_spill] sm:$0xff] %v7076_v53 }
  0x79   :  { %1111 = vrot.lane.b32.xlu1 %v1108_v13, %s6349_s23  ;;  %1006 = vrot.lane.b32.xlu0 %v1003_v26, %s6350_s14  ;;  %v1148_v13 = vmul.f32 %v6464_v0, %v6841_v4  ;;  %v1271_v26 = vsel %vm200_vm0, %v1269_v47, %v1270_v43  ;;  %v1150_v47 = vmul.f32 %v6645_v6, %v6841_v4 }
  0x7b   :  { %v1154_v29 = vrot.slane %v1148_v13, 2  ;;  %v1157_v56 = vrot.slane %v1150_v47, 2  ;;  %v7014_v13 = vmul.f32 %v6474_v2, %v7000_v8 }
  0x7d   :  { %452 = vrot.lane.b32.xlu1 %v449_v15, %s6350_s14  ;;  %1255 = vrot.lane.b32.xlu0 %v1251_v33, %s6350_s14  ;;  %v716_v33 = vrot.slane %v6903_v18, 2  ;;  %v1005_v15 = vsel %vm200_vm0, %v1002_v44, %v1004_v49  ;;  %v1156_v34 = vsel %vm216_vm1, %v1154_v29, %v1155_v41  ;;  %v699_v44 = vrot.slane %v692_v42, 1 }
  0x7e   :  { %v7026_v49 = vstv %s5944_s26  ;;  %v811_v42 = vmul.f32 %v6464_v0, %v7000_v8  ;;  %v245_v51 = vrot.slane %v7014_v13, 1  ;;  %s6358_s26 = smov 118  }
  0x7f   :  { %v717_v12 = vsel %vm216_vm1, %v715_v50, %v716_v33  ;;  %v700_v46 = vsel %vm200_vm0, %v697_v31, %v699_v44  ;;  %v7028_v50 = vstv %s5942_s27  ;;  %s6359_s27 = smov 112  }
  0x80   :  { %9850 = vst [vmem:[#allocation14_spill] sm:$0xff] %v7028_v50  ;;  %v7053_v44 = vmul.f32 %v6474_v2, %v7028_v50  ;;  %v817_v10 = vrot.slane %v811_v42, 1 }
  0x81   :  { %701 = vrot.lane.b32.xlu1 %v698_v58, %s6350_s14  ;;  %550 = vrot.lane.b32.xlu0 %v545_v38, %s6350_s14  ;;  %v443_v38 = vmul.f32 %v6561_v39, %v6781_v7 }
  0x82   :  { %9853 = vst [vmem:[#allocation17_spill] sm:$0xff] %v7053_v44 }
  0x83   :  { %v450_v52 = vrot.slane %v443_v38, 2  ;;  %v226_v38 = vmul.f32 %v6469_v1, %v7026_v49 }
  0x85   :  { %1140 = vrot.lane.b32.xlu1 %v1137_v14, %s6350_s14  ;;  %989 = vrot.lane.b32.xlu0 %v984_v9, %s6350_s14  ;;  %v1282_v9 = vmul.f32 %v6464_v0, %v6887_v63  ;;  %v1131_v14 = vmul.f32 %v6645_v6, %v6748_v23  ;;  %v451_v23 = vsel %vm216_vm1, %v448_v21, %v450_v52 }
  0x86   :  { %v711_v21 = vmul.f32 %v6561_v39, %v6887_v63  ;;  %v227_v52 = vmul.f32 %v6474_v2, %v7026_v49 }
  0x89   :  { %435 = vrot.lane.b32.xlu1 %v432_v25, %s6350_s14  ;;  %1245 = vrot.lane.b32.xlu0 %v1242_v27, %s6349_s23  ;;  %v577_v25 = vmul.f32 %v6561_v39, %v6841_v4  ;;  %v1288_v27 = vrot.slane %v1282_v9, 2  ;;  %v1291_v4 = vrot.slane %v1284_v48, 2  ;;  %v7059_v9 = vmul.f32 %v6474_v2, %v7020_v3 }
  0x8b   :  { %v584_v7 = vrot.slane %v577_v25, 2  ;;  %v1290_v31 = vsel %vm216_vm1, %v1288_v27, %v1289_v54  ;;  %v196_v27 = vmul.f32 %v6561_v39, %v7028_v50 }
  0x8d   :  { %684 = vrot.lane.b32.xlu1 %v679_v32, %s6350_s14  ;;  %586 = vrot.lane.b32.xlu0 %v583_v61, %s6350_s14  ;;  %v1138_v32 = vrot.slane %v1131_v14, 1  ;;  %v204_v57 = vrot.slane %v196_v27, 1 }
  0x8f   :  { %v1139_v24 = vsel %vm200_vm0, %v1136_v62, %v1138_v32  ;;  %v585_v62 = vsel %vm216_vm1, %v582_v60, %v584_v7  ;;  %v1273_v60 = vsel %vm200_vm0, %v1270_v43, %v1272_v40  ;;  %v1292_v43 = vsel %vm216_vm1, %v1289_v54, %v1291_v4 }
  0x90   :  { %v766_v40 = vmul.f32 %v6508_v17, %v7061_v11 }
  0x91   :  { %1123 = vrot.lane.b32.xlu1 %v1118_v35, %s6350_s14  ;;  %1025 = vrot.lane.b32.xlu0 %v1022_v37, %s6350_s14  ;;  %v718_v37 = vrot.slane %v711_v21, 2 }
  0x93   :  { %v719_v22 = vsel %vm216_vm1, %v716_v33, %v718_v37 }
  0x95   :  { %569 = vrot.lane.b32.xlu1 %v566_v28, %s6350_s14  ;;  %1274 = vrot.lane.b32.xlu0 %v1271_v26, %s6350_s14  ;;  %v238_v28 = vmul.f32 %v6469_v1, %v7000_v8  ;;  %v1158_v26 = vsel %vm216_vm1, %v1155_v41, %v1157_v56  ;;  %v257_v41 = vmul.f32 %v6469_v1, %v7020_v3 }
  0x96   :  { %v771_v56 = vmul.f32 %v6645_v6, %v7028_v50 }
  0x97   :  { %v6931_v45 = vpop.permute.xlu1 %937  ;;  %v6933_v58 = vpop.permute.xlu0 %364  ;;  %v263_v32 = vrot.slane %v257_v41, 2  ;;  %v768_v41 = vadd.f32 %v766_v40, %v7076_v53 }
  0x99   :  { %1008 = vrot.lane.b32.xlu1 %v1005_v15, %s6350_s14  ;;  %720 = vrot.lane.b32.xlu0 %v717_v12, %s6350_s14  ;;  %v7038_v15 = vmul.f32 %v6508_v17, %v7000_v8  ;;  %v244_v12 = vrot.slane %v238_v28, 1  ;;  %v7118_v28 = vmul.f32 %v6508_v17, %v7020_v3 }
  0x9b   :  { %v6948_v16 = vpop.permute.xlu1 %1071  ;;  %v6950_v20 = vpop.permute.xlu0 %498  ;;  %v818_v25 = vrot.slane %v7038_v15, 1  ;;  %v246_v54 = vsel %vm200_vm0, %v244_v12, %v245_v51 }
  0x9d   :  { %1257 = vrot.lane.b32.xlu1 %v1252_v59, %s6350_s14  ;;  %1159 = vrot.lane.b32.xlu0 %v1156_v34, %s6350_s14  ;;  %v799_v59 = vmul.f32 %v6464_v0, %v7026_v49  ;;  %v7049_v34 = vstv %s5943_s28  ;;  %s6360_s28 = smov 114  }
  0x9e   :  { %9852 = vst [vmem:[#allocation16_spill] sm:$0xff] %v7049_v34  ;;  %v7080_v7 = vmul.f32 %v6474_v2, %v7049_v34  ;;  %v212_v37 = vmul.f32 %v6561_v39, %v7049_v34 }
  0x9f   :  { %v6964_v30 = vpop.permute.xlu1 %383  ;;  %v6966_v36 = vpop.permute.xlu0 %632 }
  0xa0   :  { %9858 = vst [vmem:[#allocation22_spill] sm:$0xff] %v7080_v7  ;;  %v220_v42 = vrot.slane %v212_v37, 2 }
  0xa1   :  { %703 = vrot.lane.b32.xlu1 %v700_v46, %s6350_s14  ;;  %454 = vrot.lane.b32.xlu0 %v451_v23, %s6350_s14  ;;  %v191_v23 = vmul.f32 %v6474_v2, %v7061_v11 }
  0xa3   :  { %v6978_v61 = vpop.permute.xlu1 %517  ;;  %v6980_v35 = vpop.permute.xlu0 %366  ;;  %v193_v21 = vadd.f32 %v191_v23, %v7076_v53 }
  0xa4   :  { %9847 = vst [vmem:[#allocation11_spill] sm:$0xff] %v6980_v35 }
  0xa5   :  { %1293 = vrot.lane.b32.xlu1 %v1290_v31, %s6350_s14  ;;  %1142 = vrot.lane.b32.xlu0 %v1139_v24, %s6350_s14  ;;  %v9707_v31 = vrot.slane %v7053_v44, 1  ;;  %v7089_v24 = vmul.f32 %v6508_v17, %v7028_v50  ;;  %v7357_v50 = vld [vmem:[%s9691_s0 + $0x20] sm:$0xff] }
  0xa7   :  { %v6994_v5 = vpop.permute.xlu1 %1205  ;;  %v6996_v19 = vpop.permute.xlu0 %956  ;;  %9859 = vst [vmem:[#allocation23_spill] sm:$0xff] %v7089_v24  ;;  %v205_v4 = vsel %vm200_vm0, %v9707_v31, %v204_v57  ;;  %v9705_v12 = vrot.slane %v7089_v24, 1 }
  0xa8   :  { %9848 = vst [vmem:[#allocation12_spill] sm:$0xff] %v6994_v5 }
  0xa9   :  { %1027 = vrot.lane.b32.xlu1 %v1024_v55, %s6350_s14  ;;  %588 = vrot.lane.b32.xlu0 %v585_v62, %s6350_s14  ;;  %v264_v55 = vrot.slane %v7059_v9, 2  ;;  %v240_v62 = vmul.f32 %v6561_v39, %v7000_v8  ;;  %v819_v9 = vsel %vm200_vm0, %v817_v10, %v818_v25 }
  0xab   :  { %v7006_v63 = vpop.permute.xlu1 %500  ;;  %v7008_v18 = vpop.permute.xlu0 %402  ;;  %v265_v23 = vsel %vm216_vm1, %v263_v32, %v264_v55  ;;  %v247_v27 = vrot.slane %v240_v62, 1  ;;  %v800_v32 = vmul.f32 %v6508_v17, %v7026_v49  ;;  %v813_v49 = vmul.f32 %v6645_v6, %v7000_v8 }
  0xac   :  { %9849 = vst [vmem:[#allocation13_spill] sm:$0xff] %v7006_v63 }
  0xad   :  { %722 = vrot.lane.b32.xlu1 %v719_v22, %s6350_s14  ;;  %1276 = vrot.lane.b32.xlu0 %v1273_v60, %s6350_s14  ;;  %v830_v22 = vmul.f32 %v6464_v0, %v7020_v3  ;;  %v7109_v60 = vmul.f32 %v6508_v17, %v7049_v34 }
  0xaf   :  { %v7030_v33 = vpop.permute.xlu1 %939  ;;  %v7032_v29 = vpop.permute.xlu0 %651  ;;  %9861 = vst [vmem:[#allocation25_spill] sm:$0xff] %v7109_v60  ;;  %v9704_v57 = vrot.slane %v7109_v60, 2 }
  0xb0   :  { %9851 = vst [vmem:[#allocation15_spill] sm:$0xff] %v7030_v33 }
  0xb1   :  { %1295 = vrot.lane.b32.xlu1 %v1292_v43, %s6350_s14  ;;  %1161 = vrot.lane.b32.xlu0 %v1158_v26, %s6350_s14  ;;  %v9706_v43 = vrot.slane %v7080_v7, 2  ;;  %v209_v26 = vadd.f32 %v205_v4, %v193_v21  ;;  %v836_v4 = vrot.slane %v830_v22, 2 }
  0xb3   :  { %v7063_v14 = vpop.permute.xlu1 %385  ;;  %v7065_v46 = vpop.permute.xlu0 %1090 }
  0xb4   :  { %9855 = vst [vmem:[#allocation19_spill] sm:$0xff] %v7063_v14  ;;  %9856 = vst [vmem:[#allocation20_spill] sm:$0xff] %v7065_v46 }
  0xb5   :  { %230 = vrot.lane.b32.xlu0 %v226_v38, %s6349_s23  ;;  %803 = vrot.lane.b32.xlu1 %v799_v59, %s6349_s23  ;;  %v778_v38 = vrot.slane %v771_v56, 1  ;;  %v786_v59 = vmul.f32 %v6645_v6, %v7049_v34  ;;  %v837_v56 = vrot.slane %v7118_v28, 2 }
  0xb7   :  { %v7099_v48 = vpop.permute.xlu1 %634  ;;  %v7101_v47 = vpop.permute.xlu0 %536  ;;  %v779_v10 = vsel %vm200_vm0, %v9705_v12, %v778_v38  ;;  %v793_v40 = vrot.slane %v786_v59, 2  ;;  %v248_v38 = vsel %vm200_vm0, %v245_v51, %v247_v27  ;;  %v838_v13 = vsel %vm216_vm1, %v836_v4, %v837_v56 }
  0xb8   :  { %9860 = vst [vmem:[#allocation24_spill] sm:$0xff] %v7099_v48  ;;  %v783_v62 = vadd.f32 %v779_v10, %v768_v41  ;;  %v259_v41 = vmul.f32 %v6561_v39, %v7020_v3  ;;  %v820_v51 = vrot.slane %v813_v49, 1 }
  0xb9   :  { %249 = vrot.lane.b32.xlu0 %v246_v54, %s6349_s23  ;;  %232 = vrot.lane.b32.xlu1 %v227_v52, %s6349_s23  ;;  %v221_v52 = vsel %vm216_vm1, %v9706_v43, %v220_v42  ;;  %v7150_v42 = vstv %s7084_s2  ;;  %s7348_s2 = sld [smem:[#allocation2 + $0x180]] }
  0xba   :  { %v7139_v37 = vadd.f32 %v221_v52, %v209_v26  ;;  %v794_v26 = vsel %vm216_vm1, %v9704_v57, %v793_v40  ;;  %v276_v8 = vmul.f32 %v6469_v1, %v7150_v42  ;;  %v7196_v57 = vstv %s5949_s13  ;;  %s6365_s13 = smov 100  }
  0xbb   :  { %v7134_v54 = vpop.permute.xlu1 %1073  ;;  %v7136_v21 = vpop.permute.xlu0 %975  ;;  %v7162_v59 = vadd.f32 %v794_v26, %v783_v62  ;;  %v821_v62 = vsel %vm200_vm0, %v818_v25, %v820_v51  ;;  %v7213_v51 = vmul.f32 %v6474_v2, %v7196_v57 }
  0xbc   :  { %9862 = vst [vmem:[#allocation26_spill] sm:$0xff] %v7134_v54  ;;  %9863 = vst [vmem:[#allocation27_spill] sm:$0xff] %v7139_v37  ;;  %v7260_v37 = vstv %s5977_s18  ;;  %s9731_s18 = smov 16  }
  0xbd   :  { %822 = vrot.lane.b32.xlu0 %v819_v9, %s6349_s23  ;;  %268 = vrot.lane.b32.xlu1 %v265_v23, %s6349_s23  ;;  %9864 = vst [vmem:[#allocation28_spill] sm:$0xff] %v7162_v59  ;;  %v7169_v9 = vstv %s7105_s30  ;;  %v266_v23 = vrot.slane %v259_v41, 2  ;;  %v9708_v12 = vrot.slane %v7213_v51, 2  ;;  %s6364_s30 = smov 106  }
  0xbe   :  { %v288_v27 = vmul.f32 %v6469_v1, %v7169_v9  ;;  %v289_v52 = vmul.f32 %v6474_v2, %v7169_v9  ;;  %v861_v25 = vmul.f32 %v6464_v0, %v7169_v9  ;;  %v290_v43 = vmul.f32 %v6561_v39, %v7169_v9 }
  0xbf   :  { %v7164_v22 = vpop.permute.xlu1 %414  ;;  %v7166_v28 = vpop.permute.xlu0 %1224  ;;  %v267_v4 = vsel %vm216_vm1, %v264_v55, %v266_v23  ;;  %v863_v7 = vmul.f32 %v6645_v6, %v7169_v9 }
  0xc0   :  { %9865 = vst [vmem:[#allocation29_spill] sm:$0xff] %v7166_v28  ;;  %v294_v26 = vrot.slane %v288_v27, 1 }
  0xc1   :  { %805 = vrot.lane.b32.xlu0 %v800_v32, %s6349_s23  ;;  %251 = vrot.lane.b32.xlu1 %v248_v38, %s6349_s23  ;;  %v832_v32 = vmul.f32 %v6645_v6, %v7020_v3  ;;  %v295_v38 = vrot.slane %v289_v52, 1  ;;  %v849_v3 = vmul.f32 %v6464_v0, %v7150_v42 }
  0xc3   :  { %v7180_v10 = vpop.permute.xlu1 %670  ;;  %v7182_v40 = vpop.permute.xlu0 %519  ;;  %v839_v15 = vrot.slane %v832_v32, 2  ;;  %v296_v55 = vsel %vm200_vm0, %v294_v26, %v295_v38  ;;  %v277_v32 = vmul.f32 %v6474_v2, %v7150_v42 }
  0xc4   :  { %9866 = vst [vmem:[#allocation30_spill] sm:$0xff] %v7182_v40 }
  0xc5   :  { %841 = vrot.lane.b32.xlu0 %v838_v13, %s6349_s23  ;;  %280 = vrot.lane.b32.xlu1 %v276_v8, %s6350_s14  ;;  %v7207_v13 = vmul.f32 %v6508_v17, %v7169_v9  ;;  %v307_v8 = vmul.f32 %v6469_v1, %v7196_v57  ;;  %v840_v52 = vsel %vm216_vm1, %v837_v56, %v839_v15 }
  0xc6   :  { %v880_v56 = vmul.f32 %v6464_v0, %v7196_v57 }
  0xc7   :  { %v7192_v49 = vpop.permute.xlu1 %1109  ;;  %v7194_v41 = vpop.permute.xlu0 %958  ;;  %v313_v26 = vrot.slane %v307_v8, 2 }
  0xc8   :  { %9867 = vst [vmem:[#allocation31_spill] sm:$0xff] %v7192_v49  ;;  %9868 = vst [vmem:[#allocation32_spill] sm:$0xff] %v7194_v41 }
  0xc9   :  { %824 = vrot.lane.b32.xlu0 %v821_v62, %s6349_s23  ;;  %270 = vrot.lane.b32.xlu1 %v267_v4, %s6349_s23  ;;  %v867_v62 = vrot.slane %v861_v25, 1  ;;  %v868_v4 = vrot.slane %v7207_v13, 1  ;;  %v315_v39 = vsel %vm216_vm1, %v313_v26, %v9708_v12  ;;  %v7246_v25 = vmul.f32 %v6508_v17, %v7196_v57 }
  0xca   :  { %v297_v13 = vrot.slane %v290_v43, 1  ;;  %v850_v43 = vmul.f32 %v6508_v17, %v7150_v42  ;;  %v886_v12 = vrot.slane %v880_v56, 2 }
  0xcb   :  { %v7215_v23 = vpop.permute.xlu1 %404  ;;  %v7217_v27 = vpop.permute.xlu0 %1207  ;;  %v869_v15 = vsel %vm200_vm0, %v867_v62, %v868_v4  ;;  %9872 = vst [vmem:[#allocation36_spill] sm:$0xff] %v7246_v25  ;;  %v7258_v62 = vstv %s5952_s17  ;;  %v9717_v60 = vrot.slane %v7246_v25, 2  ;;  %s9737_s17 = smov 94  }
  0xcc   :  { %9869 = vst [vmem:[#allocation33_spill] sm:$0xff] %v7215_v23  ;;  %9870 = vst [vmem:[#allocation34_spill] sm:$0xff] %v7217_v27  ;;  %v298_v24 = vsel %vm200_vm0, %v295_v38, %v297_v13  ;;  %v345_v34 = vmul.f32 %v6469_v1, %v7258_v62 }
  0xcd   :  { %853 = vrot.lane.b32.xlu0 %v849_v3, %s6350_s14  ;;  %299 = vrot.lane.b32.xlu1 %v296_v55, %s6350_s14  ;;  %v7232_v3 = vstv %s5951_s15  ;;  %v7234_v55 = vstv %s5950_s16  ;;  %v888_v9 = vsel %vm216_vm1, %v886_v12, %v9717_v60  ;;  %s7381_s15 = sld [smem:[#allocation5 + $0x3]]  ;;  %s9733_s16 = smov 98  }
  0xce   :  { %v330_v8 = vmul.f32 %v6469_v1, %v7232_v3  ;;  %v326_v26 = vmul.f32 %v6469_v1, %v7234_v55  ;;  %v870_v1 = vrot.slane %v863_v7, 1  ;;  %v351_v38 = vrot.slane %v345_v34, 2 }
  0xcf   :  { %v7228_v31 = vpop.permute.xlu1 %653  ;;  %v7230_v59 = vpop.permute.xlu0 %548 }
  0xd0   :  { %9871 = vst [vmem:[#allocation35_spill] sm:$0xff] %v7228_v31  ;;  %v336_v44 = vrot.slane %v330_v8, 1  ;;  %v328_v6 = vadd.f32 %v326_v26, %v7260_v37  ;;  %v871_v26 = vsel %vm200_vm0, %v868_v4, %v870_v1  ;;  %v7320_v4 = vmul.f32 %v6508_v17, %v7232_v3 }
  0xd1   :  { %843 = vrot.lane.b32.xlu0 %v840_v52, %s6349_s23  ;;  %282 = vrot.lane.b32.xlu1 %v277_v32, %s6350_s14  ;;  %v7252_v52 = vmul.f32 %v6474_v2, %v7232_v3  ;;  %s5960_s23 = sld [smem:[#allocation2 + $0x101]]  ;;  %v7322_v1 = vstv %s5959_s19  ;;  %v7369_v31 = vstv %s5978_s21  ;;  %s6354_s21 = smov 124  }
  0xd2   :  { %s9739_s19 = smov 90  }
  0xd3   :  { %v7254_v32 = vpop.permute.xlu1 %1092  ;;  %v7256_v0 = vpop.permute.xlu0 %987  ;;  %v9719_v53 = vrot.slane %v7252_v52, 1  ;;  %v7447_v49 = vstv %s7381_s15  ;;  %s9735_s15 = smov 102  }
  0xd4   :  { %9873 = vst [vmem:[#allocation37_spill] sm:$0xff] %v7254_v32  ;;  %v7361_v32 = vmul.f32 %v7357_v50, %v7258_v62 }
  0xd5   :  { %872 = vrot.lane.b32.xlu0 %v869_v15, %s6350_s14  ;;  %318 = vrot.lane.b32.xlu1 %v315_v39, %s6350_s14  ;;  %v7277_v15 = vmul.f32 %v6474_v2, %v7258_v62  ;;  %v338_v2 = vsel %vm200_vm0, %v336_v44, %v9719_v53 }
  0xd7   :  { %v7279_v39 = vpop.permute.xlu1 %433  ;;  %v7281_v42 = vpop.permute.xlu0 %1243  ;;  %v9718_v56 = vrot.slane %v7277_v15, 2  ;;  %v7306_v12 = vstv %s5960_s23  ;;  %s9751_s23 = smov 96  }
  0xd8   :  { %9874 = vst [vmem:[#allocation38_spill] sm:$0xff] %v7281_v42  ;;  %v9884_v42 = vrot.slane %v7320_v4, 1  ;;  %v7428_v23 = vmul.f32 %v7357_v50, %v7306_v12 }
  0xd9   :  { %855 = vrot.lane.b32.xlu0 %v850_v43, %s6350_s14  ;;  %301 = vrot.lane.b32.xlu1 %v298_v24, %s6350_s14  ;;  %v343_v24 = vadd.f32 %v338_v2, %v328_v6  ;;  %v353_v7 = vsel %vm216_vm1, %v351_v38, %v9718_v56  ;;  %v7311_v43 = vld [vmem:[%s9691_s0 + $0x18] sm:$0xff]  ;;  %v7324_v2 = vstv %s5961_s20  ;;  %s6353_s20 = smov 48  }
  0xda   :  { %9879 = vst [vmem:[#allocation43_spill] sm:$0xff] %v7311_v43  ;;  %v903_v6 = vmul.f32 %v7311_v43, %v7232_v3  ;;  %v7329_v38 = vld [vmem:[%s9691_s0] sm:$0xff]  ;;  %v899_v56 = vmul.f32 %v7311_v43, %v7234_v55  ;;  %v918_v11 = vmul.f32 %v7311_v43, %v7258_v62  ;;  %9888 = vst [vmem:[#allocation49_spill] sm:$0xff] %v7428_v23 }
  0xdb   :  { %v7293_v13 = vpop.permute.xlu1 %682  ;;  %v7295_v8 = vpop.permute.xlu0 %538  ;;  %9880 = vst [vmem:[#allocation44_spill] sm:$0xff] %v7329_v38  ;;  %v464_v60 = vmul.f32 %v7329_v38, %v7306_v12  ;;  %v479_v54 = vmul.f32 %v7329_v38, %v7324_v2  ;;  %v1052_v25 = vmul.f32 %v7311_v43, %v7324_v2 }
  0xdc   :  { %9875 = vst [vmem:[#allocation39_spill] sm:$0xff] %v7293_v13  ;;  %9876 = vst [vmem:[#allocation40_spill] sm:$0xff] %v7295_v8  ;;  %v909_v53 = vrot.slane %v903_v6, 1  ;;  %v460_v6 = vmul.f32 %v7329_v38, %v7322_v1  ;;  %v924_v40 = vrot.slane %v918_v11, 2  ;;  %v7386_v8 = vstv %s7315_s25  ;;  %s6357_s25 = smov 116  }
  0xdd   :  { %891 = vrot.lane.b32.xlu0 %v888_v9, %s6350_s14  ;;  %v358_v9 = vadd.f32 %v353_v7, %v343_v24  ;;  %v485_v63 = vrot.slane %v479_v54, 2  ;;  %v7398_v11 = vstv %s7342_s1  ;;  %v7412_v54 = vstv %s7348_s2  ;;  %s6362_s1 = smov 110   ;;  %s9754_s2 = smov 104  }
  0xde   :  { %v911_v33 = vsel %vm200_vm0, %v909_v53, %v9884_v42  ;;  %v7407_v53 = vld [vmem:[%s9691_s0 + $0x10] sm:$0x3]  ;;  %v598_v42 = vmul.f32 %v7329_v38, %v7386_v8  ;;  %v9894_v13 = vrot.slane %v7213_v51, 2 }
  0xdf   :  { %v7302_v44 = vpop.permute.xlu1 %1121  ;;  %v7304_v34 = vpop.permute.xlu0 %977  ;;  %v370_v27 = vadd.f32 %v6933_v58, %v358_v9  ;;  %v901_v9 = vadd.f32 %v899_v56, %v7260_v37 }
  0xe0   :  { %9877 = vst [vmem:[#allocation41_spill] sm:$0xff] %v7302_v44  ;;  %9878 = vst [vmem:[#allocation42_spill] sm:$0xff] %v7304_v34  ;;  %v470_v34 = vrot.slane %v464_v60, 1  ;;  %v613_v44 = vmul.f32 %v7329_v38, %v7398_v11  ;;  %v604_v35 = vrot.slane %v598_v42, 1  ;;  %v332_v42 = vmul.f32 %v7407_v53, %v7232_v3 }
  0xe1   :  { %874 = vrot.lane.b32.xlu0 %v871_v26, %s6350_s14  ;;  %v7336_v26 = vld [vmem:[%s9691_s0 + $0x8] sm:$0xff]  ;;  %v389_v58 = vadd.f32 %v6964_v30, %v370_v27 }
  0xe2   :  { %v7340_v17 = vmul.f32 %v7336_v26, %v7306_v12  ;;  %v7374_v48 = vmul.f32 %v7336_v26, %v7324_v2  ;;  %v7434_v14 = vmul.f32 %v7336_v26, %v7398_v11  ;;  %v327_v51 = vmul.f32 %v7336_v26, %v7234_v55 }
  0xe3   :  { %v7344_v24 = vpop.permute.xlu1 %416  ;;  %v7346_v7 = vpop.permute.xlu0 %1226 }
  0xe4   :  { %9881 = vst [vmem:[#allocation45_spill] sm:$0xff] %v7344_v24  ;;  %9882 = vst [vmem:[#allocation46_spill] sm:$0xff] %v7346_v7  ;;  %v408_v24 = vadd.f32 %v7008_v18, %v389_v58  ;;  %v9885_v30 = vrot.slane %v7340_v17, 1  ;;  %v309_v18 = vmul.f32 %v7407_v53, %v7196_v57  ;;  %v916_v58 = vadd.f32 %v911_v33, %v901_v9 }
  0xe5   :  { %9889 = vst [vmem:[#allocation50_spill] sm:$0xff] %v7434_v14  ;;  %v594_v9 = vmul.f32 %v7329_v38, %v7412_v54  ;;  %v619_v38 = vrot.slane %v613_v44, 2 }
  0xe6   :  { %v472_v27 = vsel %vm200_vm0, %v470_v34, %v9885_v30  ;;  %v7418_v34 = vmul.f32 %v7336_v26, %v7386_v8  ;;  %v9887_v30 = vrot.slane %v7361_v32, 2 }
  0xe7   :  { %v7376_v41 = vpop.permute.xlu1 %672  ;;  %v7378_v7 = vpop.permute.xlu0 %567 }
  0xe8   :  { %9883 = vst [vmem:[#allocation47_spill] sm:$0xff] %v7376_v41  ;;  %v462_v41 = vadd.f32 %v460_v6, %v7369_v31  ;;  %v420_v6 = vadd.f32 %v7164_v22, %v408_v24  ;;  %v926_v56 = vsel %vm216_vm1, %v924_v40, %v9887_v30  ;;  %v1033_v22 = vmul.f32 %v7311_v43, %v7322_v1 }
  0xe9   :  { %v9890_v40 = vrot.slane %v7374_v48, 2  ;;  %v316_v30 = vrot.slane %v309_v18, 2 }
  0xea   :  { %v477_v5 = vadd.f32 %v472_v27, %v462_v41  ;;  %v439_v33 = vadd.f32 %v7279_v39, %v420_v6  ;;  %v1035_v44 = vadd.f32 %v1033_v22, %v7369_v31  ;;  %v9896_v22 = vrot.slane %v7428_v23, 1 }
  0xeb   :  { %v7400_v60 = vpop.permute.xlu1 %1111  ;;  %v7402_v28 = vpop.permute.xlu0 %1006  ;;  %v487_v24 = vsel %vm216_vm1, %v485_v63, %v9890_v40  ;;  %v7455_v63 = vmul.f32 %v7357_v50, %v7324_v2  ;;  %v7498_v23 = vmul.f32 %v7357_v50, %v7398_v11 }
  0xec   :  { %9886 = vst [vmem:[#allocation48_spill] sm:$0xff] %v7400_v60  ;;  %v1037_v60 = vmul.f32 %v7311_v43, %v7306_v12  ;;  %v492_v40 = vadd.f32 %v487_v24, %v477_v5  ;;  %v317_v5 = vsel %vm216_vm1, %v9894_v13, %v316_v30  ;;  %v9895_v24 = vrot.slane %v7418_v34, 1 }
  0xed   :  { %v347_v13 = vmul.f32 %v7407_v53, %v7258_v62 }
  0xee   :  { %v1043_v6 = vrot.slane %v1037_v60, 1  ;;  %v931_v60 = vadd.f32 %v926_v56, %v916_v58  ;;  %v606_v18 = vsel %vm200_vm0, %v604_v35, %v9895_v24  ;;  %v7477_v56 = vmul.f32 %v7357_v50, %v7386_v8 }
  0xef   :  { %v453_v41 = vpop.permute.xlu1 %452  ;;  %v7444_v27 = vpop.permute.xlu0 %1255  ;;  %v1058_v58 = vrot.slane %v1052_v25, 2  ;;  %v504_v30 = vadd.f32 %v6950_v20, %v492_v40  ;;  %v9897_v24 = vrot.slane %v7434_v14, 2  ;;  %v9900_v14 = vrot.slane %v7252_v52, 1 }
  0xf0   :  { %9891 = vst [vmem:[#allocation51_spill] sm:$0xff] %v7444_v27  ;;  %v458_v39 = vadd.f32 %v453_v41, %v439_v33  ;;  %v596_v33 = vadd.f32 %v594_v9, %v7447_v49  ;;  %v1045_v35 = vsel %vm200_vm0, %v1043_v6, %v9896_v22  ;;  %v339_v27 = vrot.slane %v332_v42, 1 }
  0xf1   :  { %v1167_v9 = vmul.f32 %v7311_v43, %v7412_v54  ;;  %v523_v40 = vadd.f32 %v6978_v61, %v504_v30  ;;  %v329_v22 = vadd.f32 %v327_v51, %v7260_v37 }
  0xf2   :  { %730 = vrot.lane.b32.xlu1 %v458_v39, %s9731_s18  ;;  %v1171_v39 = vmul.f32 %v7311_v43, %v7386_v8  ;;  %v611_v25 = vadd.f32 %v606_v18, %v596_v33  ;;  %v9899_v33 = vrot.slane %v7455_v63, 2  ;;  %v1193_v18 = vrot.slane %v7498_v23, 2 }
  0xf3   :  { %v7462_v41 = vpop.permute.xlu1 %701  ;;  %v7464_v46 = vpop.permute.xlu0 %550  ;;  %v542_v61 = vadd.f32 %v7101_v47, %v523_v40  ;;  %v7530_v47 = vld [vmem:[%s9691_s0 + $0x28] sm:$0x3]  ;;  %s6352_s0 = smov 32  }
  0xf4   :  { %9892 = vst [vmem:[#allocation52_spill] sm:$0xff] %v7462_v41  ;;  %9893 = vst [vmem:[#allocation53_spill] sm:$0xff] %v7464_v46  ;;  %v621_v46 = vsel %vm216_vm1, %v619_v38, %v9897_v24  ;;  %v1186_v41 = vmul.f32 %v7311_v43, %v7398_v11  ;;  %v943_v38 = vadd.f32 %v6931_v45, %v931_v60  ;;  %v1177_v42 = vrot.slane %v1171_v39, 1 }
  0xf5   :  { %v354_v24 = vrot.slane %v347_v13, 2  ;;  %v1050_v43 = vadd.f32 %v1045_v35, %v1035_v44  ;;  %v466_v45 = vmul.f32 %v7407_v53, %v7306_v12  ;;  %v626_v60 = vadd.f32 %v621_v46, %v611_v25 }
  0xf6   :  { %320 = vrot.lane.b32.xlu1 %v317_v5, %s6350_s14  ;;  %v1060_v5 = vsel %vm216_vm1, %v1058_v58, %v9899_v33  ;;  %v1169_v39 = vadd.f32 %v1167_v9, %v7447_v49  ;;  %v1192_v30 = vrot.slane %v1186_v41, 2  ;;  %v9901_v44 = vrot.slane %v7477_v56, 1 }
  0xf7   :  { %v7500_v6 = vpop.permute.xlu1 %1140  ;;  %v7502_v20 = vpop.permute.xlu0 %989  ;;  %v905_v46 = vmul.f32 %v7530_v47, %v7232_v3  ;;  %v9902_v9 = vrot.slane %v7277_v15, 2  ;;  %v461_v35 = vmul.f32 %v7336_v26, %v7322_v1  ;;  %v473_v25 = vrot.slane %v466_v45, 1 }
  0xf8   :  { %9898 = vst [vmem:[#allocation54_spill] sm:$0xff] %v7500_v6  ;;  %v340_v6 = vsel %vm200_vm0, %v9900_v14, %v339_v27  ;;  %v1179_v52 = vsel %vm200_vm0, %v1177_v42, %v9901_v44  ;;  %v962_v14 = vadd.f32 %v6996_v19, %v943_v38  ;;  %v554_v27 = vadd.f32 %v7230_v59, %v542_v61 }
  0xf9   :  { %v344_v41 = vadd.f32 %v340_v6, %v329_v22  ;;  %v355_v13 = vsel %vm216_vm1, %v9902_v9, %v354_v24  ;;  %v481_v19 = vmul.f32 %v7407_v53, %v7324_v2  ;;  %v920_v38 = vmul.f32 %v7530_v47, %v7258_v62 }
  0xfa   :  { %v981_v40 = vadd.f32 %v7136_v21, %v962_v14  ;;  %v573_v3 = vadd.f32 %v7378_v7, %v554_v27  ;;  %v1065_v59 = vadd.f32 %v1060_v5, %v1050_v43  ;;  %v1184_v6 = vadd.f32 %v1179_v52, %v1169_v39 }
  0xfb   :  { %v7519_v58 = vpop.permute.xlu1 %435  ;;  %v7521_v51 = vpop.permute.xlu0 %1245  ;;  %v900_v15 = vmul.f32 %v7357_v50, %v7234_v55  ;;  %v882_v22 = vmul.f32 %v7530_v47, %v7196_v57  ;;  %v1194_v24 = vsel %vm216_vm1, %v1192_v30, %v1193_v18  ;;  %v912_v62 = vrot.slane %v905_v46, 1 }
  0xfc   :  { %v993_v21 = vadd.f32 %v7256_v0, %v981_v40  ;;  %v359_v7 = vadd.f32 %v355_v13, %v344_v41  ;;  %v463_v43 = vadd.f32 %v461_v35, %v7369_v31  ;;  %v488_v5 = vrot.slane %v481_v19, 2 }
  0xfd   :  { %v600_v55 = vmul.f32 %v7407_v53, %v7386_v8  ;;  %v638_v61 = vadd.f32 %v6966_v36, %v626_v60  ;;  %v9903_v39 = vrot.slane %v7340_v17, 1  ;;  %v927_v44 = vrot.slane %v920_v38, 2 }
  0xfe   :  { %v1012_v30 = vadd.f32 %v7402_v28, %v993_v21  ;;  %v1199_v0 = vadd.f32 %v1194_v24, %v1184_v6  ;;  %v902_v52 = vadd.f32 %v900_v15, %v7260_v37  ;;  %v615_v14 = vmul.f32 %v7407_v53, %v7398_v11  ;;  %v9909_v15 = vld [vmem:[#allocation20_spill] sm:$0xff] }
  0xff   :  { %v7548_v42 = vpop.permute.xlu1 %684  ;;  %v587_v33 = vpop.permute.xlu0 %586  ;;  %v474_v57 = vsel %vm200_vm0, %v9903_v39, %v473_v25  ;;  %v889_v36 = vrot.slane %v882_v22, 2  ;;  %v9904_v17 = vrot.slane %v7320_v4, 1  ;;  %v657_v41 = vadd.f32 %v7032_v29, %v638_v61  ;;  %v9910_v22 = vld [vmem:[#allocation39_spill] sm:$0xff] }
 0x100   :  { %v592_v45 = vadd.f32 %v587_v33, %v573_v3  ;;  %v595_v28 = vmul.f32 %v7336_v26, %v7412_v54  ;;  %v478_v13 = vadd.f32 %v474_v57, %v463_v43  ;;  %v9905_v37 = vrot.slane %v7374_v48, 2  ;;  %v9913_v61 = vld [vmem:[#allocation31_spill] sm:$0xff] }
 0x101   :  { %v913_v60 = vsel %vm200_vm0, %v9904_v17, %v912_v62  ;;  %v607_v53 = vrot.slane %v600_v55, 1  ;;  %v1039_v19 = vmul.f32 %v7530_v47, %v7306_v12  ;;  %v1077_v25 = vadd.f32 %v6948_v16, %v1065_v59  ;;  %v9907_v16 = vld [vmem:[#allocation36_spill] sm:$0xff]  ;;  %v9918_v17 = vld [vmem:[#allocation41_spill] sm:$0xff] }
 0x102   :  { %738 = vrot.lane.b32.xlu0 %v592_v45, %s6352_s0  ;;  %v489_v35 = vsel %vm216_vm1, %v9905_v37, %v488_v5  ;;  %v9906_v4 = vrot.slane %v7361_v32, 2  ;;  %v676_v29 = vadd.f32 %v7180_v10, %v657_v41  ;;  %v1173_v26 = vmul.f32 %v7530_v47, %v7386_v8  ;;  %v9912_v5 = vld [vmem:[#allocation11_spill] sm:$0xff] }
 0x103   :  { %v7568_v46 = vpop.permute.xlu1 %1123  ;;  %v1026_v27 = vpop.permute.xlu0 %1025  ;;  %v917_v48 = vadd.f32 %v913_v60, %v902_v52  ;;  %v622_v40 = vrot.slane %v615_v14, 2  ;;  %v1034_v3 = vmul.f32 %v7357_v50, %v7322_v1  ;;  %v9908_v59 = vrot.slane %v9907_v16, 2  ;;  %v9915_v52 = vld [vmem:[#allocation50_spill] sm:$0xff] }
 0x104   :  { %v1031_v9 = vadd.f32 %v1026_v27, %v1012_v30  ;;  %v928_v38 = vsel %vm216_vm1, %v9906_v4, %v927_v44  ;;  %v1096_v33 = vadd.f32 %v9909_v15, %v1077_v25  ;;  %v597_v10 = vadd.f32 %v595_v28, %v7447_v49  ;;  %v9914_v44 = vld [vmem:[#allocation52_spill] sm:$0xff]  ;;  %v9919_v28 = vld [vmem:[#allocation49_spill] sm:$0xff] }
 0x105   :  { %v890_v32 = vsel %vm216_vm1, %v9908_v59, %v889_v36  ;;  %v1054_v8 = vmul.f32 %v7530_v47, %v7324_v2  ;;  %v688_v24 = vadd.f32 %v9910_v22, %v676_v29  ;;  %v9911_v62 = vrot.slane %v7418_v34, 1  ;;  %v9922_v4 = vld [vmem:[#allocation33_spill] sm:$0xff] }
 0x106   :  { %1303 = vrot.lane.b32.xlu1 %v1031_v9, %s9731_s18  ;;  %v1046_v21 = vrot.slane %v1039_v19, 1  ;;  %v1168_v45 = vmul.f32 %v7357_v50, %v7412_v54  ;;  %v1188_v43 = vmul.f32 %v7530_v47, %v7398_v11  ;;  %v371_v55 = vadd.f32 %v9912_v5, %v359_v7  ;;  %v9917_v11 = vld [vmem:[#allocation19_spill] sm:$0xff]  ;;  %v9921_v19 = vld [vmem:[#allocation12_spill] sm:$0xff]  ;;  %v9925_v59 = vld [vmem:[#allocation29_spill] sm:$0xff] }
 0x107   :  { %v7591_v6 = vpop.permute.xlu1 %569  ;;  %v1275_v12 = vpop.permute.xlu0 %1274  ;;  %v608_v1 = vsel %vm200_vm0, %v9911_v62, %v607_v53  ;;  %v1115_v39 = vadd.f32 %v9913_v61, %v1096_v33  ;;  %v1180_v57 = vrot.slane %v1173_v26, 1  ;;  %v707_v2 = vadd.f32 %v9914_v44, %v688_v24  ;;  %v9924_v26 = vld [vmem:[#allocation54_spill] sm:$0xff]  ;;  %v9928_v24 = vld [vmem:[#allocation13_spill] sm:$0xff] }
 0x108   :  { %v493_v30 = vadd.f32 %v489_v35, %v478_v13  ;;  %v932_v34 = vadd.f32 %v928_v38, %v917_v48  ;;  %v9916_v14 = vrot.slane %v9915_v52, 2  ;;  %v1036_v50 = vadd.f32 %v1034_v3, %v7369_v31 }
 0x109   :  { %v390_v47 = vadd.f32 %v9917_v11, %v371_v55  ;;  %v612_v7 = vadd.f32 %v608_v1, %v597_v10  ;;  %v1127_v60 = vadd.f32 %v9918_v17, %v1115_v39  ;;  %v9920_v9 = vrot.slane %v9919_v28, 1  ;;  %v9929_v1 = vld [vmem:[#allocation15_spill] sm:$0xff] }
 0x10a   :  { %893 = vrot.lane.b32.xlu1 %v890_v32, %s6350_s14  ;;  %v623_v27 = vsel %vm216_vm1, %v9916_v14, %v622_v40  ;;  %v1061_v13 = vrot.slane %v1054_v8, 2  ;;  %v1170_v35 = vadd.f32 %v1168_v45, %v7447_v49  ;;  %v1195_v53 = vrot.slane %v1188_v43, 2  ;;  %v9926_v49 = vld [vmem:[#allocation45_spill] sm:$0xff]  ;;  %v9930_v45 = vld [vmem:[#allocation38_spill] sm:$0xff]  ;;  %v9937_v17 = vld [vmem:[#allocation35_spill] sm:$0xff] }
 0x10b   :  { %v1009_v54 = vpop.permute.xlu1 %1008  ;;  %v721_v36 = vpop.permute.xlu0 %720  ;;  %v1047_v37 = vsel %vm200_vm0, %v9920_v9, %v1046_v21  ;;  %v1211_v25 = vadd.f32 %v9921_v19, %v1199_v0  ;;  %v409_v31 = vadd.f32 %v9922_v4, %v390_v47  ;;  %v9923_v38 = vrot.slane %v7477_v56, 1 }
 0x10c   :  { %v726_v41 = vadd.f32 %v721_v36, %v707_v2  ;;  %v1146_v48 = vadd.f32 %v9924_v26, %v1127_v60  ;;  %v627_v16 = vadd.f32 %v623_v27, %v612_v7  ;;  %v1051_v0 = vadd.f32 %v1047_v37, %v1036_v50  ;;  %v9933_v2 = vld [vmem:[#allocation51_spill] sm:$0xff]  ;;  %v9936_v36 = vld [vmem:[#allocation42_spill] sm:$0xff] }
 0x10d   :  { %v1181_v29 = vsel %vm200_vm0, %v9923_v38, %v1180_v57  ;;  %v1230_v32 = vadd.f32 %v9925_v59, %v1211_v25  ;;  %v421_v15 = vadd.f32 %v9926_v49, %v409_v31  ;;  %v9927_v10 = vrot.slane %v7455_v63, 2  ;;  %v9931_v63 = vld [vmem:[#allocation30_spill] sm:$0xff]  ;;  %v9932_v57 = vld [vmem:[#allocation32_spill] sm:$0xff]  ;;  %v9941_v25 = vld [vmem:[#allocation47_spill] sm:$0xff] }
 0x10e   :  { %746 = vrot.lane.b32.xlu0 %v726_v41, %s6353_s20  ;;  %v1185_v8 = vadd.f32 %v1181_v29, %v1170_v35  ;;  %v1196_v22 = vsel %vm216_vm1, %v1193_v18, %v1195_v53  ;;  %v505_v62 = vadd.f32 %v9928_v24, %v493_v30  ;;  %v944_v21 = vadd.f32 %v9929_v1, %v932_v34  ;;  %v9934_v30 = vld [vmem:[#allocation24_spill] sm:$0xff]  ;;  %v9938_v41 = vld [vmem:[#allocation53_spill] sm:$0xff]  ;;  %v9940_v53 = vld [vmem:[#allocation34_spill] sm:$0xff] }
 0x10f   :  { %v1258_v40 = vpop.permute.xlu1 %1257  ;;  %v1160_v3 = vpop.permute.xlu0 %1159  ;;  %v1062_v56 = vsel %vm216_vm1, %v9927_v10, %v1061_v13  ;;  %v1249_v43 = vadd.f32 %v9930_v45, %v1230_v32  ;;  %v440_v5 = vadd.f32 %v7519_v58, %v421_v15  ;;  %v639_v27 = vadd.f32 %v9934_v30, %v627_v16  ;;  %v9935_v34 = vld [vmem:[#allocation40_spill] sm:$0xff]  ;;  %v9939_v13 = vld [vmem:[#allocation26_spill] sm:$0xff]  ;;  %v9942_v38 = vld [vmem:[#allocation37_spill] sm:$0xff] }
 0x110   :  { %v1165_v33 = vadd.f32 %v1160_v3, %v1146_v48  ;;  %v524_v39 = vadd.f32 %v9931_v63, %v505_v62  ;;  %v963_v44 = vadd.f32 %v9932_v57, %v944_v21  ;;  %v1066_v18 = vadd.f32 %v1062_v56, %v1051_v0  ;;  %v9943_v3 = vld [vmem:[#allocation46_spill] sm:$0xff]  ;;  %v9944_v49 = vld [vmem:[#allocation48_spill] sm:$0xff] }
 0x111   :  { %v1261_v23 = vadd.f32 %v9933_v2, %v1249_v43  ;;  %v1200_v14 = vadd.f32 %v1196_v22, %v1185_v8  ;;  %v658_v60 = vadd.f32 %v9937_v17, %v639_v27  ;;  %v9945_v57 = vld [vmem:[#allocation14_spill] sm:$0xff]  ;;  %v9948_v30 = vld [vmem:[#allocation16_spill] sm:$0xff] }
 0x112   :  { %1311 = vrot.lane.b32.xlu0 %v1165_v33, %s6352_s0  ;;  %v543_v50 = vadd.f32 %v9935_v34, %v524_v39  ;;  %v982_v11 = vadd.f32 %v9936_v36, %v963_v44  ;;  %v1078_v35 = vadd.f32 %v9939_v13, %v1066_v18  ;;  %v9946_v44 = vld [vmem:[#allocation44_spill] sm:$0xff]  ;;  %v9949_v36 = vld [vmem:[#allocation21_spill] sm:$0xff] }
 0x113   :  { %v704_v55 = vpop.permute.xlu1 %703  ;;  %v455_v61 = vpop.permute.xlu0 %454  ;;  %v1280_v58 = vadd.f32 %v1275_v12, %v1261_v23  ;;  %v1212_v19 = vadd.f32 %v9940_v53, %v1200_v14  ;;  %v677_v4 = vadd.f32 %v9941_v25, %v658_v60  ;;  %v194_v2 = vmul.f32 %v9946_v44, %v9945_v57 }
 0x114   :  { %v459_v52 = vadd.f32 %v455_v61, %v440_v5  ;;  %v555_v28 = vadd.f32 %v9938_v41, %v543_v50  ;;  %v994_v9 = vadd.f32 %v7502_v20, %v982_v11  ;;  %v1097_v29 = vadd.f32 %v9942_v38, %v1078_v35  ;;  %v9954_v38 = vld [vmem:[#allocation43_spill] sm:$0xff] }
 0x115   :  { %v1231_v16 = vadd.f32 %v9943_v3, %v1212_v19  ;;  %v689_v20 = vadd.f32 %v7548_v42, %v677_v4  ;;  %v201_v14 = vrot.slane %v194_v2, 1  ;;  %v210_v27 = vmul.f32 %v9946_v44, %v9948_v30 }
 0x116   :  { %732 = vrot.lane.b32.xlu1 %v459_v52, %s9731_s18  ;;  %v574_v31 = vadd.f32 %v7591_v6, %v555_v28  ;;  %v1013_v12 = vadd.f32 %v1009_v54, %v994_v9  ;;  %v1116_v15 = vadd.f32 %v9944_v49, %v1097_v29  ;;  %v9947_v52 = vld [vmem:[#allocation18_spill] sm:$0xff]  ;;  %v769_v29 = vmul.f32 %v9954_v38, %v9945_v57 }
 0x117   :  { %v1294_v47 = vpop.permute.xlu1 %1293  ;;  %v1143_v7 = vpop.permute.xlu0 %1142  ;;  %v1250_v33 = vadd.f32 %v7521_v51, %v1231_v16  ;;  %v708_v0 = vadd.f32 %v704_v55, %v689_v20  ;;  %v190_v18 = vmul.f32 %v9946_v44, %v9947_v52  ;;  %v217_v17 = vrot.slane %v210_v27, 2  ;;  %v9952_v28 = vld [vmem:[#allocation22_spill] sm:$0xff]  ;;  %v9960_v27 = vld [vmem:[#allocation28_spill] sm:$0xff] }
 0x118   :  { %v1299_v37 = vadd.f32 %v1294_v47, %v1280_v58  ;;  %v1128_v10 = vadd.f32 %v7568_v46, %v1116_v15  ;;  %v9950_v58 = vld [vmem:[#allocation17_spill] sm:$0xff]  ;;  %v9953_v9 = vrot.slane %v9952_v28, 2  ;;  %v765_v16 = vmul.f32 %v9954_v38, %v9947_v52  ;;  %v9955_v15 = vld [vmem:[#allocation23_spill] sm:$0xff] }
 0x119   :  { %v1262_v56 = vadd.f32 %v1258_v40, %v1250_v33  ;;  %v192_v11 = vadd.f32 %v190_v18, %v9949_v36  ;;  %v9951_v47 = vrot.slane %v9950_v58, 1  ;;  %v775_v20 = vrot.slane %v769_v29, 1 }
 0x11a   :  { %1319 = vrot.lane.b32.xlu0 %v1299_v37, %s6353_s20  ;;  %v1147_v22 = vadd.f32 %v1143_v7, %v1128_v10  ;;  %v219_v37 = vsel %vm216_vm1, %v217_v17, %v9953_v9  ;;  %v767_v49 = vadd.f32 %v765_v16, %v9949_v36  ;;  %v9956_v33 = vrot.slane %v9955_v15, 1 }
 0x11b   :  { %v1028_v26 = vpop.permute.xlu1 %1027  ;;  %v589_v48 = vpop.permute.xlu0 %588  ;;  %v203_v7 = vsel %vm200_vm0, %v201_v14, %v9951_v47 }
 0x11c   :  { %v1032_v59 = vadd.f32 %v1028_v26, %v1013_v12  ;;  %v593_v32 = vadd.f32 %v589_v48, %v574_v31  ;;  %v208_v41 = vadd.f32 %v203_v7, %v192_v11 }
 0x11e   :  { %740 = vrot.lane.b32.xlu1 %v593_v32, %s6352_s0  ;;  %1305 = vrot.lane.b32.xlu0 %v1032_v59, %s9731_s18  ;;  %v224_v35 = vadd.f32 %v219_v37, %v208_v41  ;;  %v784_v59 = vmul.f32 %v9954_v38, %v9948_v30  ;;  %s9749_s18 = smov 88  }
 0x11f   :  { %v723_v6 = vpop.permute.xlu1 %722  ;;  %v1277_v54 = vpop.permute.xlu0 %1276 }
 0x120   :  { %v727_v8 = vadd.f32 %v723_v6, %v708_v0  ;;  %v1281_v24 = vadd.f32 %v1277_v54, %v1262_v56  ;;  %v777_v0 = vsel %vm200_vm0, %v775_v20, %v9956_v33  ;;  %v790_v6 = vrot.slane %v784_v59, 2 }
 0x121   :  { %vm4735_vm0 = vcmask 1047559  }
 0x122   :  { %748 = vrot.lane.b32.xlu1 %v727_v8, %s6353_s20  ;;  %v782_v8 = vadd.f32 %v777_v0, %v767_v49 }
 0x123   :  { %v1296_v42 = vpop.permute.xlu1 %1295  ;;  %v1162_v62 = vpop.permute.xlu0 %1161 }
 0x124   :  { %v1300_v1 = vadd.f32 %v1296_v42, %v1281_v24  ;;  %v1166_v21 = vadd.f32 %v1162_v62, %v1147_v22  ;;  %v9957_v22 = vld [vmem:[#allocation25_spill] sm:$0xff] }
 0x125   :  { %v9958_v24 = vrot.slane %v9957_v22, 2 }
 0x126   :  { %1321 = vrot.lane.b32.xlu1 %v1300_v1, %s6353_s20  ;;  %1313 = vrot.lane.b32.xlu0 %v1166_v21, %s6352_s0  ;;  %s9741_s0 = smov 92   ;;  %s9743_s20 = smov 86  }
 0x127   :  { %v231_v51 = vpop.permute.xlu0 %230  ;;  %v804_v43 = vpop.permute.xlu1 %803  ;;  %v792_v42 = vsel %vm216_vm1, %v790_v6, %v9958_v24  ;;  %vm4826_vm1 = vcmask 1040384  }
 0x128   :  { %v236_v25 = vadd.f32 %v231_v51, %v224_v35  ;;  %v797_v51 = vadd.f32 %v792_v42, %v782_v8 }
 0x12a   :  { %v809_v14 = vadd.f32 %v804_v43, %v797_v51 }
 0x12b   :  { %v250_v45 = vpop.permute.xlu0 %249  ;;  %v233_v46 = vpop.permute.xlu1 %232 }
 0x12c   :  { %v255_v31 = vadd.f32 %v250_v45, %v236_v25  ;;  %v9959_v45 = vld [vmem:[#allocation27_spill] sm:$0xff] }
 0x12f   :  { %v7668_v5 = vpop.permute.xlu0 %822  ;;  %v269_v55 = vpop.permute.xlu1 %268 }
 0x130   :  { %v274_v26 = vadd.f32 %v269_v55, %v255_v31  ;;  %v237_v55 = vadd.f32 %v233_v46, %v9959_v45  ;;  %v828_v46 = vadd.f32 %v7668_v5, %v809_v14 }
 0x133   :  { %v806_v40 = vpop.permute.xlu0 %805  ;;  %v252_v63 = vpop.permute.xlu1 %251 }
 0x134   :  { %v256_v30 = vadd.f32 %v252_v63, %v237_v55  ;;  %v810_v36 = vadd.f32 %v806_v40, %v9960_v27 }
 0x137   :  { %v7670_v61 = vpop.permute.xlu0 %841  ;;  %v281_v23 = vpop.permute.xlu1 %280 }
 0x138   :  { %v286_v32 = vadd.f32 %v281_v23, %v274_v26  ;;  %v847_v40 = vadd.f32 %v7670_v61, %v828_v46 }
 0x13b   :  { %v825_v39 = vpop.permute.xlu0 %824  ;;  %v271_v50 = vpop.permute.xlu1 %270 }
 0x13c   :  { %v275_v11 = vadd.f32 %v271_v50, %v256_v30  ;;  %v829_v58 = vadd.f32 %v825_v39, %v810_v36 }
 0x13f   :  { %v7678_v34 = vpop.permute.xlu0 %853  ;;  %v300_v13 = vpop.permute.xlu1 %299 }
 0x140   :  { %v305_v56 = vadd.f32 %v300_v13, %v286_v32  ;;  %v859_v39 = vadd.f32 %v7678_v34, %v847_v40 }
 0x143   :  { %v844_v60 = vpop.permute.xlu0 %843  ;;  %v283_v19 = vpop.permute.xlu1 %282 }
 0x144   :  { %v287_v63 = vadd.f32 %v283_v19, %v275_v11  ;;  %v848_v7 = vadd.f32 %v844_v60, %v829_v58 }
 0x147   :  { %v7687_v53 = vpop.permute.xlu0 %872  ;;  %v319_v12 = vpop.permute.xlu1 %318 }
 0x148   :  { %v324_v1 = vadd.f32 %v319_v12, %v305_v56  ;;  %v878_v60 = vadd.f32 %v7687_v53, %v859_v39 }
 0x14b   :  { %v856_v4 = vpop.permute.xlu0 %855  ;;  %v302_v3 = vpop.permute.xlu1 %301 }
 0x14c   :  { %v306_v50 = vadd.f32 %v302_v3, %v287_v63  ;;  %v860_v41 = vadd.f32 %v856_v4, %v848_v7 }
 0x14f   :  { %v7691_v48 = vpop.permute.xlu0 %891 }
 0x150   :  { %v897_v53 = vadd.f32 %v7691_v48, %v878_v60 }
 0x153   :  { %v875_v54 = vpop.permute.xlu0 %874 }
 0x154   :  { %v879_v37 = vadd.f32 %v875_v54, %v860_v41 }
 0x164   :  { %v731_v10 = vpop.permute.xlu1 %730 }
 0x165   :  { %v753_v57 = vsel %vm752_vm2, %v324_v1, %v731_v10 }
 0x168   :  { %v321_v21 = vpop.permute.xlu1 %320 }
 0x169   :  { %v325_v61 = vadd.f32 %v321_v21, %v306_v50 }
 0x174   :  { %v739_v62 = vpop.permute.xlu0 %738 }
 0x175   :  { %v756_v44 = vsel %vm755_vm3, %v753_v57, %v739_v62 }
 0x178   :  { %v1304_v52 = vpop.permute.xlu1 %1303 }
 0x179   :  { %v1325_v38 = vsel %vm752_vm2, %v897_v53, %v1304_v52 }
 0x17c   :  { %v894_v47 = vpop.permute.xlu1 %893 }
 0x17d   :  { %v898_v25 = vadd.f32 %v894_v47, %v879_v37 }
 0x180   :  { %v747_v2 = vpop.permute.xlu0 %746 }
 0x181   :  { %v759_v23 = vsel %vm758_vm4, %v756_v44, %v747_v2 }
 0x182   :  { %v7708_v18 = vmax.f32 %v759_v23, 0.0 }
 0x184   :  { %1351 = vrot.lane.b32.xlu1 %v7708_v18, %s6354_s21  ;;  %1339 = vrot.lane.b32.xlu0 %v7708_v18, %s6350_s14  ;;  %v1312_v43 = vpop.permute.xlu0 %1311 }
 0x185   :  { %v1327_v26 = vsel %vm755_vm3, %v1325_v38, %v1312_v43 }
 0x188   :  { %1375 = vrot.lane.b32.xlu1 %v7708_v18, %s6355_s22  ;;  %1363 = vrot.lane.b32.xlu0 %v7708_v18, %s6356_s24  ;;  %v733_v17 = vpop.permute.xlu1 %732 }
 0x189   :  { %v754_v9 = vsel %vm752_vm2, %v325_v61, %v733_v17 }
 0x18c   :  { %1399 = vrot.lane.b32.xlu1 %v7708_v18, %s6357_s25  ;;  %1387 = vrot.lane.b32.xlu0 %v7708_v18, %s6358_s26  ;;  %v1320_v5 = vpop.permute.xlu0 %1319 }
 0x18d   :  { %v1329_v3 = vsel %vm758_vm4, %v1327_v26, %v1320_v5 }
 0x18e   :  { %v7757_v16 = vmax.f32 %v1329_v3, 0.0 }
 0x190   :  { %v741_v28 = vpop.permute.xlu1 %740  ;;  %1423 = vrot.lane.b32.xlu1 %v7708_v18, %s6359_s27  ;;  %1411 = vrot.lane.b32.xlu0 %v7708_v18, %s6360_s28  ;;  %v1306_v34 = vpop.permute.xlu0 %1305 }
 0x191   :  { %v757_v13 = vsel %vm755_vm3, %v754_v9, %v741_v28  ;;  %v1326_v4 = vsel %vm752_vm2, %v898_v25, %v1306_v34 }
 0x194   :  { %v749_v35 = vpop.permute.xlu1 %748  ;;  %1447 = vrot.lane.b32.xlu1 %v7708_v18, %s9753_s29  ;;  %1435 = vrot.lane.b32.xlu0 %v7708_v18, %s6362_s1 }
 0x195   :  { %v7738_v19 = vsel %vm758_vm4, %v757_v13, %v749_v35 }
 0x196   :  { %v7840_v20 = vmax.f32 %v7738_v19, 0.0 }
 0x198   :  { %v1322_v31 = vpop.permute.xlu1 %1321  ;;  %v1314_v12 = vpop.permute.xlu0 %1313  ;;  %1471 = vrot.lane.b32.xlu1 %v7708_v18, %s9754_s2  ;;  %1459 = vrot.lane.b32.xlu0 %v7708_v18, %s6364_s30  ;;  %9961 = vst [vmem:[#allocation36_spill] sm:$0xff] %v7840_v20 }
 0x199   :  { %v1328_v29 = vsel %vm755_vm3, %v1326_v4, %v1314_v12 }
 0x19a   :  { %v7750_v48 = vsel %vm758_vm4, %v1328_v29, %v1322_v31  ;;  %vm5913_vm4 = vcmask 58368  }
 0x19b   :  { %v7923_v45 = vmax.f32 %v7750_v48, 0.0 }
 0x19c   :  { %1495 = vrot.lane.b32.xlu1 %v7708_v18, %s6365_s13  ;;  %1483 = vrot.lane.b32.xlu0 %v7708_v18, %s9735_s15 }
 0x19d   :  { %9964 = vst [vmem:[#allocation20_spill] sm:$0xff] %v7923_v45 }
 0x1a0   :  { %1343 = vrot.lane.b32.xlu1 %v7757_v16, %s6350_s14  ;;  %1507 = vrot.lane.b32.xlu0 %v7708_v18, %s9733_s16 }
 0x1a4   :  { %1367 = vrot.lane.b32.xlu1 %v7757_v16, %s6356_s24  ;;  %1355 = vrot.lane.b32.xlu0 %v7757_v16, %s6354_s21 }
 0x1a8   :  { %1391 = vrot.lane.b32.xlu1 %v7757_v16, %s6358_s26  ;;  %1379 = vrot.lane.b32.xlu0 %v7757_v16, %s6355_s22 }
 0x1ac   :  { %1415 = vrot.lane.b32.xlu1 %v7757_v16, %s6360_s28  ;;  %1403 = vrot.lane.b32.xlu0 %v7757_v16, %s6357_s25 }
 0x1b0   :  { %1439 = vrot.lane.b32.xlu1 %v7757_v16, %s6362_s1  ;;  %1427 = vrot.lane.b32.xlu0 %v7757_v16, %s6359_s27 }
 0x1b4   :  { %1463 = vrot.lane.b32.xlu1 %v7757_v16, %s6364_s30  ;;  %1451 = vrot.lane.b32.xlu0 %v7757_v16, %s9753_s29 }
 0x1b8   :  { %1487 = vrot.lane.b32.xlu1 %v7757_v16, %s9735_s15  ;;  %1475 = vrot.lane.b32.xlu0 %v7757_v16, %s9754_s2  ;;  %s9747_s15 = smov 84  }
 0x1bc   :  { %1511 = vrot.lane.b32.xlu1 %v7757_v16, %s9733_s16  ;;  %1499 = vrot.lane.b32.xlu0 %v7757_v16, %s6365_s13  ;;  %s9745_s16 = smov 82  }
 0x1c0   :  { %1531 = vrot.lane.b32.xlu1 %v7708_v18, %s9737_s17  ;;  %1519 = vrot.lane.b32.xlu0 %v7708_v18, %s9751_s23 }
 0x1c4   :  { %1555 = vrot.lane.b32.xlu1 %v7708_v18, %s9739_s19  ;;  %1543 = vrot.lane.b32.xlu0 %v7708_v18, %s9741_s0 }
 0x1c8   :  { %1579 = vrot.lane.b32.xlu1 %v7708_v18, %s9743_s20  ;;  %1567 = vrot.lane.b32.xlu0 %v7708_v18, %s9749_s18 }
 0x1cc   :  { %1603 = vrot.lane.b32.xlu1 %v7708_v18, %s9745_s16  ;;  %1591 = vrot.lane.b32.xlu0 %v7708_v18, %s9747_s15 }
 0x1d0   :  { %1535 = vrot.lane.b32.xlu1 %v7757_v16, %s9737_s17  ;;  %1523 = vrot.lane.b32.xlu0 %v7757_v16, %s9751_s23  ;;  %s6376_s17 = smov 78   ;;  %s6383_s23 = smov 68  }
 0x1d4   :  { %1559 = vrot.lane.b32.xlu1 %v7757_v16, %s9739_s19  ;;  %1547 = vrot.lane.b32.xlu0 %v7757_v16, %s9741_s0  ;;  %s6377_s19 = smov 80   ;;  %s6378_s0 = smov 74  }
 0x1d8   :  { %1583 = vrot.lane.b32.xlu1 %v7757_v16, %s9743_s20  ;;  %1571 = vrot.lane.b32.xlu0 %v7757_v16, %s9749_s18  ;;  %s6379_s20 = smov 76   ;;  %s6382_s18 = smov 66  }
 0x1dc   :  { %1607 = vrot.lane.b32.xlu1 %v7757_v16, %s9745_s16  ;;  %1595 = vrot.lane.b32.xlu0 %v7757_v16, %s9747_s15  ;;  %s6380_s16 = smov 70   ;;  %s6381_s15 = smov 72  }
 0x1e0   :  { %1627 = vrot.lane.b32.xlu1 %v7708_v18, %s6376_s17  ;;  %1615 = vrot.lane.b32.xlu0 %v7708_v18, %s6377_s19 }
 0x1e4   :  { %1651 = vrot.lane.b32.xlu1 %v7708_v18, %s6378_s0  ;;  %1639 = vrot.lane.b32.xlu0 %v7708_v18, %s6379_s20 }
 0x1e8   :  { %1675 = vrot.lane.b32.xlu1 %v7708_v18, %s6380_s16  ;;  %1663 = vrot.lane.b32.xlu0 %v7708_v18, %s6381_s15 }
 0x1ec   :  { %1699 = vrot.lane.b32.xlu1 %v7708_v18, %s6382_s18  ;;  %1687 = vrot.lane.b32.xlu0 %v7708_v18, %s6383_s23 }
 0x1f0   :  { %1353 = vrot.lane.b32.xlu1 %v7840_v20, %s6354_s21  ;;  %1341 = vrot.lane.b32.xlu0 %v7840_v20, %s6350_s14 }
 0x1f4   :  { %1377 = vrot.lane.b32.xlu1 %v7840_v20, %s6355_s22  ;;  %1365 = vrot.lane.b32.xlu0 %v7840_v20, %s6356_s24 }
 0x1f6   :  { %v7850_v59 = vpop.permute.xlu1 %1351  ;;  %v7852_v32 = vpop.permute.xlu0 %1339 }
 0x1f8   :  { %1401 = vrot.lane.b32.xlu1 %v7840_v20, %s6357_s25  ;;  %1389 = vrot.lane.b32.xlu0 %v7840_v20, %s6358_s26 }
 0x1fa   :  { %v7858_v49 = vpop.permute.xlu1 %1375  ;;  %v7860_v15 = vpop.permute.xlu0 %1363 }
 0x1fc   :  { %1425 = vrot.lane.b32.xlu1 %v7840_v20, %s6359_s27  ;;  %1413 = vrot.lane.b32.xlu0 %v7840_v20, %s6360_s28 }
 0x1fe   :  { %v7866_v33 = vpop.permute.xlu1 %1399  ;;  %v7868_v0 = vpop.permute.xlu0 %1387 }
 0x200   :  { %1449 = vrot.lane.b32.xlu1 %v7840_v20, %s9753_s29  ;;  %1437 = vrot.lane.b32.xlu0 %v7840_v20, %s6362_s1  ;;  %s9962_s29 = smov 102  }
 0x202   :  { %v7874_v6 = vpop.permute.xlu1 %1423  ;;  %v7876_v54 = vpop.permute.xlu0 %1411 }
 0x204   :  { %1473 = vrot.lane.b32.xlu1 %v7840_v20, %s9754_s2  ;;  %1461 = vrot.lane.b32.xlu0 %v7840_v20, %s6364_s30  ;;  %s9963_s2 = smov 98  }
 0x206   :  { %v7882_v10 = vpop.permute.xlu1 %1447  ;;  %v7884_v56 = vpop.permute.xlu0 %1435 }
 0x208   :  { %1497 = vrot.lane.b32.xlu1 %v7840_v20, %s6365_s13  ;;  %1485 = vrot.lane.b32.xlu0 %v7840_v20, %s9962_s29 }
 0x20a   :  { %v7890_v8 = vpop.permute.xlu1 %1471  ;;  %v7892_v22 = vpop.permute.xlu0 %1459 }
 0x20c   :  { %1619 = vrot.lane.b32.xlu1 %v7757_v16, %s6377_s19  ;;  %1509 = vrot.lane.b32.xlu0 %v7840_v20, %s9963_s2 }
 0x20e   :  { %v7898_v24 = vpop.permute.xlu1 %1495  ;;  %v7900_v42 = vpop.permute.xlu0 %1483 }
 0x210   :  { %1643 = vrot.lane.b32.xlu1 %v7757_v16, %s6379_s20  ;;  %1631 = vrot.lane.b32.xlu0 %v7757_v16, %s6376_s17 }
 0x212   :  { %v7906_v62 = vpop.permute.xlu1 %1343  ;;  %v7908_v1 = vpop.permute.xlu0 %1507 }
 0x214   :  { %1667 = vrot.lane.b32.xlu1 %v7757_v16, %s6381_s15  ;;  %1655 = vrot.lane.b32.xlu0 %v7757_v16, %s6378_s0 }
 0x216   :  { %v7914_v21 = vpop.permute.xlu1 %1367  ;;  %v7916_v51 = vpop.permute.xlu0 %1355 }
 0x218   :  { %1691 = vrot.lane.b32.xlu1 %v7757_v16, %s6383_s23  ;;  %1679 = vrot.lane.b32.xlu0 %v7757_v16, %s6380_s16 }
 0x21a   :  { %v7925_v55 = vpop.permute.xlu1 %1391  ;;  %v7927_v57 = vpop.permute.xlu0 %1379 }
 0x21c   :  { %1345 = vrot.lane.b32.xlu1 %v7923_v45, %s6350_s14  ;;  %1703 = vrot.lane.b32.xlu0 %v7757_v16, %s6382_s18  ;;  %s9966_s14 = smov 108  }
 0x21e   :  { %v7933_v44 = vpop.permute.xlu1 %1415  ;;  %v7935_v2 = vpop.permute.xlu0 %1403 }
 0x220   :  { %1369 = vrot.lane.b32.xlu1 %v7923_v45, %s6356_s24  ;;  %1357 = vrot.lane.b32.xlu0 %v7923_v45, %s6354_s21  ;;  %s9967_s21 = smov 104   ;;  %s9971_s24 = smov 96  }
 0x222   :  { %v7941_v23 = vpop.permute.xlu1 %1439  ;;  %v7943_v52 = vpop.permute.xlu0 %1427 }
 0x223   :  { %9965 = vst [vmem:[#allocation39_spill] sm:$0xff] %v7943_v52 }
 0x224   :  { %1393 = vrot.lane.b32.xlu1 %v7923_v45, %s6358_s26  ;;  %1381 = vrot.lane.b32.xlu0 %v7923_v45, %s6355_s22  ;;  %s9970_s22 = smov 94   ;;  %s9973_s26 = smov 92  }
 0x226   :  { %v7949_v14 = vpop.permute.xlu1 %1463  ;;  %v7951_v30 = vpop.permute.xlu0 %1451 }
 0x228   :  { %1417 = vrot.lane.b32.xlu1 %v7923_v45, %s6360_s28  ;;  %1405 = vrot.lane.b32.xlu0 %v7923_v45, %s6357_s25  ;;  %s9972_s25 = smov 90   ;;  %s9977_s28 = smov 88  }
 0x22a   :  { %v7957_v27 = vpop.permute.xlu1 %1487  ;;  %v7959_v36 = vpop.permute.xlu0 %1475 }
 0x22c   :  { %1441 = vrot.lane.b32.xlu1 %v7923_v45, %s6362_s1  ;;  %1429 = vrot.lane.b32.xlu0 %v7923_v45, %s6359_s27  ;;  %s9976_s27 = smov 86   ;;  %s9981_s1 = smov 84  }
 0x22e   :  { %v7965_v46 = vpop.permute.xlu1 %1511  ;;  %v7967_v11 = vpop.permute.xlu0 %1499 }
 0x230   :  { %1465 = vrot.lane.b32.xlu1 %v7923_v45, %s6364_s30  ;;  %1453 = vrot.lane.b32.xlu0 %v7923_v45, %s9966_s14 }
 0x232   :  { %v7973_v58 = vpop.permute.xlu1 %1531  ;;  %v7975_v47 = vpop.permute.xlu0 %1519 }
 0x234   :  { %1489 = vrot.lane.b32.xlu1 %v7923_v45, %s9962_s29  ;;  %1477 = vrot.lane.b32.xlu0 %v7923_v45, %s9967_s21  ;;  %s9980_s29 = smov 82  }
 0x236   :  { %v7981_v43 = vpop.permute.xlu1 %1555  ;;  %v7983_v40 = vpop.permute.xlu0 %1543 }
 0x238   :  { %1513 = vrot.lane.b32.xlu1 %v7923_v45, %s9963_s2  ;;  %1501 = vrot.lane.b32.xlu0 %v7923_v45, %s6365_s13 }
 0x23a   :  { %v7989_v63 = vpop.permute.xlu1 %1579  ;;  %v7991_v7 = vpop.permute.xlu0 %1567 }
 0x23b   :  { %9968 = vst [vmem:[#allocation11_spill] sm:$0xff] %v7989_v63  ;;  %9969 = vst [vmem:[#allocation31_spill] sm:$0xff] %v7991_v7 }
 0x23c   :  { %1533 = vrot.lane.b32.xlu1 %v7840_v20, %s9970_s22  ;;  %1521 = vrot.lane.b32.xlu0 %v7840_v20, %s9971_s24 }
 0x23e   :  { %v7997_v17 = vpop.permute.xlu1 %1603  ;;  %v7999_v5 = vpop.permute.xlu0 %1591 }
 0x240   :  { %1557 = vrot.lane.b32.xlu1 %v7840_v20, %s9972_s25  ;;  %1545 = vrot.lane.b32.xlu0 %v7840_v20, %s9973_s26 }
 0x242   :  { %v8005_v39 = vpop.permute.xlu1 %1535  ;;  %v8007_v50 = vpop.permute.xlu0 %1523 }
 0x243   :  { %9974 = vst [vmem:[#allocation52_spill] sm:$0xff] %v8005_v39  ;;  %9975 = vst [vmem:[#allocation50_spill] sm:$0xff] %v8007_v50 }
 0x244   :  { %1581 = vrot.lane.b32.xlu1 %v7840_v20, %s9976_s27  ;;  %1569 = vrot.lane.b32.xlu0 %v7840_v20, %s9977_s28 }
 0x246   :  { %v8013_v41 = vpop.permute.xlu1 %1559  ;;  %v8015_v28 = vpop.permute.xlu0 %1547 }
 0x247   :  { %9978 = vst [vmem:[#allocation19_spill] sm:$0xff] %v8013_v41  ;;  %9979 = vst [vmem:[#allocation41_spill] sm:$0xff] %v8015_v28  ;;  %v6385_v41 = vmov 1934713408  }
 0x248   :  { %1605 = vrot.lane.b32.xlu1 %v7840_v20, %s9980_s29  ;;  %1593 = vrot.lane.b32.xlu0 %v7840_v20, %s9981_s1 }
 0x24a   :  { %v8021_v61 = vpop.permute.xlu1 %1583  ;;  %v8023_v60 = vpop.permute.xlu0 %1571 }
 0x24b   :  { %9982 = vst [vmem:[#allocation49_spill] sm:$0xff] %v8021_v61  ;;  %9983 = vst [vmem:[#allocation12_spill] sm:$0xff] %v8023_v60  ;;  %v1879_v61 = vcombine.low %v7890_v8, %v7898_v24 }
 0x24c   :  { %1537 = vrot.lane.b32.xlu1 %v7923_v45, %s9970_s22  ;;  %1525 = vrot.lane.b32.xlu0 %v7923_v45, %s9971_s24 }
 0x24e   :  { %v8029_v9 = vpop.permute.xlu1 %1607  ;;  %v8031_v37 = vpop.permute.xlu0 %1595 }
 0x24f   :  { %9984 = vst [vmem:[#allocation33_spill] sm:$0xff] %v8029_v9  ;;  %9985 = vst [vmem:[#allocation54_spill] sm:$0xff] %v8031_v37  ;;  %v1863_v37 = vcombine.low %v7884_v56, %v7892_v22 }
 0x250   :  { %1561 = vrot.lane.b32.xlu1 %v7923_v45, %s9972_s25  ;;  %1549 = vrot.lane.b32.xlu0 %v7923_v45, %s9973_s26 }
 0x252   :  { %v8037_v13 = vpop.permute.xlu1 %1627  ;;  %v8039_v34 = vpop.permute.xlu0 %1615 }
 0x253   :  { %9986 = vst [vmem:[#allocation29_spill] sm:$0xff] %v8037_v13  ;;  %9987 = vst [vmem:[#allocation45_spill] sm:$0xff] %v8039_v34 }
 0x254   :  { %1585 = vrot.lane.b32.xlu1 %v7923_v45, %s9976_s27  ;;  %1573 = vrot.lane.b32.xlu0 %v7923_v45, %s9977_s28 }
 0x256   :  { %v8045_v35 = vpop.permute.xlu1 %1651  ;;  %v8047_v19 = vpop.permute.xlu0 %1639 }
 0x257   :  { %9988 = vst [vmem:[#allocation13_spill] sm:$0xff] %v8045_v35  ;;  %9989 = vst [vmem:[#allocation15_spill] sm:$0xff] %v8047_v19 }
 0x258   :  { %1609 = vrot.lane.b32.xlu1 %v7923_v45, %s9980_s29  ;;  %1597 = vrot.lane.b32.xlu0 %v7923_v45, %s9981_s1 }
 0x25a   :  { %v8053_v25 = vpop.permute.xlu1 %1675  ;;  %v8055_v53 = vpop.permute.xlu0 %1663 }
 0x25b   :  { %9990 = vst [vmem:[#allocation38_spill] sm:$0xff] %v8053_v25  ;;  %9991 = vst [vmem:[#allocation30_spill] sm:$0xff] %v8055_v53 }
 0x25c   :  { %1629 = vrot.lane.b32.xlu1 %v7840_v20, %s6376_s17  ;;  %1617 = vrot.lane.b32.xlu0 %v7840_v20, %s6377_s19 }
 0x25e   :  { %v8061_v4 = vpop.permute.xlu1 %1699  ;;  %v8063_v31 = vpop.permute.xlu0 %1687 }
 0x25f   :  { %9992 = vst [vmem:[#allocation32_spill] sm:$0xff] %v8061_v4  ;;  %9993 = vst [vmem:[#allocation51_spill] sm:$0xff] %v8063_v31 }
 0x260   :  { %1653 = vrot.lane.b32.xlu1 %v7840_v20, %s6378_s0  ;;  %1641 = vrot.lane.b32.xlu0 %v7840_v20, %s6379_s20 }
 0x262   :  { %v8069_v12 = vpop.permute.xlu1 %1353  ;;  %v8071_v38 = vpop.permute.xlu0 %1341 }
 0x263   :  { %9994 = vst [vmem:[#allocation24_spill] sm:$0xff] %v8069_v12  ;;  %9995 = vst [vmem:[#allocation40_spill] sm:$0xff] %v8071_v38 }
 0x264   :  { %1677 = vrot.lane.b32.xlu1 %v7840_v20, %s6380_s16  ;;  %1665 = vrot.lane.b32.xlu0 %v7840_v20, %s6381_s15 }
 0x266   :  { %v8077_v29 = vpop.permute.xlu1 %1377  ;;  %v8079_v26 = vpop.permute.xlu0 %1365 }
 0x267   :  { %9996 = vst [vmem:[#allocation42_spill] sm:$0xff] %v8077_v29  ;;  %9997 = vst [vmem:[#allocation35_spill] sm:$0xff] %v8079_v26 }
 0x268   :  { %1701 = vrot.lane.b32.xlu1 %v7840_v20, %s6382_s18  ;;  %1689 = vrot.lane.b32.xlu0 %v7840_v20, %s6383_s23 }
 0x26a   :  { %v8085_v48 = vpop.permute.xlu1 %1401  ;;  %v8087_v3 = vpop.permute.xlu0 %1389 }
 0x26b   :  { %9998 = vst [vmem:[#allocation53_spill] sm:$0xff] %v8085_v48  ;;  %9999 = vst [vmem:[#allocation26_spill] sm:$0xff] %v8087_v3  ;;  %v9777_v3 = vlaneseq }
 0x26c   :  { %1633 = vrot.lane.b32.xlu1 %v7923_v45, %s6376_s17  ;;  %1621 = vrot.lane.b32.xlu0 %v7923_v45, %s6377_s19 }
 0x26e   :  { %v8093_v12 = vpop.permute.xlu1 %1425  ;;  %v8095_v29 = vpop.permute.xlu0 %1413 }
 0x26f   :  { %10000 = vst [vmem:[#allocation34_spill] sm:$0xff] %v8093_v12  ;;  %10001 = vst [vmem:[#allocation47_spill] sm:$0xff] %v8095_v29 }
 0x270   :  { %1657 = vrot.lane.b32.xlu1 %v7923_v45, %s6378_s0  ;;  %1645 = vrot.lane.b32.xlu0 %v7923_v45, %s6379_s20 }
 0x272   :  { %v8101_v20 = vpop.permute.xlu1 %1449  ;;  %v8103_v48 = vpop.permute.xlu0 %1437 }
 0x273   :  { %10002 = vst [vmem:[#allocation37_spill] sm:$0xff] %v8101_v20  ;;  %10003 = vst [vmem:[#allocation46_spill] sm:$0xff] %v8103_v48  ;;  %v6384_v20 = vmov 1983009808  }
 0x274   :  { %1681 = vrot.lane.b32.xlu1 %v7923_v45, %s6380_s16  ;;  %1669 = vrot.lane.b32.xlu0 %v7923_v45, %s6381_s15  ;;  %v1714_v48 = vunpack.c.l.s4 %v6384_v20  ;;  %v1727_v20 = vcombine.low %v7852_v32, %v7860_v15 }
 0x276   :  { %v8109_v38 = vpop.permute.xlu0 %1461  ;;  %v8111_v12 = vpop.permute.xlu1 %1473  ;;  %v1715_v28 = vunpack.c.0.s8 %v1714_v48 }
 0x277   :  { %10004 = vst [vmem:[#allocation48_spill] sm:$0xff] %v8109_v38  ;;  %10005 = vst [vmem:[#allocation14_spill] sm:$0xff] %v8111_v12  ;;  %v8124_v38 = vshrl.u32 %v9777_v3, 7  ;;  %v1759_v12 = vcombine.low %v7868_v0, %v7876_v54  ;;  %v1711_v3 = vcombine.low %v7708_v18, %v7850_v59 }
 0x278   :  { %1705 = vrot.lane.b32.xlu1 %v7923_v45, %s6382_s18  ;;  %1693 = vrot.lane.b32.xlu0 %v7923_v45, %s6383_s23  ;;  %v1778_v45 = vunpack.c.l.s4 %v6385_v41 }
 0x279   :  { %10009 = vst [vmem:[#allocation21_spill] sm:$0xff] %v8124_v38 }
 0x27a   :  { %v8117_v26 = vpop.permute.xlu0 %1485  ;;  %v8119_v29 = vpop.permute.xlu1 %1497  ;;  %v1779_v41 = vunpack.c.0.s8 %v1778_v45 }
 0x27b   :  { %10006 = vst [vmem:[#allocation44_spill] sm:$0xff] %v8117_v26  ;;  %10007 = vst [vmem:[#allocation18_spill] sm:$0xff] %v8119_v29  ;;  %v8131_v26 = vsub.s32 %v1715_v28, %v8124_v38  ;;  %v1743_v29 = vcombine.low %v7858_v49, %v7866_v33 }
 0x27c   :  { %v8161_v35 = vsub.s32 %v1779_v41, %v8124_v38  ;;  %v2015_v41 = vcombine.low %v7991_v7, %v7999_v5 }
 0x27d   :  { %v1735_v28 = vrot.slane %v1727_v20, %v8131_v26  ;;  %v1751_v60 = vrot.slane %v1743_v29, %v8131_v26  ;;  %v1719_v9 = vrot.slane %v1711_v3, %v8131_v26  ;;  %v1871_v29 = vrot.slane %v1863_v37, %v8131_v26 }
 0x27e   :  { %v8121_v50 = vpop.permute.xlu0 %1509  ;;  %v8128_v39 = vpop.permute.xlu1 %1619  ;;  %v1887_v13 = vrot.slane %v1879_v61, %v8131_v26  ;;  %v2031_v61 = vcombine.low %v7989_v63, %v7997_v17 }
 0x27f   :  { %10008 = vst [vmem:[#allocation16_spill] sm:$0xff] %v8121_v50  ;;  %10010 = vst [vmem:[#allocation17_spill] sm:$0xff] %v8128_v39  ;;  %v1767_v50 = vrot.slane %v1759_v12, %v8131_v26  ;;  %v1895_v39 = vcombine.low %v7900_v42, %v7908_v1  ;;  %v1847_v12 = vcombine.low %v7874_v6, %v7882_v10 }
 0x280   :  { %v1775_v20 = vcombine.low %v1719_v9, %v1735_v28  ;;  %v1776_v38 = vcombine.high %v1719_v9, %v1735_v28  ;;  %v2039_v7 = vrot.slane %v2031_v61, %v8131_v26 }
 0x281   :  { %v1807_v34 = vcombine.low %v1751_v60, %v1767_v50  ;;  %v1903_v45 = vrot.slane %v1895_v39, %v8131_v26  ;;  %v1808_v52 = vcombine.high %v1751_v60, %v1767_v50 }
 0x282   :  { %v8137_v48 = vpop.permute.xlu0 %1631  ;;  %v1783_v39 = vrot.slane %v1775_v20, %v8161_v35  ;;  %v1983_v20 = vcombine.low %v7975_v47, %v7983_v40 }
 0x283   :  { %10011 = vst [vmem:[#allocation22_spill] sm:$0xff] %v8137_v48  ;;  %v8150_v48 = vpop.permute.xlu1 %1643  ;;  %v1943_v53 = vcombine.low %v1887_v13, %v1903_v45  ;;  %v1815_v31 = vrot.slane %v1807_v34, %v8161_v35  ;;  %v1822_v9 = vrot.slane %v1808_v52, %v8161_v35 }
 0x284   :  { %10012 = vst [vmem:[#allocation43_spill] sm:$0xff] %v8150_v48  ;;  %v1855_v48 = vrot.slane %v1847_v12, %v8131_v26 }
 0x285   :  { %v1951_v37 = vrot.slane %v1943_v53, %v8161_v35  ;;  %v1944_v53 = vcombine.high %v1887_v13, %v1903_v45  ;;  %v1744_v13 = vcombine.high %v7858_v49, %v7866_v33  ;;  %v1728_v49 = vcombine.high %v7852_v32, %v7860_v15 }
 0x286   :  { %v8156_v19 = vpop.permute.xlu0 %1655  ;;  %v1911_v25 = vcombine.low %v1855_v48, %v1871_v29  ;;  %v1912_v28 = vcombine.high %v1855_v48, %v1871_v29  ;;  %v1896_v29 = vcombine.high %v7900_v42, %v7908_v1  ;;  %v1880_v32 = vcombine.high %v7890_v8, %v7898_v24 }
 0x287   :  { %10013 = vst [vmem:[#allocation23_spill] sm:$0xff] %v8156_v19  ;;  %v8164_v3 = vpop.permute.xlu1 %1667  ;;  %v1839_v19 = vcombine.low %v1783_v39, %v1815_v31  ;;  %v1848_v1 = vcombine.high %v7874_v6, %v7882_v10  ;;  %v1864_v8 = vcombine.high %v7884_v56, %v7892_v22  ;;  %v2847_v22 = vcombine.low %v7925_v55, %v7933_v44 }
 0x288   :  { %10014 = vst [vmem:[#allocation25_spill] sm:$0xff] %v8164_v3  ;;  %v1919_v34 = vrot.slane %v1911_v25, %v8161_v35  ;;  %v1999_v3 = vcombine.low %v7973_v58, %v7981_v43  ;;  %v1760_v25 = vcombine.high %v7868_v0, %v7876_v54  ;;  %v1926_v48 = vrot.slane %v1912_v28, %v8161_v35 }
 0x289   :  { %v3888_v60 = vsel %vm3887_vm5, %v1839_v19, -inf  ;;  %v1991_v19 = vrot.slane %v1983_v20, %v8131_v26  ;;  %v8239_v28 = vrot.slane %v1880_v32, %v8131_v26 }
 0x28a   :  { %v8167_v4 = vpop.permute.xlu0 %1679  ;;  %v1975_v63 = vcombine.low %v1919_v34, %v1951_v37  ;;  %v2007_v45 = vrot.slane %v1999_v3, %v8131_v26  ;;  %v1976_v52 = vcombine.high %v1919_v34, %v1951_v37  ;;  %v8203_v33 = vrot.slane %v1760_v25, %v8131_v26 }
 0x28b   :  { %10015 = vst [vmem:[#allocation27_spill] sm:$0xff] %v8167_v4  ;;  %v8175_v12 = vpop.permute.xlu1 %1691  ;;  %v1840_v4 = vcombine.high %v1783_v39, %v1815_v31  ;;  %v1790_v31 = vrot.slane %v1776_v38, %v8161_v35 }
 0x28c   :  { %10016 = vst [vmem:[#allocation28_spill] sm:$0xff] %v8175_v12  ;;  %v2023_v12 = vrot.slane %v2015_v41, %v8131_v26  ;;  %v3891_v41 = vsel %vm3887_vm5, %v1975_v63, -inf  ;;  %v1712_v63 = vcombine.high %v7708_v18, %v7850_v59  ;;  %v2047_v3 = vcombine.low %v1991_v19, %v2007_v45 }
 0x28d   :  { %v3900_v61 = vsel %vm3887_vm5, %v1840_v4, -inf  ;;  %v1841_v54 = vcombine.low %v1790_v31, %v1822_v9  ;;  %v8211_v4 = vrot.slane %v1744_v13, %v8131_v26  ;;  %v3903_v15 = vsel %vm3887_vm5, %v1976_v52, -inf }
 0x28e   :  { %v8182_v50 = vpop.permute.xlu0 %1703  ;;  %v2079_v0 = vcombine.low %v2023_v12, %v2039_v7  ;;  %v1842_v34 = vcombine.high %v1790_v31, %v1822_v9  ;;  %v2080_v20 = vcombine.high %v2023_v12, %v2039_v7  ;;  %v8221_v59 = vrot.slane %v1728_v49, %v8131_v26 }
 0x28f   :  { %10017 = vst [vmem:[#allocation55_spill] sm:$0xff] %v8182_v50  ;;  %v8195_v39 = vpop.permute.xlu1 %1345  ;;  %v1823_v42 = vcombine.low %v8211_v4, %v8203_v33  ;;  %v8232_v7 = vrot.slane %v1712_v63, %v8131_v26  ;;  %v8235_v12 = vrot.slane %v1896_v29, %v8131_v26  ;;  %v2048_v9 = vcombine.high %v1991_v19, %v2007_v45 }
 0x290   :  { %10018 = vst [vmem:[#allocation56_spill] sm:$0xff] %v8195_v39  ;;  %v2087_v18 = vrot.slane %v2079_v0, %v8161_v35  ;;  %v2055_v25 = vrot.slane %v2047_v3, %v8161_v35  ;;  %v3924_v10 = vsel %vm3887_vm5, %v1842_v34, -inf  ;;  %v2831_v31 = vcombine.low %v7927_v57, %v7935_v2 }
 0x291   :  { %v2094_v19 = vrot.slane %v2080_v20, %v8161_v35  ;;  %v8256_v52 = vrot.slane %v1864_v8, %v8131_v26  ;;  %v1959_v0 = vcombine.low %v8239_v28, %v8235_v12  ;;  %v2799_v49 = vcombine.low %v7757_v16, %v7916_v51  ;;  %v10023_v8 = vld [vmem:[#allocation39_spill] sm:$0xff] }
 0x292   :  { %v8205_v38 = vpop.permute.xlu0 %1357  ;;  %v2111_v45 = vcombine.low %v2055_v25, %v2087_v18  ;;  %v2983_v63 = vcombine.low %v7957_v27, %v7965_v46  ;;  %v2967_v29 = vcombine.low %v7959_v36, %v7967_v11  ;;  %v2839_v34 = vrot.slane %v2831_v31, %v8131_v26 }
 0x293   :  { %10019 = vst [vmem:[#allocation57_spill] sm:$0xff] %v8205_v38  ;;  %v8229_v24 = vpop.permute.xlu1 %1369 }
 0x294   :  { %10020 = vst [vmem:[#allocation58_spill] sm:$0xff] %v8229_v24  ;;  %v3894_v20 = vsel %vm3887_vm5, %v2111_v45, -inf  ;;  %v2975_v31 = vrot.slane %v2967_v29, %v8131_v26 }
 0x296   :  { %v8241_v13 = vpop.permute.xlu0 %1381 }
 0x297   :  { %3889 = vmax.xlane.f32.xlu0 %v3888_v60  ;;  %v1958_v60 = vrot.slane %v1944_v53, %v8161_v35  ;;  %v3912_v53 = vsel %vm3887_vm5, %v1841_v54, -inf  ;;  %10021 = vst [vmem:[#allocation59_spill] sm:$0xff] %v8241_v13  ;;  %v2815_v54 = vcombine.low %v7906_v62, %v7914_v21  ;;  %v8270_v3 = vpop.permute.xlu1 %1393 }
 0x298   :  { %10022 = vst [vmem:[#allocation60_spill] sm:$0xff] %v8270_v3  ;;  %v10029_v3 = vld [vmem:[#allocation38_spill] sm:$0xff] }
 0x299   :  { %v1977_v37 = vcombine.low %v1926_v48, %v1958_v60  ;;  %v1978_v56 = vcombine.high %v1926_v48, %v1958_v60  ;;  %v1831_v60 = vrot.slane %v1823_v42, %v8161_v35  ;;  %v2062_v48 = vrot.slane %v2048_v9, %v8161_v35 }
 0x29a   :  { %v2935_v9 = vcombine.low %v10023_v8, %v7951_v30 }
 0x29b   :  { %3901 = vmax.xlane.f32.xlu0 %v3900_v61  ;;  %v3915_v6 = vsel %vm3887_vm5, %v1977_v37, -inf  ;;  %v1791_v61 = vcombine.low %v8232_v7, %v8221_v59  ;;  %v3927_v32 = vsel %vm3887_vm5, %v1978_v56, -inf  ;;  %v2855_v37 = vrot.slane %v2847_v22, %v8131_v26  ;;  %v8294_v24 = vpop.permute.xlu1 %1417 }
 0x29c   :  { %3892 = vmax.xlane.f32.xlu1 %v3891_v41  ;;  %v8253_v41 = vrot.slane %v1848_v1, %v8131_v26  ;;  %v2951_v1 = vcombine.low %v7941_v23, %v7949_v14  ;;  %v1967_v56 = vrot.slane %v1959_v0, %v8161_v35  ;;  %v2991_v22 = vrot.slane %v2983_v63, %v8131_v26 }
 0x29d   :  { %v2895_v38 = vcombine.low %v2839_v34, %v2855_v37  ;;  %10025 = vst [vmem:[#allocation61_spill] sm:$0xff] %v8294_v24  ;;  %v10030_v24 = vld [vmem:[#allocation51_spill] sm:$0xff] }
 0x29e   :  { %v1927_v42 = vcombine.low %v8253_v41, %v8256_v52  ;;  %v3031_v63 = vcombine.low %v2975_v31, %v2991_v22 }
 0x29f   :  { %3904 = vmax.xlane.f32.xlu0 %v3903_v15  ;;  %v2112_v15 = vcombine.high %v2055_v25, %v2087_v18  ;;  %v2823_v18 = vrot.slane %v2815_v54, %v8131_v26  ;;  %v2807_v25 = vrot.slane %v2799_v49, %v8131_v26  ;;  %v2959_v54 = vrot.slane %v2951_v1, %v8131_v26  ;;  %v8303_v13 = vpop.permute.xlu1 %1441 }
 0x2a0   :  { %3913 = vmax.xlane.f32.xlu1 %v3912_v53  ;;  %v2113_v53 = vcombine.low %v2062_v48, %v2094_v19  ;;  %v2943_v49 = vrot.slane %v2935_v9, %v8131_v26  ;;  %v2903_v1 = vrot.slane %v2895_v38, %v8161_v35  ;;  %10027 = vst [vmem:[#allocation63_spill] sm:$0xff] %v8303_v13  ;;  %v10036_v13 = vld [vmem:[#allocation45_spill] sm:$0xff] }
 0x2a1   :  { %v3906_v45 = vsel %vm3887_vm5, %v2112_v15, -inf  ;;  %v2863_v0 = vcombine.low %v2807_v25, %v2823_v18 }
 0x2a2   :  { %v3918_v39 = vsel %vm3887_vm5, %v2113_v53, -inf }
 0x2a3   :  { %3916 = vmax.xlane.f32.xlu0 %v3915_v6  ;;  %v8282_v6 = vpop.permute.xlu0 %1405  ;;  %v2871_v9 = vrot.slane %v2863_v0, %v8161_v35  ;;  %v3032_v0 = vcombine.high %v2975_v31, %v2991_v22  ;;  %v8324_v22 = vpop.permute.xlu1 %1465 }
 0x2a4   :  { %3925 = vmax.xlane.f32.xlu1 %v3924_v10  ;;  %10024 = vst [vmem:[#allocation39_spill] sm:$0xff] %v8282_v6  ;;  %v1799_v10 = vrot.slane %v1791_v61, %v8161_v35  ;;  %v1935_v61 = vrot.slane %v1927_v42, %v8161_v35  ;;  %10037 = vst [vmem:[#allocation51_spill] sm:$0xff] %v8324_v22 }
 0x2a6   :  { %v1844_v53 = vcombine.high %v1799_v10, %v1831_v60  ;;  %v1980_v6 = vcombine.high %v1935_v61, %v1967_v56 }
 0x2a7   :  { %3928 = vmax.xlane.f32.xlu0 %v3927_v32  ;;  %v2114_v32 = vcombine.high %v2062_v48, %v2094_v19  ;;  %v8297_v29 = vpop.permute.xlu0 %1429  ;;  %v1979_v48 = vcombine.low %v1935_v61, %v1967_v56  ;;  %v10033_v56 = vld [vmem:[#allocation13_spill] sm:$0xff] }
 0x2a8   :  { %3895 = vmax.xlane.f32.xlu1 %v3894_v20  ;;  %v1843_v20 = vcombine.low %v1799_v10, %v1831_v60  ;;  %10026 = vst [vmem:[#allocation62_spill] sm:$0xff] %v8297_v29  ;;  %v3039_v29 = vrot.slane %v3031_v63, %v8161_v35  ;;  %v3948_v38 = vsel %vm3887_vm5, %v1844_v53, -inf  ;;  %v2927_v10 = vcombine.low %v2871_v9, %v2903_v1  ;;  %v10034_v61 = vld [vmem:[#allocation29_spill] sm:$0xff] }
 0x2a9   :  { %v3930_v19 = vsel %vm3887_vm5, %v2114_v32, -inf  ;;  %v3939_v42 = vsel %vm3887_vm5, %v1979_v48, -inf  ;;  %v10028_v32 = vld [vmem:[#allocation32_spill] sm:$0xff]  ;;  %v2135_v63 = vcombine.low %v10034_v61, %v10033_v56  ;;  %v10035_v48 = vld [vmem:[#allocation15_spill] sm:$0xff] }
 0x2aa   :  { %v3936_v15 = vsel %vm3887_vm5, %v1843_v20, -inf  ;;  %v10031_v20 = vld [vmem:[#allocation30_spill] sm:$0xff]  ;;  %v2119_v50 = vcombine.low %v10036_v13, %v10035_v48 }
 0x2ab   :  { %3907 = vmax.xlane.f32.xlu0 %v3906_v45  ;;  %v2999_v45 = vcombine.low %v2943_v49, %v2959_v54  ;;  %v2151_v60 = vcombine.low %v10031_v20, %v10030_v24  ;;  %v2143_v31 = vrot.slane %v2135_v63, %v8131_v26 }
 0x2ac   :  { %3919 = vmax.xlane.f32.xlu1 %v3918_v39  ;;  %v2896_v39 = vcombine.high %v2839_v34, %v2855_v37  ;;  %v2864_v34 = vcombine.high %v2807_v25, %v2823_v18  ;;  %v2928_v18 = vcombine.high %v2871_v9, %v2903_v1  ;;  %v3000_v25 = vcombine.high %v2943_v49, %v2959_v54 }
 0x2ad   :  { %v3007_v37 = vrot.slane %v2999_v45, %v8161_v35  ;;  %v4080_v45 = vsel %vm3887_vm5, %v2927_v10, -inf }
 0x2ae   :  { %v4092_v9 = vsel %vm3887_vm5, %v2928_v18, -inf }
 0x2af   :  { %3931 = vmax.xlane.f32.xlu0 %v3930_v19  ;;  %v2167_v19 = vcombine.low %v10029_v3, %v10028_v32  ;;  %v3951_v3 = vsel %vm3887_vm5, %v1980_v6, -inf  ;;  %v3063_v20 = vcombine.low %v3007_v37, %v3039_v29  ;;  %v2878_v6 = vrot.slane %v2864_v34, %v8161_v35 }
 0x2b0   :  { %3937 = vmax.xlane.f32.xlu1 %v3936_v15  ;;  %v8312_v15 = vpop.permute.xlu0 %1453  ;;  %v3064_v49 = vcombine.high %v3007_v37, %v3039_v29  ;;  %v3014_v34 = vrot.slane %v3000_v25, %v8161_v35 }
 0x2b1   :  { %10032 = vst [vmem:[#allocation32_spill] sm:$0xff] %v8312_v15  ;;  %v2175_v53 = vrot.slane %v2167_v19, %v8131_v26  ;;  %v2159_v15 = vrot.slane %v2151_v60, %v8131_v26  ;;  %v10038_v19 = vld [vmem:[#allocation11_spill] sm:$0xff]  ;;  %v4083_v54 = vsel %vm3887_vm5, %v3063_v20, -inf  ;;  %v8349_v20 = vpop.permute.xlu1 %1489 }
 0x2b2   :  { %v2032_v13 = vcombine.high %v10038_v19, %v7997_v17  ;;  %v1984_v17 = vcombine.high %v7975_v47, %v7983_v40  ;;  %10041 = vst [vmem:[#allocation29_spill] sm:$0xff] %v8349_v20  ;;  %v4095_v37 = vsel %vm3887_vm5, %v3064_v49, -inf  ;;  %v10084_v20 = vld [vmem:[#allocation17_spill] sm:$0xff] }
 0x2b3   :  { %3940 = vmax.xlane.f32.xlu0 %v3939_v42  ;;  %v2910_v42 = vrot.slane %v2896_v39, %v8161_v35  ;;  %v3046_v39 = vrot.slane %v3032_v0, %v8161_v35  ;;  %v2215_v1 = vcombine.low %v2159_v15, %v2175_v53  ;;  %v2000_v0 = vcombine.high %v7973_v58, %v7981_v43 }
 0x2b4   :  { %3949 = vmax.xlane.f32.xlu1 %v3948_v38  ;;  %v2127_v38 = vrot.slane %v2119_v50, %v8131_v26  ;;  %v8334_v10 = vpop.permute.xlu0 %1477  ;;  %v8344_v63 = vrot.slane %v2032_v13, %v8131_v26  ;;  %v2216_v18 = vcombine.high %v2159_v15, %v2175_v53  ;;  %v8360_v13 = vrot.slane %v1984_v17, %v8131_v26  ;;  %v10045_v17 = vld [vmem:[#allocation49_spill] sm:$0xff] }
 0x2b5   :  { %10040 = vst [vmem:[#allocation13_spill] sm:$0xff] %v8334_v10  ;;  %v2929_v50 = vcombine.low %v2878_v6, %v2910_v42  ;;  %v2930_v58 = vcombine.high %v2878_v6, %v2910_v42  ;;  %v2223_v43 = vrot.slane %v2215_v1, %v8161_v35  ;;  %v8357_v40 = vrot.slane %v2000_v0, %v8131_v26  ;;  %v8368_v49 = vpop.permute.xlu1 %1513  ;;  %v10044_v0 = vld [vmem:[#allocation33_spill] sm:$0xff] }
 0x2b6   :  { %v2184_v19 = vcombine.high %v2127_v38, %v2143_v31  ;;  %v3066_v42 = vcombine.high %v3014_v34, %v3046_v39  ;;  %10043 = vst [vmem:[#allocation11_spill] sm:$0xff] %v8368_v49  ;;  %v1824_v1 = vcombine.high %v8211_v4, %v8203_v33  ;;  %v1792_v33 = vcombine.high %v8232_v7, %v8221_v59 }
 0x2b7   :  { %3952 = vmax.xlane.f32.xlu0 %v3951_v3  ;;  %v10039_v3 = vld [vmem:[#allocation31_spill] sm:$0xff]  ;;  %v4104_v25 = vsel %vm3887_vm5, %v2929_v50, -inf  ;;  %v4116_v6 = vsel %vm3887_vm5, %v2930_v58, -inf  ;;  %v1960_v4 = vcombine.high %v8239_v28, %v8235_v12 }
 0x2b8   :  { %4081 = vmax.xlane.f32.xlu1 %v4080_v45  ;;  %v2016_v60 = vcombine.high %v10039_v3, %v7999_v5  ;;  %v2183_v5 = vcombine.low %v2127_v38, %v2143_v31  ;;  %v3065_v45 = vcombine.low %v3014_v34, %v3046_v39  ;;  %v8354_v47 = vpop.permute.xlu0 %1501  ;;  %v2063_v31 = vcombine.low %v8360_v13, %v8357_v40 }
 0x2b9   :  { %10042 = vst [vmem:[#allocation15_spill] sm:$0xff] %v8354_v47  ;;  %v2198_v38 = vrot.slane %v2184_v19, %v8161_v35  ;;  %v4119_v39 = vsel %vm3887_vm5, %v3066_v42, -inf  ;;  %v10049_v19 = vld [vmem:[#allocation52_spill] sm:$0xff]  ;;  %v1838_v7 = vrot.slane %v1824_v1, %v8161_v35 }
 0x2ba   :  { %v8347_v29 = vrot.slane %v2016_v60, %v8131_v26  ;;  %v2191_v3 = vrot.slane %v2183_v5, %v8161_v35  ;;  %v4107_v53 = vsel %vm3887_vm5, %v3065_v45, -inf  ;;  %v3119_v5 = vcombine.low %v10045_v17, %v10044_v0  ;;  %v10047_v45 = vld [vmem:[#allocation12_spill] sm:$0xff] }
 0x2bb   :  { %4084 = vmax.xlane.f32.xlu0 %v4083_v54  ;;  %v2230_v54 = vrot.slane %v2216_v18, %v8161_v35 }
 0x2bc   :  { %4093 = vmax.xlane.f32.xlu1 %v4092_v9  ;;  %v2095_v15 = vcombine.low %v8347_v29, %v8344_v63  ;;  %v2247_v60 = vcombine.low %v2191_v3, %v2223_v43  ;;  %v8375_v9 = vpop.permute.xlu0 %1521  ;;  %v2248_v50 = vcombine.high %v2191_v3, %v2223_v43  ;;  %v10048_v43 = vld [vmem:[#allocation19_spill] sm:$0xff]  ;;  %v3127_v12 = vrot.slane %v3119_v5, %v8131_v26 }
 0x2bd   :  { %v2249_v58 = vcombine.low %v2198_v38, %v2230_v54  ;;  %v3087_v3 = vcombine.low %v10049_v19, %v10048_v43  ;;  %v2250_v59 = vcombine.high %v2198_v38, %v2230_v54  ;;  %v1974_v38 = vrot.slane %v1960_v4, %v8161_v35 }
 0x2be   :  { %v2103_v34 = vrot.slane %v2095_v15, %v8161_v35  ;;  %v10050_v15 = vld [vmem:[#allocation41_spill] sm:$0xff]  ;;  %v3909_v22 = vsel %vm3887_vm5, %v2248_v50, -inf }
 0x2bf   :  { %4096 = vmax.xlane.f32.xlu0 %v4095_v37  ;;  %v10046_v37 = vld [vmem:[#allocation54_spill] sm:$0xff]  ;;  %v3095_v54 = vrot.slane %v3087_v3, %v8131_v26  ;;  %v3933_v1 = vsel %vm3887_vm5, %v2250_v59, -inf }
 0x2c0   :  { %4105 = vmax.xlane.f32.xlu1 %v4104_v25  ;;  %v3103_v18 = vcombine.low %v10047_v45, %v10046_v37  ;;  %v3897_v25 = vsel %vm3887_vm5, %v2247_v60, -inf  ;;  %v8395_v60 = vpop.permute.xlu1 %1533  ;;  %v8402_v47 = vpop.permute.xlu0 %1545 }
 0x2c2   :  { %v3111_v28 = vrot.slane %v3103_v18, %v8131_v26 }
 0x2c3   :  { %4108 = vmax.xlane.f32.xlu0 %v4107_v53  ;;  %v10051_v53 = vld [vmem:[#allocation50_spill] sm:$0xff] }
 0x2c4   :  { %4117 = vmax.xlane.f32.xlu1 %v4116_v6  ;;  %v3071_v42 = vcombine.low %v10051_v53, %v10050_v15  ;;  %v2071_v6 = vrot.slane %v2063_v31, %v8161_v35  ;;  %v3167_v5 = vcombine.low %v3111_v28, %v3127_v12 }
 0x2c6   :  { %v2115_v10 = vcombine.low %v2071_v6, %v2103_v34  ;;  %v3079_v31 = vrot.slane %v3071_v42, %v8131_v26  ;;  %v2116_v50 = vcombine.high %v2071_v6, %v2103_v34  ;;  %v2984_v42 = vcombine.high %v7957_v27, %v7965_v46 }
 0x2c7   :  { %4120 = vmax.xlane.f32.xlu0 %v4119_v39  ;;  %v1928_v39 = vcombine.high %v8253_v41, %v8256_v52  ;;  %v1806_v41 = vrot.slane %v1792_v33, %v8161_v35  ;;  %v2848_v52 = vcombine.high %v7925_v55, %v7933_v44  ;;  %v2816_v55 = vcombine.high %v7906_v62, %v7914_v21  ;;  %v8417_v44 = vpop.permute.xlu1 %1557  ;;  %v8431_v21 = vpop.permute.xlu0 %1569 }
 0x2c8   :  { %3898 = vmax.xlane.f32.xlu1 %v3897_v25  ;;  %v3921_v25 = vsel %vm3887_vm5, %v2249_v58, -inf  ;;  %v3942_v18 = vsel %vm3887_vm5, %v2115_v10, -inf  ;;  %v3135_v34 = vcombine.low %v3079_v31, %v3095_v54  ;;  %v2968_v62 = vcombine.high %v7959_v36, %v7967_v11 }
 0x2c9   :  { %v1845_v58 = vcombine.low %v1806_v41, %v1838_v7  ;;  %v1942_v33 = vrot.slane %v1928_v39, %v8161_v35  ;;  %v1846_v4 = vcombine.high %v1806_v41, %v1838_v7  ;;  %v3954_v6 = vsel %vm3887_vm5, %v2116_v50, -inf }
 0x2ca   :  { %v3168_v39 = vcombine.high %v3111_v28, %v3127_v12  ;;  %v8437_v59 = vrot.slane %v2816_v55, %v8131_v26  ;;  %v2952_v7 = vcombine.high %v7941_v23, %v7949_v14  ;;  %v2936_v27 = vcombine.high %v10023_v8, %v7951_v30  ;;  %v10052_v8 = vld [vmem:[#allocation38_spill] sm:$0xff] }
 0x2cb   :  { %3910 = vmax.xlane.f32.xlu0 %v3909_v22  ;;  %v2832_v22 = vcombine.high %v7927_v57, %v7935_v2  ;;  %v2800_v57 = vcombine.high %v7757_v16, %v7916_v51  ;;  %v8422_v2 = vrot.slane %v2848_v52, %v8131_v26  ;;  %v1981_v3 = vcombine.low %v1942_v33, %v1974_v38  ;;  %v8456_v14 = vpop.permute.xlu1 %1581 }
 0x2cc   :  { %3922 = vmax.xlane.f32.xlu1 %v3921_v25  ;;  %v3960_v16 = vsel %vm3887_vm5, %v1845_v58, -inf  ;;  %v3175_v51 = vrot.slane %v3167_v5, %v8161_v35  ;;  %v3972_v36 = vsel %vm3887_vm5, %v1846_v4, -inf  ;;  %v3136_v11 = vcombine.high %v3079_v31, %v3095_v54  ;;  %v10053_v54 = vld [vmem:[#allocation30_spill] sm:$0xff]  ;;  %v8470_v5 = vpop.permute.xlu0 %1593 }
 0x2cd   :  { %v8425_v10 = vrot.slane %v2832_v22, %v8131_v26  ;;  %v8445_v46 = vrot.slane %v2800_v57, %v8131_v26  ;;  %v1982_v12 = vcombine.high %v1942_v33, %v1974_v38  ;;  %v3143_v28 = vrot.slane %v3135_v34, %v8161_v35 }
 0x2ce   :  { %v8451_v41 = vrot.slane %v2984_v42, %v8131_v26  ;;  %v8454_v23 = vrot.slane %v2968_v62, %v8131_v26  ;;  %v3963_v30 = vsel %vm3887_vm5, %v1981_v3, -inf  ;;  %v2168_v52 = vcombine.high %v10052_v8, %v10028_v32 }
 0x2cf   :  { %3934 = vmax.xlane.f32.xlu0 %v3933_v1  ;;  %v2911_v25 = vcombine.low %v8425_v10, %v8422_v2  ;;  %v2152_v31 = vcombine.high %v10053_v54, %v10030_v24  ;;  %v3199_v38 = vcombine.low %v3143_v28, %v3175_v51  ;;  %v3182_v22 = vrot.slane %v3168_v39, %v8161_v35  ;;  %v10054_v24 = vld [vmem:[#allocation45_spill] sm:$0xff]  ;;  %v8492_v62 = vpop.permute.xlu1 %1605 }
 0x2d0   :  { %3943 = vmax.xlane.f32.xlu1 %v3942_v18  ;;  %v8465_v1 = vrot.slane %v2952_v7, %v8131_v26  ;;  %v8468_v50 = vrot.slane %v2936_v27, %v8131_v26  ;;  %v2879_v18 = vcombine.low %v8445_v46, %v8437_v59  ;;  %v2136_v32 = vcombine.high %v10034_v61, %v10033_v56 }
 0x2d1   :  { %v2120_v58 = vcombine.high %v10054_v24, %v10035_v48  ;;  %v3150_v33 = vrot.slane %v3136_v11, %v8161_v35  ;;  %v3047_v55 = vcombine.low %v8454_v23, %v8451_v41  ;;  %v3975_v4 = vsel %vm3887_vm5, %v1982_v12, -inf  ;;  %v10056_v12 = vld [vmem:[#allocation47_spill] sm:$0xff]  ;;  %v10061_v24 = vld [vmem:[#allocation42_spill] sm:$0xff] }
 0x2d2   :  { %v3200_v57 = vcombine.high %v3143_v28, %v3175_v51  ;;  %v2919_v34 = vrot.slane %v2911_v25, %v8161_v35  ;;  %v8484_v3 = vrot.slane %v2168_v52, %v8131_v26  ;;  %v8487_v42 = vrot.slane %v2152_v31, %v8131_v26  ;;  %v8501_v51 = vpop.permute.xlu0 %1525  ;;  %v10057_v28 = vld [vmem:[#allocation26_spill] sm:$0xff] }
 0x2d3   :  { %3955 = vmax.xlane.f32.xlu0 %v3954_v6  ;;  %v4086_v56 = vsel %vm3887_vm5, %v3199_v38, -inf  ;;  %v3201_v61 = vcombine.low %v3150_v33, %v3182_v22  ;;  %v3015_v48 = vcombine.low %v8468_v50, %v8465_v1  ;;  %v8495_v6 = vrot.slane %v2136_v32, %v8131_v26  ;;  %10055 = vst [vmem:[#allocation31_spill] sm:$0xff] %v8501_v51  ;;  %v10058_v38 = vld [vmem:[#allocation35_spill] sm:$0xff]  ;;  %v10060_v32 = vld [vmem:[#allocation53_spill] sm:$0xff] }
 0x2d4   :  { %3961 = vmax.xlane.f32.xlu1 %v3960_v16  ;;  %v8498_v39 = vrot.slane %v2120_v58, %v8131_v26  ;;  %v2887_v16 = vrot.slane %v2879_v18, %v8161_v35  ;;  %v4098_v7 = vsel %vm3887_vm5, %v3200_v57, -inf  ;;  %v3202_v27 = vcombine.high %v3150_v33, %v3182_v22  ;;  %v10059_v22 = vld [vmem:[#allocation40_spill] sm:$0xff] }
 0x2d5   :  { %v2231_v11 = vcombine.low %v8487_v42, %v8484_v3  ;;  %v2303_v25 = vcombine.low %v10057_v28, %v10056_v12  ;;  %v3023_v52 = vrot.slane %v3015_v48, %v8161_v35  ;;  %v2271_v18 = vcombine.low %v10059_v22, %v10058_v38  ;;  %v10065_v48 = vld [vmem:[#allocation24_spill] sm:$0xff]  ;;  %v10083_v38 = vld [vmem:[#allocation43_spill] sm:$0xff] }
 0x2d6   :  { %v2931_v8 = vcombine.low %v2887_v16, %v2919_v34  ;;  %v2932_v54 = vcombine.high %v2887_v16, %v2919_v34  ;;  %v2199_v31 = vcombine.low %v8498_v39, %v8495_v6  ;;  %v2287_v58 = vcombine.low %v10061_v24, %v10060_v32  ;;  %v10066_v16 = vld [vmem:[#allocation36_spill] sm:$0xff]  ;;  %v8537_v28 = vpop.permute.xlu0 %1549 }
 0x2d7   :  { %3964 = vmax.xlane.f32.xlu0 %v3963_v30  ;;  %v4110_v30 = vsel %vm3887_vm5, %v3201_v61, -inf  ;;  %v2096_v33 = vcombine.high %v8347_v29, %v8344_v63  ;;  %v4122_v61 = vsel %vm3887_vm5, %v3202_v27, -inf  ;;  %v2239_v24 = vrot.slane %v2231_v11, %v8161_v35  ;;  %v10067_v29 = vld [vmem:[#allocation48_spill] sm:$0xff]  ;;  %v10070_v27 = vld [vmem:[#allocation14_spill] sm:$0xff]  ;;  %10071 = vst [vmem:[#allocation49_spill] sm:$0xff] %v8537_v28 }
 0x2d8   :  { %3973 = vmax.xlane.f32.xlu1 %v3972_v36  ;;  %v3055_v36 = vrot.slane %v3047_v55, %v8161_v35  ;;  %v10062_v55 = vld [vmem:[#allocation16_spill] sm:$0xff]  ;;  %v4128_v51 = vsel %vm3887_vm5, %v2931_v8, -inf  ;;  %v2064_v63 = vcombine.high %v8360_v13, %v8357_v40  ;;  %v8544_v8 = vrot.slane %v2287_v58, %v8131_v26  ;;  %v10072_v13 = vld [vmem:[#allocation37_spill] sm:$0xff]  ;;  %v10074_v58 = vld [vmem:[#allocation55_spill] sm:$0xff] }
 0x2d9   :  { %v2207_v40 = vrot.slane %v2199_v31, %v8161_v35  ;;  %v3207_v49 = vcombine.low %v10084_v20, %v10083_v38  ;;  %v3120_v20 = vcombine.high %v10045_v17, %v10044_v0  ;;  %v3088_v17 = vcombine.high %v10049_v19, %v10048_v43 }
 0x2da   :  { %v3067_v34 = vcombine.low %v3023_v52, %v3055_v36  ;;  %v3068_v11 = vcombine.high %v3023_v52, %v3055_v36  ;;  %v10075_v36 = vld [vmem:[#allocation27_spill] sm:$0xff] }
 0x2db   :  { %3976 = vmax.xlane.f32.xlu0 %v3975_v4  ;;  %v10063_v4 = vld [vmem:[#allocation44_spill] sm:$0xff]  ;;  %v3255_v52 = vcombine.low %v10075_v36, %v10074_v58  ;;  %v2251_v31 = vcombine.low %v2207_v40, %v2239_v24 }
 0x2dc   :  { %4087 = vmax.xlane.f32.xlu1 %v4086_v56  ;;  %v2439_v57 = vcombine.low %v10063_v4, %v10062_v55  ;;  %v8521_v56 = vpop.permute.xlu1 %1537  ;;  %v10068_v4 = vld [vmem:[#allocation46_spill] sm:$0xff]  ;;  %v4131_v28 = vsel %vm3887_vm5, %v3067_v34, -inf }
 0x2dd   :  { %10064 = vst [vmem:[#allocation33_spill] sm:$0xff] %v8521_v56  ;;  %v2407_v56 = vcombine.low %v10068_v4, %v10067_v29  ;;  %v10069_v55 = vld [vmem:[#allocation18_spill] sm:$0xff] }
 0x2de   :  { %v2423_v32 = vcombine.low %v10070_v27, %v10069_v55  ;;  %v8550_v29 = vrot.slane %v2439_v57, %v8131_v26  ;;  %v10079_v27 = vld [vmem:[#allocation22_spill] sm:$0xff] }
 0x2df   :  { %4099 = vmax.xlane.f32.xlu0 %v4098_v7  ;;  %v2255_v7 = vcombine.low %v10066_v16, %v10065_v48  ;;  %v10073_v16 = vld [vmem:[#allocation34_spill] sm:$0xff]  ;;  %v10080_v48 = vld [vmem:[#allocation28_spill] sm:$0xff] }
 0x2e0   :  { %4111 = vmax.xlane.f32.xlu1 %v4110_v30  ;;  %v8527_v30 = vrot.slane %v2303_v25, %v8131_v26  ;;  %v4140_v25 = vsel %vm3887_vm5, %v2932_v54, -inf  ;;  %v2391_v4 = vcombine.low %v10073_v16, %v10072_v13  ;;  %v8562_v16 = vrot.slane %v2407_v56, %v8131_v26  ;;  %v8567_v34 = vpop.permute.xlu1 %1561  ;;  %v10078_v13 = vld [vmem:[#allocation23_spill] sm:$0xff] }
 0x2e1   :  { %v8555_v54 = vrot.slane %v2255_v7, %v8131_v26  ;;  %v8565_v57 = vrot.slane %v2423_v32, %v8131_v26  ;;  %10077 = vst [vmem:[#allocation12_spill] sm:$0xff] %v8567_v34  ;;  %v3223_v55 = vcombine.low %v10079_v27, %v10078_v13  ;;  %v4143_v56 = vsel %vm3887_vm5, %v3068_v11, -inf }
 0x2e2   :  { %v8578_v22 = vrot.slane %v2391_v4, %v8131_v26  ;;  %v3263_v27 = vrot.slane %v3255_v52, %v8131_v26  ;;  %v3104_v52 = vcombine.high %v10047_v45, %v10046_v37  ;;  %v3072_v37 = vcombine.high %v10051_v53, %v10050_v15 }
 0x2e3   :  { %4123 = vmax.xlane.f32.xlu0 %v4122_v61  ;;  %v8541_v61 = vrot.slane %v2271_v18, %v8131_v26  ;;  %v2351_v18 = vcombine.low %v8544_v8, %v8527_v30  ;;  %10076 = vst [vmem:[#allocation54_spill] sm:$0xff] %v8565_v57  ;;  %v2487_v32 = vcombine.low %v8565_v57, %v8550_v29 }
 0x2e4   :  { %4129 = vmax.xlane.f32.xlu1 %v4128_v51  ;;  %v2110_v51 = vrot.slane %v2096_v33, %v8161_v35  ;;  %v2078_v33 = vrot.slane %v2064_v63, %v8161_v35  ;;  %v2252_v63 = vcombine.high %v2207_v40, %v2239_v24  ;;  %v2455_v4 = vcombine.low %v8578_v22, %v8562_v16 }
 0x2e5   :  { %v2319_v7 = vcombine.low %v8555_v54, %v8541_v61  ;;  %v2359_v11 = vrot.slane %v2351_v18, %v8161_v35  ;;  %v3231_v57 = vrot.slane %v3223_v55, %v8131_v26  ;;  %v8623_v15 = vrot.slane %v3088_v17, %v8131_v26 }
 0x2e6   :  { %v2117_v34 = vcombine.low %v2078_v33, %v2110_v51  ;;  %v2118_v24 = vcombine.high %v2078_v33, %v2110_v51  ;;  %v3957_v18 = vsel %vm3887_vm5, %v2252_v63, -inf  ;;  %v2463_v0 = vrot.slane %v2455_v4, %v8161_v35 }
 0x2e7   :  { %4132 = vmax.xlane.f32.xlu0 %v4131_v28  ;;  %v10081_v28 = vld [vmem:[#allocation25_spill] sm:$0xff]  ;;  %v2327_v40 = vrot.slane %v2319_v7, %v8161_v35  ;;  %v8612_v7 = vrot.slane %v3120_v20, %v8131_v26  ;;  %v8626_v20 = vrot.slane %v3072_v37, %v8131_v26 }
 0x2e8   :  { %4141 = vmax.xlane.f32.xlu1 %v4140_v25  ;;  %v3239_v12 = vcombine.low %v10081_v28, %v10080_v48  ;;  %v8582_v25 = vpop.permute.xlu0 %1573  ;;  %v3945_v28 = vsel %vm3887_vm5, %v2251_v31, -inf  ;;  %v8598_v31 = vpop.permute.xlu1 %1585 }
 0x2e9   :  { %10082 = vst [vmem:[#allocation19_spill] sm:$0xff] %v8582_v25  ;;  %10085 = vst [vmem:[#allocation52_spill] sm:$0xff] %v8598_v31  ;;  %v2383_v51 = vcombine.low %v2327_v40, %v2359_v11 }
 0x2ea   :  { %v3247_v25 = vrot.slane %v3239_v12, %v8131_v26  ;;  %v3966_v12 = vsel %vm3887_vm5, %v2117_v34, -inf  ;;  %v3978_v34 = vsel %vm3887_vm5, %v2118_v24, -inf }
 0x2eb   :  { %4144 = vmax.xlane.f32.xlu0 %v4143_v56  ;;  %v2495_v56 = vrot.slane %v2487_v32, %v8161_v35  ;;  %v3984_v4 = vsel %vm3887_vm5, %v2383_v51, -inf  ;;  %v2912_v51 = vcombine.high %v8425_v10, %v8422_v2  ;;  %v3048_v2 = vcombine.high %v8454_v23, %v8451_v41 }
 0x2ec   :  { %3946 = vmax.xlane.f32.xlu1 %v3945_v28  ;;  %v3215_v28 = vrot.slane %v3207_v49, %v8131_v26  ;;  %v3303_v55 = vcombine.low %v3247_v25, %v3263_v27  ;;  %v8604_v33 = vpop.permute.xlu0 %1597  ;;  %v8615_v49 = vrot.slane %v3104_v52, %v8131_v26  ;;  %v3304_v63 = vcombine.high %v3247_v25, %v3263_v27  ;;  %v8620_v19 = vpop.permute.xlu1 %1609 }
 0x2ed   :  { %10086 = vst [vmem:[#allocation41_spill] sm:$0xff] %v8604_v33  ;;  %v2519_v32 = vcombine.low %v2463_v0, %v2495_v56  ;;  %10087 = vst [vmem:[#allocation50_spill] sm:$0xff] %v8620_v19  ;;  %v2520_v25 = vcombine.high %v2463_v0, %v2495_v56  ;;  %v2543_v23 = vcombine.low %v8395_v60, %v8417_v44 }
 0x2ee   :  { %v3271_v45 = vcombine.low %v3215_v28, %v3231_v57  ;;  %v3311_v43 = vrot.slane %v3303_v55, %v8161_v35  ;;  %v3272_v53 = vcombine.high %v3215_v28, %v3231_v57  ;;  %v3151_v57 = vcombine.low %v8626_v20, %v8623_v15 }
 0x2ef   :  { %3958 = vmax.xlane.f32.xlu0 %v3957_v18  ;;  %v2384_v18 = vcombine.high %v2327_v40, %v2359_v11  ;;  %v3987_v27 = vsel %vm3887_vm5, %v2519_v32, -inf  ;;  %v3183_v11 = vcombine.low %v8615_v49, %v8612_v7  ;;  %v3999_v56 = vsel %vm3887_vm5, %v2520_v25, -inf }
 0x2f0   :  { %3967 = vmax.xlane.f32.xlu1 %v3966_v12  ;;  %v3279_v24 = vrot.slane %v3271_v45, %v8161_v35  ;;  %v8629_v52 = vpop.permute.xlu0 %1617  ;;  %v3318_v12 = vrot.slane %v3304_v63, %v8161_v35  ;;  %v3286_v28 = vrot.slane %v3272_v53, %v8161_v35  ;;  %v8641_v17 = vpop.permute.xlu1 %1629  ;;  %v2880_v32 = vcombine.high %v8445_v46, %v8437_v59 }
 0x2f1   :  { %10088 = vst [vmem:[#allocation38_spill] sm:$0xff] %v8629_v52  ;;  %v3996_v40 = vsel %vm3887_vm5, %v2384_v18, -inf  ;;  %10089 = vst [vmem:[#allocation30_spill] sm:$0xff] %v8641_v17  ;;  %v2575_v53 = vcombine.low %v8456_v14, %v8492_v62 }
 0x2f2   :  { %v3335_v55 = vcombine.low %v3279_v24, %v3311_v43  ;;  %v3336_v0 = vcombine.high %v3279_v24, %v3311_v43  ;;  %v3337_v45 = vcombine.low %v3286_v28, %v3318_v12  ;;  %v3338_v18 = vcombine.high %v3286_v28, %v3318_v12 }
 0x2f3   :  { %3979 = vmax.xlane.f32.xlu0 %v3978_v34  ;;  %v3191_v34 = vrot.slane %v3183_v11, %v8161_v35  ;;  %v2926_v43 = vrot.slane %v2912_v51, %v8161_v35  ;;  %v2559_v24 = vcombine.low %v8431_v21, %v8470_v5  ;;  %v2894_v41 = vrot.slane %v2880_v32, %v8161_v35 }
 0x2f4   :  { %3985 = vmax.xlane.f32.xlu1 %v3984_v4  ;;  %v4089_v37 = vsel %vm3887_vm5, %v3335_v55, -inf  ;;  %v8648_v63 = vpop.permute.xlu0 %1641  ;;  %v3159_v4 = vrot.slane %v3151_v57, %v8161_v35  ;;  %v4101_v10 = vsel %vm3887_vm5, %v3336_v0, -inf  ;;  %v4113_v59 = vsel %vm3887_vm5, %v3337_v45, -inf  ;;  %v8662_v25 = vpop.permute.xlu1 %1653 }
 0x2f5   :  { %10090 = vst [vmem:[#allocation45_spill] sm:$0xff] %v8648_v63  ;;  %10091 = vst [vmem:[#allocation55_spill] sm:$0xff] %v8662_v25  ;;  %v2527_v11 = vcombine.low %v8375_v9, %v8402_v47  ;;  %v4125_v55 = vsel %vm3887_vm5, %v3338_v18, -inf  ;;  %v2933_v57 = vcombine.low %v2894_v41, %v2926_v43  ;;  %v3062_v28 = vrot.slane %v3048_v2, %v8161_v35 }
 0x2f6   :  { %v3203_v46 = vcombine.low %v3159_v4, %v3191_v34  ;;  %v3204_v12 = vcombine.high %v3159_v4, %v3191_v34  ;;  %v8679_v51 = vrot.slane %v2559_v24, %v8131_v26  ;;  %v8686_v45 = vrot.slane %v2543_v23, %v8131_v26 }
 0x2f7   :  { %3988 = vmax.xlane.f32.xlu0 %v3987_v27  ;;  %v3016_v27 = vcombine.high %v8468_v50, %v8465_v1  ;;  %v2232_v1 = vcombine.high %v8487_v42, %v8484_v3  ;;  %v8676_v50 = vrot.slane %v2575_v53, %v8131_v26  ;;  %v8689_v3 = vrot.slane %v2527_v11, %v8131_v26 }
 0x2f8   :  { %3997 = vmax.xlane.f32.xlu1 %v3996_v40  ;;  %v8669_v40 = vpop.permute.xlu0 %1665  ;;  %v8691_v42 = vpop.permute.xlu1 %1677  ;;  %v4146_v34 = vsel %vm3887_vm5, %v3204_v12, -inf  ;;  %v4152_v2 = vsel %vm3887_vm5, %v2933_v57, -inf  ;;  %v2352_v24 = vcombine.high %v8544_v8, %v8527_v30  ;;  %v2320_v11 = vcombine.high %v8555_v54, %v8541_v61  ;;  %v10096_v30 = vld [vmem:[#allocation22_spill] sm:$0xff]  ;;  %v10097_v12 = vld [vmem:[#allocation25_spill] sm:$0xff] }
 0x2f9   :  { %10092 = vst [vmem:[#allocation27_spill] sm:$0xff] %v8669_v40  ;;  %v3030_v0 = vrot.slane %v3016_v27, %v8161_v35  ;;  %10093 = vst [vmem:[#allocation23_spill] sm:$0xff] %v8691_v42  ;;  %v2623_v4 = vcombine.low %v8679_v51, %v8676_v50  ;;  %v2591_v18 = vcombine.low %v8689_v3, %v8686_v45 }
 0x2fa   :  { %v3256_v27 = vcombine.high %v10075_v36, %v10074_v58  ;;  %v3224_v8 = vcombine.high %v10096_v30, %v10078_v13  ;;  %v3240_v57 = vcombine.high %v10097_v12, %v10080_v48  ;;  %v10098_v36 = vld [vmem:[#allocation54_spill] sm:$0xff]  ;;  %v2366_v54 = vrot.slane %v2352_v24, %v8161_v35  ;;  %v10102_v24 = vld [vmem:[#allocation61_spill] sm:$0xff] }
 0x2fb   :  { %4000 = vmax.xlane.f32.xlu0 %v3999_v56  ;;  %v4134_v56 = vsel %vm3887_vm5, %v3203_v46, -inf  ;;  %v3069_v32 = vcombine.low %v3030_v0, %v3062_v28  ;;  %v3070_v46 = vcombine.high %v3030_v0, %v3062_v28  ;;  %v2631_v23 = vrot.slane %v2623_v4, %v8161_v35 }
 0x2fc   :  { %4090 = vmax.xlane.f32.xlu1 %v4089_v37  ;;  %v2200_v37 = vcombine.high %v8498_v39, %v8495_v6  ;;  %v2246_v6 = vrot.slane %v2232_v1, %v8161_v35  ;;  %v8698_v39 = vpop.permute.xlu0 %1689  ;;  %v2599_v58 = vrot.slane %v2591_v18, %v8161_v35  ;;  %v2488_v1 = vcombine.high %v10098_v36, %v8550_v29  ;;  %v10109_v36 = vld [vmem:[#allocation57_spill] sm:$0xff] }
 0x2fd   :  { %10094 = vst [vmem:[#allocation28_spill] sm:$0xff] %v8698_v39  ;;  %v4167_v61 = vsel %vm3887_vm5, %v3070_v46, -inf  ;;  %v8728_v13 = vrot.slane %v3256_v27, %v8131_v26  ;;  %v2334_v29 = vrot.slane %v2320_v11, %v8161_v35  ;;  %v8738_v4 = vrot.slane %v3240_v57, %v8131_v26  ;;  %v10104_v27 = vld [vmem:[#allocation39_spill] sm:$0xff]  ;;  %v10107_v57 = vld [vmem:[#allocation58_spill] sm:$0xff] }
 0x2fe   :  { %v2214_v53 = vrot.slane %v2200_v37, %v8161_v35  ;;  %v2656_v18 = vcombine.high %v2599_v58, %v2631_v23  ;;  %v3184_v30 = vcombine.high %v8615_v49, %v8612_v7  ;;  %v10114_v7 = vld [vmem:[#allocation13_spill] sm:$0xff] }
 0x2ff   :  { %4102 = vmax.xlane.f32.xlu0 %v4101_v10  ;;  %v2934_v10 = vcombine.high %v2894_v41, %v2926_v43 }
 0x300   :  { %4114 = vmax.xlane.f32.xlu1 %v4113_v59  ;;  %v4155_v59 = vsel %vm3887_vm5, %v3069_v32, -inf  ;;  %v2253_v41 = vcombine.low %v2214_v53, %v2246_v6  ;;  %v2254_v28 = vcombine.high %v2214_v53, %v2246_v6  ;;  %v8723_v37 = vpop.permute.xlu0 %1621  ;;  %v2456_v32 = vcombine.high %v8578_v22, %v8562_v16 }
 0x301   :  { %v4164_v43 = vsel %vm3887_vm5, %v2934_v10, -inf  ;;  %10100 = vst [vmem:[#allocation22_spill] sm:$0xff] %v8723_v37  ;;  %v2385_v53 = vcombine.low %v2334_v29, %v2366_v54  ;;  %v2502_v22 = vrot.slane %v2488_v1, %v8161_v35  ;;  %v3319_v16 = vcombine.low %v8738_v4, %v8728_v13  ;;  %v10110_v1 = vld [vmem:[#allocation20_spill] sm:$0xff]  ;;  %v10136_v37 = vld [vmem:[#allocation14_spill] sm:$0xff] }
 0x302   :  { %v3969_v48 = vsel %vm3887_vm5, %v2253_v41, -inf }
 0x303   :  { %4126 = vmax.xlane.f32.xlu0 %v4125_v55  ;;  %v8712_v55 = vpop.permute.xlu1 %1701 }
 0x304   :  { %4135 = vmax.xlane.f32.xlu1 %v4134_v56  ;;  %10095 = vst [vmem:[#allocation43_spill] sm:$0xff] %v8712_v55  ;;  %v10099_v56 = vld [vmem:[#allocation17_spill] sm:$0xff] }
 0x305   :  { %v3208_v0 = vcombine.high %v10099_v56, %v10083_v38  ;;  %v8735_v38 = vrot.slane %v3224_v8, %v8131_v26  ;;  %v8756_v8 = vpop.permute.xlu0 %1645  ;;  %v3343_v56 = vcombine.low %v10110_v1, %v10109_v36 }
 0x306   :  { %10106 = vst [vmem:[#allocation54_spill] sm:$0xff] %v8756_v8 }
 0x307   :  { %4147 = vmax.xlane.f32.xlu0 %v4146_v34  ;;  %v2655_v34 = vcombine.low %v2599_v58, %v2631_v23  ;;  %v8742_v10 = vrot.slane %v3208_v0, %v8131_v26  ;;  %v8744_v6 = vpop.permute.xlu1 %1633  ;;  %v2470_v23 = vrot.slane %v2456_v32, %v8161_v35  ;;  %v2386_v0 = vcombine.high %v2334_v29, %v2366_v54 }
 0x308   :  { %4153 = vmax.xlane.f32.xlu1 %v4152_v2  ;;  %v3981_v2 = vsel %vm3887_vm5, %v2254_v28, -inf  ;;  %10101 = vst [vmem:[#allocation25_spill] sm:$0xff] %v8744_v6  ;;  %v10108_v28 = vld [vmem:[#allocation56_spill] sm:$0xff]  ;;  %v3327_v54 = vrot.slane %v3319_v16, %v8161_v35  ;;  %v3152_v29 = vcombine.high %v8626_v20, %v8623_v15 }
 0x309   :  { %v3990_v11 = vsel %vm3887_vm5, %v2655_v34, -inf  ;;  %v3287_v12 = vcombine.low %v8742_v10, %v8735_v38  ;;  %v3359_v58 = vcombine.low %v10108_v28, %v10107_v57  ;;  %v4008_v28 = vsel %vm3887_vm5, %v2385_v53, -inf }
 0x30a   :  { %v8791_v53 = vrot.slane %v3343_v56, %v8131_v26  ;;  %v4020_v16 = vsel %vm3887_vm5, %v2386_v0, -inf  ;;  %v2711_v56 = vcombine.low %v8691_v42, %v8712_v55 }
 0x30b   :  { %4156 = vmax.xlane.f32.xlu0 %v4155_v59  ;;  %v10103_v59 = vld [vmem:[#allocation60_spill] sm:$0xff]  ;;  %v8784_v36 = vpop.permute.xlu1 %1657  ;;  %v3295_v15 = vrot.slane %v3287_v12, %v8161_v35  ;;  %v2695_v12 = vcombine.low %v8669_v40, %v8698_v39  ;;  %v2663_v40 = vcombine.low %v8629_v52, %v8648_v63  ;;  %v10122_v63 = vld [vmem:[#allocation35_spill] sm:$0xff] }
 0x30c   :  { %4165 = vmax.xlane.f32.xlu1 %v4164_v43  ;;  %v3391_v46 = vcombine.low %v10103_v59, %v10102_v24  ;;  %v10105_v43 = vld [vmem:[#allocation59_spill] sm:$0xff]  ;;  %10119 = vst [vmem:[#allocation17_spill] sm:$0xff] %v8784_v36  ;;  %v10137_v36 = vld [vmem:[#allocation48_spill] sm:$0xff] }
 0x30d   :  { %v3375_v41 = vcombine.low %v10105_v43, %v10104_v27  ;;  %v2521_v43 = vcombine.low %v2470_v23, %v2502_v22  ;;  %v3339_v0 = vcombine.low %v3295_v15, %v3327_v54  ;;  %v3340_v39 = vcombine.high %v3295_v15, %v3327_v54 }
 0x30e   :  { %v8771_v32 = vrot.slane %v3391_v46, %v8131_v26  ;;  %v3198_v46 = vrot.slane %v3184_v30, %v8161_v35  ;;  %v8832_v42 = vrot.slane %v2695_v12, %v8131_v26  ;;  %v10128_v12 = vld [vmem:[#allocation36_spill] sm:$0xff] }
 0x30f   :  { %4168 = vmax.xlane.f32.xlu0 %v4167_v61  ;;  %v10111_v61 = vld [vmem:[#allocation11_spill] sm:$0xff]  ;;  %v8774_v27 = vrot.slane %v3375_v41, %v8131_v26  ;;  %v8788_v41 = vrot.slane %v3359_v58, %v8131_v26  ;;  %v4011_v30 = vsel %vm3887_vm5, %v2521_v43, -inf  ;;  %v4149_v57 = vsel %vm3887_vm5, %v3340_v39, -inf }
 0x310   :  { %3970 = vmax.xlane.f32.xlu1 %v3969_v48  ;;  %v10112_v48 = vld [vmem:[#allocation29_spill] sm:$0xff] }
 0x311   :  { %v3527_v34 = vcombine.low %v10112_v48, %v10111_v61  ;;  %v10115_v48 = vld [vmem:[#allocation51_spill] sm:$0xff]  ;;  %v3439_v58 = vcombine.low %v8774_v27, %v8771_v32  ;;  %v3407_v43 = vcombine.low %v8791_v53, %v8788_v41 }
 0x312   :  { %v10116_v61 = vld [vmem:[#allocation63_spill] sm:$0xff] }
 0x313   :  { %3982 = vmax.xlane.f32.xlu0 %v3981_v2  ;;  %v10113_v2 = vld [vmem:[#allocation15_spill] sm:$0xff]  ;;  %v8796_v20 = vrot.slane %v3527_v34, %v8131_v26  ;;  %v3447_v52 = vrot.slane %v3439_v58, %v8161_v35  ;;  %v8850_v58 = vrot.slane %v2663_v40, %v8131_v26 }
 0x314   :  { %3991 = vmax.xlane.f32.xlu1 %v3990_v11  ;;  %v3511_v49 = vcombine.low %v10114_v7, %v10113_v2  ;;  %v4002_v11 = vsel %vm3887_vm5, %v2656_v18, -inf  ;;  %v3495_v7 = vcombine.low %v10116_v61, %v10115_v48  ;;  %v10117_v2 = vld [vmem:[#allocation32_spill] sm:$0xff]  ;;  %v10118_v18 = vld [vmem:[#allocation62_spill] sm:$0xff] }
 0x315   :  { %v3479_v1 = vcombine.low %v10118_v18, %v10117_v2  ;;  %v8801_v18 = vpop.permute.xlu0 %1669  ;;  %v10124_v2 = vld [vmem:[#allocation47_spill] sm:$0xff]  ;;  %v10125_v61 = vld [vmem:[#allocation26_spill] sm:$0xff] }
 0x316   :  { %10120 = vst [vmem:[#allocation64_spill] sm:$0xff] %v8801_v18  ;;  %v8811_v34 = vrot.slane %v3495_v7, %v8131_v26  ;;  %v8825_v7 = vpop.permute.xlu1 %1681  ;;  %v2304_v48 = vcombine.high %v10125_v61, %v10124_v2  ;;  %v10130_v61 = vld [vmem:[#allocation42_spill] sm:$0xff] }
 0x317   :  { %4003 = vmax.xlane.f32.xlu0 %v4002_v11  ;;  %v8799_v11 = vrot.slane %v3511_v49, %v8131_v26  ;;  %v8814_v49 = vrot.slane %v3479_v1, %v8131_v26  ;;  %10121 = vst [vmem:[#allocation65_spill] sm:$0xff] %v8825_v7 }
 0x318   :  { %4009 = vmax.xlane.f32.xlu1 %v4008_v28  ;;  %v2522_v28 = vcombine.high %v2470_v23, %v2502_v22  ;;  %v3166_v22 = vrot.slane %v3152_v29, %v8161_v35  ;;  %v2679_v23 = vcombine.low %v8641_v17, %v8662_v25  ;;  %v8829_v29 = vrot.slane %v2711_v56, %v8131_v26  ;;  %v10123_v25 = vld [vmem:[#allocation40_spill] sm:$0xff] }
 0x319   :  { %v4137_v17 = vsel %vm3887_vm5, %v3339_v0, -inf  ;;  %v2272_v55 = vcombine.high %v10123_v25, %v10122_v63  ;;  %v3543_v54 = vcombine.low %v8814_v49, %v8811_v34  ;;  %v8842_v15 = vpop.permute.xlu0 %1693  ;;  %v10127_v56 = vld [vmem:[#allocation24_spill] sm:$0xff]  ;;  %v3415_v63 = vrot.slane %v3407_v43, %v8161_v35  ;;  %v10129_v25 = vld [vmem:[#allocation53_spill] sm:$0xff] }
 0x31a   :  { %v4023_v1 = vsel %vm3887_vm5, %v2522_v28, -inf  ;;  %10126 = vst [vmem:[#allocation35_spill] sm:$0xff] %v8842_v15  ;;  %v3206_v28 = vcombine.high %v3166_v22, %v3198_v46  ;;  %v8847_v0 = vrot.slane %v2679_v23, %v8131_v26  ;;  %v2288_v2 = vcombine.high %v10130_v61, %v10129_v25  ;;  %v8866_v43 = vpop.permute.xlu1 %1705 }
 0x31b   :  { %4012 = vmax.xlane.f32.xlu0 %v4011_v30  ;;  %v3575_v30 = vcombine.low %v8799_v11, %v8796_v20  ;;  %v8861_v23 = vrot.slane %v2272_v55, %v8131_v26  ;;  %v8864_v40 = vrot.slane %v2304_v48, %v8131_v26  ;;  %10131 = vst [vmem:[#allocation40_spill] sm:$0xff] %v8866_v43  ;;  %v10134_v61 = vlaneseq }
 0x31c   :  { %4021 = vmax.xlane.f32.xlu1 %v4020_v16  ;;  %v3205_v16 = vcombine.low %v3166_v22, %v3198_v46  ;;  %v3471_v22 = vcombine.low %v3415_v63, %v3447_v52  ;;  %v4170_v39 = vsel %vm3887_vm5, %v3206_v28, -inf  ;;  %v2727_v55 = vcombine.low %v8850_v58, %v8847_v0 }
 0x31d   :  { %v3583_v59 = vrot.slane %v3575_v30, %v8161_v35  ;;  %v3551_v30 = vrot.slane %v3543_v54, %v8161_v35  ;;  %v8878_v48 = vand.u32 127, %v10134_v61  ;;  %v8881_v24 = vrot.slane %v2288_v2, %v8131_v26 }
 0x31e   :  { %v4158_v46 = vsel %vm3887_vm5, %v3205_v16, -inf  ;;  %v10133_v16 = vld [vmem:[#allocation44_spill] sm:$0xff]  ;;  %v2624_v54 = vcombine.high %v8679_v51, %v8676_v50  ;;  %v4176_v8 = vsel %vm3887_vm5, %v3471_v22, -inf  ;;  %v2592_v50 = vcombine.high %v8689_v3, %v8686_v45  ;;  %v10143_v3 = vld [vmem:[#allocation21_spill] sm:$0xff] }
 0x31f   :  { %4024 = vmax.xlane.f32.xlu0 %v4023_v1  ;;  %v2256_v1 = vcombine.high %v10128_v12, %v10127_v56  ;;  %v2367_v2 = vcombine.low %v8881_v24, %v8864_v40  ;;  %v2735_v15 = vrot.slane %v2727_v55, %v8161_v35 }
 0x320   :  { %4138 = vmax.xlane.f32.xlu1 %v4137_v17  ;;  %v2759_v17 = vcombine.low %v8832_v42, %v8829_v29  ;;  %v2638_v45 = vrot.slane %v2624_v54, %v8161_v35 }
 0x321   :  { %v8871_v12 = vrot.slane %v2256_v1, %v8131_v26  ;;  %v3607_v1 = vcombine.low %v3551_v30, %v3583_v59  ;;  %v2375_v54 = vrot.slane %v2367_v2, %v8161_v35 }
 0x322   :  { %v2767_v6 = vrot.slane %v2759_v17, %v8161_v35 }
 0x323   :  { %4150 = vmax.xlane.f32.xlu0 %v4149_v57  ;;  %v10132_v57 = vld [vmem:[#allocation16_spill] sm:$0xff]  ;;  %v2335_v61 = vcombine.low %v8871_v12, %v8861_v23 }
 0x324   :  { %4159 = vmax.xlane.f32.xlu1 %v4158_v46  ;;  %v3890_v56 = vpop.xlane.xlu0 %3889  ;;  %v2440_v25 = vcombine.high %v10133_v16, %v10132_v57  ;;  %v10135_v46 = vld [vmem:[#allocation18_spill] sm:$0xff]  ;;  %v3472_v57 = vcombine.high %v3415_v63, %v3447_v52  ;;  %v4417_v16 = vadd.s32 4294967288, %v8878_v48  ;;  %v10139_v52 = vld [vmem:[#allocation37_spill] sm:$0xff] }
 0x325   :  { %v2424_v28 = vcombine.high %v10136_v37, %v10135_v46  ;;  %v10138_v37 = vld [vmem:[#allocation46_spill] sm:$0xff] }
 0x326   :  { %v2408_v46 = vcombine.high %v10138_v37, %v10137_v36  ;;  %v10140_v63 = vld [vmem:[#allocation34_spill] sm:$0xff]  ;;  %v8901_v17 = vrot.slane %v2440_v25, %v8131_v26  ;;  %v4179_v36 = vsel %vm3887_vm5, %v3607_v1, -inf  ;;  %v3608_v37 = vcombine.high %v3551_v30, %v3583_v59 }
 0x327   :  { %4171 = vmax.xlane.f32.xlu0 %v4170_v39  ;;  %v2392_v39 = vcombine.high %v10140_v63, %v10139_v52  ;;  %v8905_v7 = vrot.slane %v2424_v28, %v8131_v26  ;;  %v4188_v52 = vsel %vm3887_vm5, %v3472_v57, -inf  ;;  %v8915_v25 = vsub.s32 %v4417_v16, %v10143_v3 }
 0x328   :  { %4177 = vmax.xlane.f32.xlu1 %v4176_v8  ;;  %v3902_v51 = vpop.xlane.xlu0 %3901  ;;  %10141 = vst [vmem:[#allocation47_spill] sm:$0xff] %v8901_v17  ;;  %v8911_v8 = vsub.s32 %v8878_v48, %v10143_v3  ;;  %v8918_v55 = vrot.slane %v2408_v46, %v8131_v26  ;;  %v2606_v59 = vrot.slane %v2592_v50, %v8161_v35  ;;  %v4191_v63 = vsel %vm3887_vm5, %v3608_v37, -inf  ;;  %v10147_v37 = vld [vmem:[#allocation33_spill] sm:$0xff] }
 0x329   :  { %v3893_v22 = vpop.xlane.xlu1 %3892  ;;  %v4272_v18 = vmax.f32 %v3890_v56, %v3902_v51  ;;  %10142 = vst [vmem:[#allocation26_spill] sm:$0xff] %v8905_v7  ;;  %v2791_v56 = vcombine.low %v2735_v15, %v2767_v6  ;;  %v2343_v30 = vrot.slane %v2335_v61, %v8161_v35  ;;  %v8924_v1 = vrot.slane %v2392_v39, %v8131_v26  ;;  %v10145_v61 = vld [vmem:[#allocation19_spill] sm:$0xff] }
 0x32a   :  { %v2503_v57 = vcombine.low %v8905_v7, %v8901_v17  ;;  %v3663_v46 = vcombine.low %v8598_v31, %v8620_v19  ;;  %v2657_v50 = vcombine.low %v2606_v59, %v2638_v45  ;;  %v10146_v19 = vld [vmem:[#allocation12_spill] sm:$0xff]  ;;  %v10149_v7 = vld [vmem:[#allocation31_spill] sm:$0xff] }
 0x32b   :  { %4180 = vmax.xlane.f32.xlu0 %v4179_v36  ;;  %10144 = vst [vmem:[#allocation24_spill] sm:$0xff] %v8924_v1  ;;  %v2792_v36 = vcombine.high %v2735_v15, %v2767_v6  ;;  %v4416_v2 = vrot.slane %v4272_v18, %v8911_v8  ;;  %v3993_v43 = vsel %vm3887_vm5, %v2791_v56, -inf  ;;  %v2387_v31 = vcombine.low %v2343_v30, %v2375_v54  ;;  %v10148_v15 = vld [vmem:[#allocation49_spill] sm:$0xff] }
 0x32c   :  { %4189 = vmax.xlane.f32.xlu1 %v4188_v52  ;;  %v3905_v28 = vpop.xlane.xlu0 %3904  ;;  %v3647_v52 = vcombine.low %v10145_v61, %v8604_v33  ;;  %v3631_v6 = vcombine.low %v10147_v37, %v10146_v19  ;;  %v3615_v17 = vcombine.low %v10149_v7, %v10148_v15  ;;  %v3320_v56 = vcombine.high %v8738_v4, %v8728_v13 }
 0x32d   :  { %v4273_v16 = vmax.f32 %v3893_v22, %v3905_v28  ;;  %v3914_v51 = vpop.xlane.xlu1 %3913  ;;  %v2471_v22 = vcombine.low %v8924_v1, %v8918_v55  ;;  %v4005_v33 = vsel %vm3887_vm5, %v2792_v36, -inf  ;;  %v8948_v1 = vrot.slane %v3663_v46, %v8131_v26 }
 0x32e   :  { %v8951_v37 = vrot.slane %v3647_v52, %v8131_v26  ;;  %v4014_v7 = vsel %vm3887_vm5, %v2657_v50, -inf  ;;  %v2388_v13 = vcombine.high %v2343_v30, %v2375_v54  ;;  %v3288_v4 = vcombine.high %v8742_v10, %v8735_v38 }
 0x32f   :  { %v4421_v39 = vrot.slane %v4273_v16, %v8915_v25  ;;  %4192 = vmax.xlane.f32.xlu0 %v4191_v63  ;;  %v2511_v16 = vrot.slane %v2503_v57, %v8161_v35  ;;  %v4032_v36 = vsel %vm3887_vm5, %v2387_v31, -inf  ;;  %v3334_v50 = vrot.slane %v3320_v56, %v8161_v35 }
 0x330   :  { %3994 = vmax.xlane.f32.xlu1 %v3993_v43  ;;  %v3917_v28 = vpop.xlane.xlu0 %3916  ;;  %v2658_v43 = vcombine.high %v2606_v59, %v2638_v45  ;;  %v8959_v45 = vrot.slane %v3631_v6, %v8131_v26  ;;  %v8962_v59 = vrot.slane %v3615_v17, %v8131_v26  ;;  %v3711_v30 = vcombine.low %v8951_v37, %v8948_v1 }
 0x331   :  { %v4423_v61 = vsel %vm4422_vm6, %v4421_v39, %v4416_v2  ;;  %v3926_v18 = vpop.xlane.xlu1 %3925  ;;  %v4424_v2 = vadd.s32 4294967280, %v8878_v48  ;;  %v2479_v39 = vrot.slane %v2471_v22, %v8161_v35  ;;  %v3302_v6 = vrot.slane %v3288_v4, %v8161_v35 }
 0x332   :  { %v4276_v63 = vmax.f32 %v3914_v51, %v3926_v18  ;;  %v4026_v46 = vsel %vm3887_vm5, %v2658_v43, -inf  ;;  %v3679_v52 = vcombine.low %v8962_v59, %v8959_v45  ;;  %v4044_v56 = vsel %vm3887_vm5, %v2388_v13, -inf }
 0x333   :  { %4006 = vmax.xlane.f32.xlu0 %v4005_v33  ;;  %v8972_v17 = vsub.s32 %v4424_v2, %v10143_v3  ;;  %v3440_v43 = vcombine.high %v8774_v27, %v8771_v32  ;;  %v3576_v4 = vcombine.high %v8799_v11, %v8796_v20 }
 0x334   :  { %4015 = vmax.xlane.f32.xlu1 %v4014_v7  ;;  %v3929_v57 = vpop.xlane.xlu0 %3928  ;;  %v2523_v7 = vcombine.low %v2479_v39, %v2511_v16  ;;  %v4441_v38 = vrot.slane %v4276_v63, %v8911_v8  ;;  %v2524_v63 = vcombine.high %v2479_v39, %v2511_v16  ;;  %v2576_v16 = vcombine.high %v8456_v14, %v8492_v62 }
 0x335   :  { %v4277_v51 = vmax.f32 %v3917_v28, %v3929_v57  ;;  %v3896_v33 = vpop.xlane.xlu1 %3895  ;;  %v3341_v57 = vcombine.low %v3302_v6, %v3334_v50  ;;  %v3687_v13 = vrot.slane %v3679_v52, %v8161_v35 }
 0x336   :  { %v4035_v18 = vsel %vm3887_vm5, %v2523_v7, -inf  ;;  %v2336_v7 = vcombine.high %v8871_v12, %v8861_v23  ;;  %v4047_v20 = vsel %vm3887_vm5, %v2524_v63, -inf  ;;  %v2544_v23 = vcombine.high %v8395_v60, %v8417_v44 }
 0x337   :  { %v4445_v10 = vrot.slane %v4277_v51, %v8915_v25  ;;  %4027 = vmax.xlane.f32.xlu0 %v4026_v46  ;;  %v3719_v51 = vrot.slane %v3711_v30, %v8161_v35  ;;  %v4161_v62 = vsel %vm3887_vm5, %v3341_v57, -inf }
 0x338   :  { %4033 = vmax.xlane.f32.xlu1 %v4032_v36  ;;  %v3908_v54 = vpop.xlane.xlu0 %3907  ;;  %v3342_v36 = vcombine.high %v3302_v6, %v3334_v50  ;;  %v3544_v50 = vcombine.high %v8814_v49, %v8811_v34  ;;  %v3590_v34 = vrot.slane %v3576_v4, %v8161_v35  ;;  %v9035_v6 = vrot.slane %v2336_v7, %v8161_v35 }
 0x339   :  { %v4446_v31 = vsel %vm4422_vm6, %v4445_v10, %v4441_v38  ;;  %v4274_v22 = vmax.f32 %v3896_v33, %v3908_v54  ;;  %v3920_v28 = vpop.xlane.xlu1 %3919  ;;  %v3408_v33 = vcombine.high %v8791_v53, %v8788_v41  ;;  %v2368_v41 = vcombine.high %v8881_v24, %v8864_v40 }
 0x33a   :  { %v2560_v53 = vcombine.high %v8431_v21, %v8470_v5  ;;  %v3743_v11 = vcombine.low %v3687_v13, %v3719_v51  ;;  %v2528_v24 = vcombine.high %v8375_v9, %v8402_v47  ;;  %v9012_v40 = vrot.slane %v2576_v16, %v8131_v26 }
 0x33b   :  { %v4428_v2 = vrot.slane %v4274_v22, %v8972_v17  ;;  %4036 = vmax.xlane.f32.xlu0 %v4035_v18  ;;  %v3422_v5 = vrot.slane %v3408_v33, %v8161_v35  ;;  %v4173_v38 = vsel %vm3887_vm5, %v3342_v36, -inf  ;;  %v2760_v47 = vcombine.high %v8832_v42, %v8829_v29  ;;  %v10150_v33 = vld [vmem:[#allocation24_spill] sm:$0xff]  ;;  %v10152_v36 = vld [vmem:[#allocation26_spill] sm:$0xff] }
 0x33c   :  { %4045 = vmax.xlane.f32.xlu1 %v4044_v56  ;;  %v3932_v46 = vpop.xlane.xlu0 %3931  ;;  %v9020_v60 = vrot.slane %v2560_v53, %v8131_v26  ;;  %v3744_v44 = vcombine.high %v3687_v13, %v3719_v51  ;;  %v4182_v49 = vsel %vm3887_vm5, %v3743_v11, -inf  ;;  %v9026_v54 = vrot.slane %v2544_v23, %v8131_v26 }
 0x33d   :  { %v8991_v27 = vsel %vm4429_vm7, %v4428_v2, %v4423_v61  ;;  %v4278_v32 = vmax.f32 %v3920_v28, %v3932_v46  ;;  %v3938_v39 = vpop.xlane.xlu1 %3937  ;;  %v3454_v61 = vrot.slane %v3440_v43, %v8161_v35  ;;  %v9029_v52 = vrot.slane %v2528_v24, %v8131_v26  ;;  %v10151_v46 = vld [vmem:[#allocation47_spill] sm:$0xff] }
 0x33e   :  { %v3558_v28 = vrot.slane %v3544_v50, %v8161_v35  ;;  %v9038_v18 = vrot.slane %v2368_v41, %v8161_v35  ;;  %v2639_v56 = vcombine.low %v9020_v60, %v9012_v40  ;;  %v4194_v63 = vsel %vm3887_vm5, %v3744_v44, -inf  ;;  %v10154_v50 = vld [vmem:[#allocation65_spill] sm:$0xff]  ;;  %v10155_v24 = vld [vmem:[#allocation35_spill] sm:$0xff] }
 0x33f   :  { %v4450_v14 = vrot.slane %v4278_v32, %v8972_v17  ;;  %4048 = vmax.xlane.f32.xlu0 %v4047_v20  ;;  %v3473_v10 = vcombine.low %v3422_v5, %v3454_v61  ;;  %v3474_v51 = vcombine.high %v3422_v5, %v3454_v61  ;;  %v2472_v4 = vcombine.high %v10150_v33, %v8918_v55  ;;  %v10153_v61 = vld [vmem:[#allocation40_spill] sm:$0xff] }
 0x340   :  { %4162 = vmax.xlane.f32.xlu1 %v4161_v62  ;;  %v3941_v21 = vpop.xlane.xlu0 %3940  ;;  %v3609_v43 = vcombine.low %v3558_v28, %v3590_v34  ;;  %v2504_v16 = vcombine.high %v10152_v36, %v10151_v46  ;;  %v2607_v32 = vcombine.low %v9029_v52, %v9026_v54  ;;  %v3610_v53 = vcombine.high %v3558_v28, %v3590_v34  ;;  %v10160_v28 = vld [vmem:[#allocation22_spill] sm:$0xff]  ;;  %v10162_v46 = vld [vmem:[#allocation60_spill] sm:$0xff] }
 0x341   :  { %v9015_v12 = vsel %vm4429_vm7, %v4450_v14, %v4446_v31  ;;  %v3950_v30 = vpop.xlane.xlu1 %3949  ;;  %v2728_v31 = vcombine.high %v8850_v58, %v8847_v0  ;;  %v2774_v0 = vrot.slane %v2760_v47, %v8161_v35  ;;  %v4200_v57 = vsel %vm3887_vm5, %v3473_v10, -inf  ;;  %v10158_v10 = vld [vmem:[#allocation25_spill] sm:$0xff] }
 0x342   :  { %v4280_v9 = vmax.f32 %v3938_v39, %v3950_v30  ;;  %v2389_v20 = vcombine.low %v9035_v6, %v9038_v18  ;;  %v4203_v55 = vsel %vm3887_vm5, %v3609_v43, -inf  ;;  %v2647_v11 = vrot.slane %v2639_v56, %v8161_v35 }
 0x343   :  { %4174 = vmax.xlane.f32.xlu0 %v4173_v38  ;;  %v2742_v13 = vrot.slane %v2728_v31, %v8161_v35  ;;  %v3799_v23 = vcombine.low %v10154_v50, %v10153_v61  ;;  %v4212_v30 = vsel %vm3887_vm5, %v3474_v51, -inf  ;;  %v2615_v34 = vrot.slane %v2607_v32, %v8161_v35  ;;  %v10164_v32 = vld [vmem:[#allocation59_spill] sm:$0xff] }
 0x344   :  { %4183 = vmax.xlane.f32.xlu1 %v4182_v49  ;;  %v3953_v22 = vpop.xlane.xlu0 %3952  ;;  %v4460_v58 = vrot.slane %v4280_v9, %v8911_v8  ;;  %v2486_v47 = vrot.slane %v2472_v4, %v8161_v35  ;;  %v2518_v9 = vrot.slane %v2504_v16, %v8161_v35  ;;  %v2390_v44 = vcombine.high %v9035_v6, %v9038_v18  ;;  %v10157_v49 = vld [vmem:[#allocation17_spill] sm:$0xff]  ;;  %v10163_v16 = vld [vmem:[#allocation39_spill] sm:$0xff] }
 0x345   :  { %v4281_v42 = vmax.f32 %v3941_v21, %v3953_v22  ;;  %v4082_v29 = vpop.xlane.xlu1 %4081  ;;  %v2793_v62 = vcombine.low %v2742_v13, %v2774_v0  ;;  %v10156_v21 = vld [vmem:[#allocation64_spill] sm:$0xff]  ;;  %v3767_v31 = vcombine.low %v10158_v10, %v10157_v49  ;;  %v10159_v22 = vld [vmem:[#allocation54_spill] sm:$0xff]  ;;  %v4215_v43 = vsel %vm3887_vm5, %v3610_v53, -inf  ;;  %v10161_v4 = vld [vmem:[#allocation61_spill] sm:$0xff] }
 0x346   :  { %v3783_v5 = vcombine.low %v10156_v21, %v10155_v24  ;;  %v9079_v51 = vrot.slane %v3799_v23, %v8131_v26  ;;  %v3392_v36 = vcombine.high %v10162_v46, %v10161_v4  ;;  %v10165_v53 = vld [vmem:[#allocation58_spill] sm:$0xff]  ;;  %v4068_v4 = vsel %vm3887_vm5, %v2390_v44, -inf  ;;  %v10170_v46 = vld [vmem:[#allocation29_spill] sm:$0xff] }
 0x347   :  { %v4464_v2 = vrot.slane %v4281_v42, %v8915_v25  ;;  %4195 = vmax.xlane.f32.xlu0 %v4194_v63  ;;  %v3751_v42 = vcombine.low %v10160_v28, %v10159_v22  ;;  %v4056_v63 = vsel %vm3887_vm5, %v2389_v20, -inf  ;;  %v10166_v20 = vld [vmem:[#allocation56_spill] sm:$0xff] }
 0x348   :  { %4201 = vmax.xlane.f32.xlu1 %v4200_v57  ;;  %v4085_v39 = vpop.xlane.xlu0 %4084  ;;  %v2659_v57 = vcombine.low %v2615_v34, %v2647_v11  ;;  %v9082_v6 = vrot.slane %v3783_v5, %v8131_v26 }
 0x349   :  { %v9055_v7 = vsel %vm4422_vm6, %v4464_v2, %v4460_v58  ;;  %v4094_v41 = vpop.xlane.xlu1 %4093  ;;  %v4017_v58 = vsel %vm3887_vm5, %v2793_v62, -inf  ;;  %v2794_v2 = vcombine.high %v2742_v13, %v2774_v0  ;;  %v2525_v13 = vcombine.low %v2486_v47, %v2518_v9 }
 0x34a   :  { %v4304_v14 = vmax.f32 %v4082_v29, %v4094_v41  ;;  %v2526_v41 = vcombine.high %v2486_v47, %v2518_v9  ;;  %v9093_v62 = vrot.slane %v3767_v31, %v8131_v26  ;;  %v2660_v47 = vcombine.high %v2615_v34, %v2647_v11 }
 0x34b   :  { %4204 = vmax.xlane.f32.xlu0 %v4203_v55  ;;  %v3360_v55 = vcombine.high %v10166_v20, %v10165_v53  ;;  %v3847_v9 = vcombine.low %v9082_v6, %v9079_v51  ;;  %v4038_v31 = vsel %vm3887_vm5, %v2659_v57, -inf  ;;  %v4059_v11 = vsel %vm3887_vm5, %v2525_v13, -inf  ;;  %v10169_v57 = vld [vmem:[#allocation11_spill] sm:$0xff]  ;;  %v10172_v53 = vld [vmem:[#allocation13_spill] sm:$0xff] }
 0x34c   :  { %4213 = vmax.xlane.f32.xlu1 %v4212_v30  ;;  %v4097_v38 = vpop.xlane.xlu0 %4096  ;;  %v4574_v18 = vrot.slane %v4304_v14, %v8911_v8  ;;  %v9096_v14 = vrot.slane %v3751_v42, %v8131_v26  ;;  %v10167_v30 = vld [vmem:[#allocation57_spill] sm:$0xff]  ;;  %v4431_v42 = vadd.s32 4294967272, %v8878_v48  ;;  %v4071_v34 = vsel %vm3887_vm5, %v2526_v41, -inf }
 0x34d   :  { %v4305_v29 = vmax.f32 %v4085_v39, %v4097_v38  ;;  %v4106_v56 = vpop.xlane.xlu1 %4105  ;;  %v3376_v39 = vcombine.high %v10164_v32, %v10163_v16  ;;  %v10168_v38 = vld [vmem:[#allocation20_spill] sm:$0xff]  ;;  %v3528_v48 = vcombine.high %v10170_v46, %v10169_v57  ;;  %v3712_v13 = vcombine.high %v8951_v37, %v8948_v1  ;;  %v10176_v1 = vld [vmem:[#allocation62_spill] sm:$0xff] }
 0x34e   :  { %v3815_v44 = vcombine.low %v9096_v14, %v9093_v62  ;;  %v4050_v41 = vsel %vm3887_vm5, %v2660_v47, -inf }
 0x34f   :  { %v4578_v33 = vrot.slane %v4305_v29, %v8915_v25  ;;  %4216 = vmax.xlane.f32.xlu0 %v4215_v43  ;;  %v3344_v29 = vcombine.high %v10168_v38, %v10167_v30  ;;  %v9135_v30 = vsub.s32 %v4431_v42, %v10143_v3  ;;  %v9147_v57 = vrot.slane %v3528_v48, %v8131_v26  ;;  %v10180_v48 = vld [vmem:[#allocation27_spill] sm:$0xff] }
 0x350   :  { %4018 = vmax.xlane.f32.xlu1 %v4017_v58  ;;  %v4109_v0 = vpop.xlane.xlu0 %4108  ;;  %v4029_v58 = vsel %vm3887_vm5, %v2794_v2, -inf  ;;  %v9118_v2 = vrot.slane %v3360_v55, %v8131_v26  ;;  %v3823_v46 = vrot.slane %v3815_v44, %v8161_v35 }
 0x351   :  { %v9099_v23 = vsel %vm4422_vm6, %v4578_v33, %v4574_v18  ;;  %v4118_v5 = vpop.xlane.xlu1 %4117  ;;  %v9110_v18 = vrot.slane %v3392_v36, %v8131_v26  ;;  %v9113_v33 = vrot.slane %v3376_v39, %v8131_v26  ;;  %v9125_v32 = vrot.slane %v3344_v29, %v8131_v26  ;;  %v10171_v39 = vld [vmem:[#allocation15_spill] sm:$0xff] }
 0x352   :  { %v4308_v43 = vmax.f32 %v4106_v56, %v4118_v5  ;;  %v3512_v20 = vcombine.high %v10172_v53, %v10171_v39  ;;  %v10173_v29 = vld [vmem:[#allocation51_spill] sm:$0xff] }
 0x353   :  { %4030 = vmax.xlane.f32.xlu0 %v4029_v58  ;;  %v3455_v38 = vcombine.low %v9113_v33, %v9110_v18  ;;  %v10174_v58 = vld [vmem:[#allocation63_spill] sm:$0xff] }
 0x354   :  { %4039 = vmax.xlane.f32.xlu1 %v4038_v31  ;;  %v4121_v56 = vpop.xlane.xlu0 %4120  ;;  %v4593_v55 = vrot.slane %v4308_v43, %v8911_v8  ;;  %v3496_v31 = vcombine.high %v10174_v58, %v10173_v29  ;;  %v3680_v43 = vcombine.high %v8962_v59, %v8959_v45  ;;  %v10177_v39 = vld [vmem:[#allocation43_spill] sm:$0xff]  ;;  %v3726_v45 = vrot.slane %v3712_v13, %v8161_v35 }
 0x355   :  { %v4309_v36 = vmax.f32 %v4109_v0, %v4121_v56  ;;  %v3899_v16 = vpop.xlane.xlu1 %3898  ;;  %v3855_v0 = vrot.slane %v3847_v9, %v8161_v35  ;;  %v10175_v56 = vld [vmem:[#allocation32_spill] sm:$0xff]  ;;  %v10178_v53 = vld [vmem:[#allocation23_spill] sm:$0xff]  ;;  %v3423_v59 = vcombine.low %v9125_v32, %v9118_v2  ;;  %v3463_v58 = vrot.slane %v3455_v38, %v8161_v35 }
 0x356   :  { %v3480_v37 = vcombine.high %v10176_v1, %v10175_v56  ;;  %v9165_v44 = vrot.slane %v3496_v31, %v8131_v26  ;;  %v3694_v13 = vrot.slane %v3680_v43, %v8161_v35  ;;  %v10181_v56 = vld [vmem:[#allocation55_spill] sm:$0xff]  ;;  %v10182_v1 = vld [vmem:[#allocation30_spill] sm:$0xff] }
 0x357   :  { %v4597_v5 = vrot.slane %v4309_v36, %v8915_v25  ;;  %4051 = vmax.xlane.f32.xlu0 %v4050_v41  ;;  %v9154_v36 = vrot.slane %v3512_v20, %v8131_v26  ;;  %v2712_v41 = vcombine.high %v10178_v53, %v10177_v39  ;;  %v10183_v39 = vld [vmem:[#allocation45_spill] sm:$0xff]  ;;  %v10184_v53 = vld [vmem:[#allocation38_spill] sm:$0xff]  ;;  %v3880_v43 = vcombine.high %v3823_v46, %v3855_v0 }
 0x358   :  { %4057 = vmax.xlane.f32.xlu1 %v4056_v63  ;;  %v3911_v47 = vpop.xlane.xlu0 %3910  ;;  %v10179_v63 = vld [vmem:[#allocation28_spill] sm:$0xff]  ;;  %v9168_v20 = vrot.slane %v3480_v37, %v8131_v26 }
 0x359   :  { %v9150_v3 = vsel %vm4422_vm6, %v4597_v5, %v4593_v55  ;;  %v4275_v9 = vmax.f32 %v3899_v16, %v3911_v47  ;;  %v3923_v42 = vpop.xlane.xlu1 %3922  ;;  %v2696_v55 = vcombine.high %v10180_v48, %v10179_v63  ;;  %v3879_v5 = vcombine.low %v3823_v46, %v3855_v0 }
 0x35a   :  { %v2680_v47 = vcombine.high %v10182_v1, %v10181_v56  ;;  %v3591_v37 = vcombine.low %v9154_v36, %v9147_v57  ;;  %v3745_v48 = vcombine.low %v3694_v13, %v3726_v45 }
 0x35b   :  { %v4435_v16 = vrot.slane %v4275_v9, %v9135_v30  ;;  %4060 = vmax.xlane.f32.xlu0 %v4059_v11  ;;  %v2664_v9 = vcombine.high %v10184_v53, %v10183_v39  ;;  %v9184_v38 = vrot.slane %v2696_v55, %v8131_v26  ;;  %v4185_v1 = vsel %vm3887_vm5, %v3879_v5, -inf }
 0x35c   :  { %4069 = vmax.xlane.f32.xlu1 %v4068_v4  ;;  %v3935_v29 = vpop.xlane.xlu0 %3934  ;;  %v9181_v4 = vrot.slane %v2712_v41, %v8131_v26  ;;  %v9192_v41 = vrot.slane %v2680_v47, %v8131_v26  ;;  %v3746_v39 = vcombine.high %v3694_v13, %v3726_v45 }
 0x35d   :  { %v4437_v11 = vsel %vm4436_vm8, %v4435_v16, %v8991_v27  ;;  %v4279_v31 = vmax.f32 %v3923_v42, %v3935_v29  ;;  %v3944_v63 = vpop.xlane.xlu1 %3943  ;;  %v3559_v27 = vcombine.low %v9168_v20, %v9165_v44  ;;  %v3431_v16 = vrot.slane %v3423_v59, %v8161_v35 }
 0x35e   :  { %v9195_v0 = vrot.slane %v2664_v9, %v8131_v26  ;;  %v4197_v29 = vsel %vm3887_vm5, %v3880_v43, -inf  ;;  %v3599_v59 = vrot.slane %v3591_v37, %v8161_v35  ;;  %v2775_v47 = vcombine.low %v9184_v38, %v9181_v4 }
 0x35f   :  { %v4455_v56 = vrot.slane %v4279_v31, %v9135_v30  ;;  %4072 = vmax.xlane.f32.xlu0 %v4071_v34  ;;  %v4206_v9 = vsel %vm3887_vm5, %v3745_v48, -inf  ;;  %v2640_v37 = vcombine.high %v9020_v60, %v9012_v40  ;;  %v4218_v43 = vsel %vm3887_vm5, %v3746_v39, -inf  ;;  %v10189_v60 = vld [vmem:[#allocation33_spill] sm:$0xff] }
 0x360   :  { %4186 = vmax.xlane.f32.xlu1 %v4185_v1  ;;  %v3956_v42 = vpop.xlane.xlu0 %3955  ;;  %v10185_v1 = vld [vmem:[#allocation50_spill] sm:$0xff]  ;;  %v2608_v40 = vcombine.high %v9029_v52, %v9026_v54 }
 0x361   :  { %v4456_v46 = vsel %vm4436_vm8, %v4455_v56, %v9015_v12  ;;  %v4282_v55 = vmax.f32 %v3944_v63, %v3956_v42  ;;  %v9199_v34 = vpop.xlane.xlu1 %3961  ;;  %v3475_v12 = vcombine.low %v3431_v16, %v3463_v58  ;;  %v2743_v63 = vcombine.low %v9195_v0, %v9192_v41  ;;  %v10186_v42 = vld [vmem:[#allocation52_spill] sm:$0xff] }
 0x362   :  { %v9202_v5 = vsel %vm4723_vm9, %v4456_v46, %v4437_v11  ;;  %v3567_v11 = vrot.slane %v3559_v27, %v8161_v35  ;;  %v3476_v56 = vcombine.high %v3431_v16, %v3463_v58  ;;  %v3664_v46 = vcombine.high %v10186_v42, %v10185_v1  ;;  %v10187_v27 = vld [vmem:[#allocation41_spill] sm:$0xff]  ;;  %v10190_v16 = vld [vmem:[#allocation31_spill] sm:$0xff] }
 0x363   :  { %v4469_v53 = vrot.slane %v4282_v55, %v8972_v17  ;;  %4198 = vmax.xlane.f32.xlu0 %v4197_v29  ;;  %v10188_v55 = vld [vmem:[#allocation19_spill] sm:$0xff]  ;;  %v3632_v58 = vcombine.high %v10189_v60, %v10146_v19  ;;  %v3616_v39 = vcombine.high %v10190_v16, %v10148_v15  ;;  %v3848_v19 = vcombine.high %v9082_v6, %v9079_v51 }
 0x364   :  { %4207 = vmax.xlane.f32.xlu1 %v4206_v9  ;;  %v9210_v31 = vpop.xlane.xlu0 %3964  ;;  %v3611_v48 = vcombine.low %v3567_v11, %v3599_v59  ;;  %v3648_v29 = vcombine.high %v10188_v55, %v10187_v27  ;;  %v4224_v9 = vsel %vm3887_vm5, %v3475_v12, -inf  ;;  %v3612_v42 = vcombine.high %v3567_v11, %v3599_v59 }
 0x365   :  { %v9217_v45 = vsel %vm4429_vm7, %v4469_v53, %v9055_v7  ;;  %v9219_v13 = vpop.xlane.xlu1 %3973  ;;  %v2783_v7 = vrot.slane %v2775_v47, %v8161_v35  ;;  %v4236_v47 = vsel %vm3887_vm5, %v3476_v56, -inf  ;;  %v2654_v27 = vrot.slane %v2640_v37, %v8161_v35 }
 0x366   :  { %v4227_v12 = vsel %vm3887_vm5, %v3611_v48, -inf  ;;  %v9245_v55 = vrot.slane %v3664_v46, %v8131_v26  ;;  %v9248_v54 = vrot.slane %v3648_v29, %v8131_v26  ;;  %v9258_v59 = vrot.slane %v3616_v39, %v8131_v26 }
 0x367   :  { %4219 = vmax.xlane.f32.xlu0 %v4218_v43  ;;  %v2751_v43 = vrot.slane %v2743_v63, %v8161_v35  ;;  %v9255_v63 = vrot.slane %v3632_v58, %v8131_v26  ;;  %v3816_v11 = vcombine.high %v9096_v14, %v9093_v62  ;;  %v2622_v48 = vrot.slane %v2608_v40, %v8161_v35 }
 0x368   :  { %4225 = vmax.xlane.f32.xlu1 %v4224_v9  ;;  %v9230_v53 = vpop.xlane.xlu0 %3976  ;;  %v4239_v51 = vsel %vm3887_vm5, %v3612_v42, -inf  ;;  %v3727_v56 = vcombine.low %v9248_v54, %v9245_v55  ;;  %v3862_v9 = vrot.slane %v3848_v19, %v8161_v35 }
 0x369   :  { %v9238_v1 = vpop.xlane.xlu1 %4087  ;;  %v2795_v15 = vcombine.low %v2751_v43, %v2783_v7  ;;  %v2796_v6 = vcombine.high %v2751_v43, %v2783_v7  ;;  %v2661_v29 = vcombine.low %v2622_v48, %v2654_v27  ;;  %v3695_v62 = vcombine.low %v9258_v59, %v9255_v63 }
 0x36a   :  { %v3830_v40 = vrot.slane %v3816_v11, %v8161_v35  ;;  %v3456_v7 = vcombine.high %v9113_v33, %v9110_v18  ;;  %v2662_v16 = vcombine.high %v2622_v48, %v2654_v27  ;;  %v3592_v18 = vcombine.high %v9154_v36, %v9147_v57 }
 0x36b   :  { %4228 = vmax.xlane.f32.xlu0 %v4227_v12  ;;  %v4041_v46 = vsel %vm3887_vm5, %v2795_v15, -inf  ;;  %v4053_v58 = vsel %vm3887_vm5, %v2796_v6, -inf  ;;  %v4062_v39 = vsel %vm3887_vm5, %v2661_v29, -inf  ;;  %v3735_v12 = vrot.slane %v3727_v56, %v8161_v35 }
 0x36c   :  { %4237 = vmax.xlane.f32.xlu1 %v4236_v47  ;;  %v9252_v52 = vpop.xlane.xlu0 %4099  ;;  %v3881_v43 = vcombine.low %v3830_v40, %v3862_v9  ;;  %v3424_v47 = vcombine.high %v9125_v32, %v9118_v2  ;;  %v3703_v15 = vrot.slane %v3695_v62, %v8161_v35  ;;  %v4074_v33 = vsel %vm3887_vm5, %v2662_v16, -inf }
 0x36d   :  { %v9262_v37 = vpop.xlane.xlu1 %4111  ;;  %v3882_v27 = vcombine.high %v3830_v40, %v3862_v9  ;;  %v3470_v11 = vrot.slane %v3456_v7, %v8161_v35  ;;  %v3800_v48 = vcombine.high %v10154_v50, %v10153_v61  ;;  %v3784_v2 = vcombine.high %v10156_v21, %v10155_v24 }
 0x36e   :  { %v4209_v32 = vsel %vm3887_vm5, %v3881_v43, -inf  ;;  %v3560_v6 = vcombine.high %v9168_v20, %v9165_v44  ;;  %v3438_v36 = vrot.slane %v3424_v47, %v8161_v35  ;;  %v3768_v56 = vcombine.high %v10158_v10, %v10157_v49 }
 0x36f   :  { %4240 = vmax.xlane.f32.xlu0 %v4239_v51  ;;  %v3747_v51 = vcombine.low %v3703_v15, %v3735_v12  ;;  %v3752_v61 = vcombine.high %v10160_v28, %v10159_v22  ;;  %v4221_v24 = vsel %vm3887_vm5, %v3882_v27, -inf  ;;  %v3748_v21 = vcombine.high %v3703_v15, %v3735_v12 }
 0x370   :  { %4042 = vmax.xlane.f32.xlu1 %v4041_v46  ;;  %v9270_v60 = vpop.xlane.xlu0 %4123  ;;  %v3477_v46 = vcombine.low %v3438_v36, %v3470_v11  ;;  %v3606_v29 = vrot.slane %v3592_v18, %v8161_v35  ;;  %v2776_v44 = vcombine.high %v9184_v38, %v9181_v4  ;;  %v3814_v20 = vrot.slane %v3800_v48, %v8131_v26 }
 0x371   :  { %v9274_v14 = vpop.xlane.xlu1 %4129  ;;  %v3798_v9 = vrot.slane %v3784_v2, %v8131_v26  ;;  %v4230_v49 = vsel %vm3887_vm5, %v3747_v51, -inf  ;;  %v3574_v22 = vrot.slane %v3560_v6, %v8161_v35  ;;  %v2744_v28 = vcombine.high %v9195_v0, %v9192_v41 }
 0x372   :  { %v3782_v62 = vrot.slane %v3768_v56, %v8131_v26  ;;  %v3766_v40 = vrot.slane %v3752_v61, %v8131_v26  ;;  %v4242_v38 = vsel %vm3887_vm5, %v3748_v21, -inf  ;;  %v2790_v41 = vrot.slane %v2776_v44, %v8161_v35 }
 0x373   :  { %4054 = vmax.xlane.f32.xlu0 %v4053_v58  ;;  %v4248_v58 = vsel %vm3887_vm5, %v3477_v46, -inf  ;;  %v3613_v16 = vcombine.low %v3574_v22, %v3606_v29  ;;  %v3863_v43 = vcombine.low %v3798_v9, %v3814_v20  ;;  %v2758_v18 = vrot.slane %v2744_v28, %v8161_v35 }
 0x374   :  { %4063 = vmax.xlane.f32.xlu1 %v4062_v39  ;;  %v9284_v42 = vpop.xlane.xlu0 %4132  ;;  %v3478_v39 = vcombine.high %v3438_v36, %v3470_v11  ;;  %v3831_v26 = vcombine.low %v3766_v40, %v3782_v62  ;;  %v3614_v11 = vcombine.high %v3574_v22, %v3606_v29  ;;  %v3728_v48 = vcombine.high %v9248_v54, %v9245_v55 }
 0x375   :  { %v9286_v19 = vpop.xlane.xlu1 %4141  ;;  %v4251_v27 = vsel %vm3887_vm5, %v3613_v16, -inf  ;;  %v3696_v6 = vcombine.high %v9258_v59, %v9255_v63  ;;  %v2798_v61 = vcombine.high %v2758_v18, %v2790_v41  ;;  %v3864_v55 = vcombine.high %v3798_v9, %v3814_v20 }
 0x376   :  { %v4260_v2 = vsel %vm3887_vm5, %v3478_v39, -inf  ;;  %v3839_v36 = vrot.slane %v3831_v26, %v8161_v35  ;;  %v4263_v56 = vsel %vm3887_vm5, %v3614_v11, -inf  ;;  %v3832_v46 = vcombine.high %v3766_v40, %v3782_v62 }
 0x377   :  { %4075 = vmax.xlane.f32.xlu0 %v4074_v33  ;;  %v3710_v63 = vrot.slane %v3696_v6, %v8161_v35  ;;  %v4077_v59 = vsel %vm3887_vm5, %v2798_v61, -inf  ;;  %v3878_v9 = vrot.slane %v3864_v55, %v8161_v35  ;;  %v4310_v22 = vmax.f32 %v9262_v37, %v9270_v60 }
 0x378   :  { %4210 = vmax.xlane.f32.xlu1 %v4209_v32  ;;  %v9300_v57 = vpop.xlane.xlu0 %4144  ;;  %v2797_v32 = vcombine.low %v2758_v18, %v2790_v41 }
 0x379   :  { %v3947_v50 = vpop.xlane.xlu1 %3946 }
 0x37a   :  { %v4065_v54 = vsel %vm3887_vm5, %v2797_v32, -inf }
 0x37b   :  { %4222 = vmax.xlane.f32.xlu0 %v4221_v24  ;;  %v3742_v24 = vrot.slane %v3728_v48, %v8161_v35 }
 0x37c   :  { %4231 = vmax.xlane.f32.xlu1 %v4230_v49  ;;  %v3959_v10 = vpop.xlane.xlu0 %3958 }
 0x37d   :  { %v4283_v7 = vmax.f32 %v3947_v50, %v3959_v10  ;;  %v9319_v4 = vpop.xlane.xlu1 %3967  ;;  %v3749_v20 = vcombine.low %v3710_v63, %v3742_v24  ;;  %v4306_v10 = vmax.f32 %v9238_v1, %v9252_v52  ;;  %v4602_v1 = vrot.slane %v4310_v22, %v8972_v17  ;;  %v4862_v22 = vld [vmem:[%s9695_s4] sm:$0xff] }
 0x37f   :  { %v4474_v12 = vrot.slane %v4283_v7, %v9135_v30  ;;  %4243 = vmax.xlane.f32.xlu0 %v4242_v38  ;;  %v3846_v7 = vrot.slane %v3832_v46, %v8161_v35  ;;  %v4254_v16 = vsel %vm3887_vm5, %v3749_v20, -inf  ;;  %v4337_v46 = vld [vmem:[%s9694_s3 + $0x8] sm:$0xff] }
 0x380   :  { %4249 = vmax.xlane.f32.xlu1 %v4248_v58  ;;  %v9325_v0 = vpop.xlane.xlu0 %3979  ;;  %v3750_v58 = vcombine.high %v3710_v63, %v3742_v24  ;;  %v4336_v24 = vld [vmem:[%s9694_s3] sm:$0xff]  ;;  %v4338_v63 = vld [vmem:[%s9694_s3 + $0x10] sm:$0xff] }
 0x381   :  { %v4475_v47 = vsel %vm4436_vm8, %v4474_v12, %v9217_v45  ;;  %v9329_v15 = vpop.xlane.xlu1 %3985  ;;  %v3871_v45 = vrot.slane %v3863_v43, %v8161_v35  ;;  %v3885_v39 = vcombine.low %v3846_v7, %v3878_v9  ;;  %v4583_v43 = vrot.slane %v4306_v10, %v8972_v17 }
 0x382   :  { %v9334_v33 = vsel %vm4725_vm10, %v4475_v47, %v9202_v5  ;;  %v4266_v41 = vsel %vm3887_vm5, %v3750_v58, -inf  ;;  %v3886_v35 = vcombine.high %v3846_v7, %v3878_v9  ;;  %v4313_v9 = vmax.f32 %v9284_v42, %v9300_v57 }
 0x383   :  { %4252 = vmax.xlane.f32.xlu0 %v4251_v27  ;;  %v3883_v50 = vcombine.low %v3839_v36, %v3871_v45  ;;  %v3884_v44 = vcombine.high %v3839_v36, %v3871_v45  ;;  %v4257_v47 = vsel %vm3887_vm5, %v3885_v39, -inf  ;;  %v4584_v18 = vsel %vm4429_vm7, %v4583_v43, %v9099_v23 }
 0x384   :  { %4261 = vmax.xlane.f32.xlu1 %v4260_v2  ;;  %v9341_v51 = vpop.xlane.xlu0 %3988  ;;  %v4603_v27 = vsel %vm4429_vm7, %v4602_v1, %v9150_v3  ;;  %v4269_v6 = vsel %vm3887_vm5, %v3886_v35, -inf  ;;  %v6386_v7 = vmov 0.0|0.0   ;;  %v6388_v58 = vmov 0.0  }
 0x385   :  { %v9345_v5 = vpop.xlane.xlu1 %3997  ;;  %v4233_v49 = vsel %vm3887_vm5, %v3883_v50, -inf  ;;  %v4245_v38 = vsel %vm3887_vm5, %v3884_v44, -inf  ;;  %6145 = vmatprep.subr.bf16.mxu1 %v6386_v7  ;;  %6062 = vmatprep.mubr.msk.f32.mxu1 %vm6387_vm11, %v6388_v58  ;;  %v4312_v42 = vmax.f32 %v9274_v14, %v9286_v19  ;;  %v4616_v39 = vrot.slane %v4313_v9, %v8915_v25 }
 0x387   :  { %4264 = vmax.xlane.f32.xlu0 %v4263_v56  ;;  %v4612_v14 = vrot.slane %v4312_v42, %v8911_v8 }
 0x388   :  { %4066 = vmax.xlane.f32.xlu1 %v4065_v54  ;;  %v9351_v21 = vpop.xlane.xlu0 %4000 }
 0x389   :  { %v4091_v29 = vpop.xlane.xlu1 %4090 }
 0x38b   :  { %4078 = vmax.xlane.f32.xlu0 %v4077_v59  ;;  %v4339_v59 = vld [vmem:[%s9694_s3 + $0x18] sm:$0xff] }
 0x38c   :  { %4234 = vmax.xlane.f32.xlu1 %v4233_v49  ;;  %v4103_v28 = vpop.xlane.xlu0 %4102  ;;  %v6141_v49 = vpack.c.bf16 %v4339_v59, %v4338_v63  ;;  %v4289_v59 = vmax.f32 %v9341_v51, %v9351_v21 }
 0x38d   :  { %v4307_v62 = vmax.f32 %v4091_v29, %v4103_v28  ;;  %v4115_v40 = vpop.xlane.xlu1 %4114  ;;  %v6137_v29 = vpack.c.bf16 %v4337_v46, %v4336_v24  ;;  %v4863_v28 = vld [vmem:[%s9695_s4 + $0x8] sm:$0xff]  ;;  %v4284_v46 = vmax.f32 %v9199_v34, %v9219_v13 }
 0x38f   :  { %4246 = vmax.xlane.f32.xlu0 %v4245_v38  ;;  %v4588_v37 = vrot.slane %v4307_v62, %v9135_v30  ;;  %6138 = vmatprep.subr.bf16.mxu0 %v6137_v29  ;;  %v9415_v38 = vpack.c.bf16 %v4863_v28, %v4862_v22  ;;  %v4479_v13 = vrot.slane %v4284_v46, %v8911_v8 }
 0x390   :  { %4255 = vmax.xlane.f32.xlu1 %v4254_v16  ;;  %v4127_v52 = vpop.xlane.xlu0 %4126  ;;  %6140 = vmatpush3.bf16.msra.mxu0 %v6137_v29 }
 0x391   :  { %v4311_v60 = vmax.f32 %v4115_v40, %v4127_v52  ;;  %v4136_v12 = vpop.xlane.xlu1 %4135  ;;  %v4589_v48 = vsel %vm4436_vm8, %v4588_v37, %v4584_v18  ;;  %6142 = vmatprep.subr.bf16.mxu0 %v6141_v49  ;;  %6147 = vmatpush3.bf16.msra.mxu1 %v9415_v38 }
 0x392   :  { %6148 = vmatprep.subr.bf16.mxu1 %v6386_v7 }
 0x393   :  { %v4607_v26 = vrot.slane %v4311_v60, %v9135_v30  ;;  %4267 = vmax.xlane.f32.xlu0 %v4266_v41  ;;  %v4617_v41 = vsel %vm4422_vm6, %v4616_v39, %v4612_v14 }
 0x394   :  { %4258 = vmax.xlane.f32.xlu1 %v4257_v47  ;;  %v4148_v11 = vpop.xlane.xlu0 %4147  ;;  %6144 = vmatpush3.bf16.msra.mxu0 %v6141_v49 }
 0x395   :  { %v4608_v2 = vsel %vm4436_vm8, %v4607_v26, %v4603_v27  ;;  %v9376_v32 = vpop.xlane.xlu1 %4153  ;;  %v4314_v62 = vmax.f32 %v4136_v12, %v4148_v11  ;;  %6151 = vmatprep.subr.bf16.mxu0 %v6386_v7  ;;  %6063 = vmatmul.mubr.f32.vlgmr.msra.gmra.mrb[0].mxu1 %v6388_v58 }
 0x396   :  { %v4737_v45 = vsel %vm4723_vm9, %v4608_v2, %v4589_v48  ;;  %6150 = vmatpush3.bf16.msra.mxu1 %v9415_v38  ;;  %6069 = vmatprep.mubr.msk.f32.mxu1 %vm6387_vm11, %v6388_v58  ;;  %v4285_v2 = vmax.f32 %v9210_v31, %v9230_v53 }
 0x397   :  { %4270 = vmax.xlane.f32.xlu0 %v4269_v6  ;;  %v4621_v52 = vrot.slane %v4314_v62, %v8972_v17  ;;  %6154 = vmatprep.subr.bf16.mxu1 %v6386_v7 }
 0x398   :  { %v9380_v36 = vpop.xlane.xlu0 %4156 }
 0x399   :  { %v9382_v56 = vpop.xlane.xlu1 %4165  ;;  %v4622_v26 = vsel %vm4429_vm7, %v4621_v52, %v4617_v41 }
 0x39c   :  { %v9384_v23 = vpop.xlane.xlu0 %4168 }
 0x39d   :  { %v9386_v3 = vpop.xlane.xlu1 %3970  ;;  %v4317_v41 = vmax.f32 %v9380_v36, %v9384_v23 }
 0x3a0   :  { %v9388_v61 = vpop.xlane.xlu0 %3982 }
 0x3a1   :  { %v9390_v55 = vpop.xlane.xlu1 %3991  ;;  %v4287_v29 = vmax.f32 %v9386_v3, %v9388_v61  ;;  %v4502_v61 = vrot.slane %v4289_v59, %v8915_v25 }
 0x3a3   :  { %v4493_v3 = vrot.slane %v4287_v29, %v9135_v30 }
 0x3a4   :  { %v9392_v54 = vpop.xlane.xlu0 %4003 }
 0x3a5   :  { %v4010_v50 = vpop.xlane.xlu1 %4009  ;;  %v4290_v31 = vmax.f32 %v9390_v55, %v9392_v54 }
 0x3a7   :  { %v4507_v54 = vrot.slane %v4290_v31, %v8972_v17 }
 0x3a8   :  { %v4013_v44 = vpop.xlane.xlu0 %4012 }
 0x3a9   :  { %v4022_v20 = vpop.xlane.xlu1 %4021 }
 0x3aa   :  { %v4292_v10 = vmax.f32 %v4010_v50, %v4022_v20  ;;  %v4286_v50 = vmax.f32 %v9319_v4, %v9325_v0  ;;  %v4288_v4 = vmax.f32 %v9329_v15, %v9345_v5 }
 0x3ac   :  { %v4025_v40 = vpop.xlane.xlu0 %4024  ;;  %v4517_v43 = vrot.slane %v4292_v10, %v8911_v8  ;;  %v4498_v15 = vrot.slane %v4288_v4, %v8911_v8 }
 0x3ad   :  { %v4293_v57 = vmax.f32 %v4013_v44, %v4025_v40  ;;  %v4139_v16 = vpop.xlane.xlu1 %4138  ;;  %v4488_v44 = vrot.slane %v4286_v50, %v8972_v17 }
 0x3ae   :  { %v4503_v28 = vsel %vm4422_vm6, %v4502_v61, %v4498_v15 }
 0x3af   :  { %v4521_v1 = vrot.slane %v4293_v57, %v8915_v25  ;;  %v4508_v40 = vsel %vm4429_vm7, %v4507_v54, %v4503_v28 }
 0x3b0   :  { %v4151_v37 = vpop.xlane.xlu0 %4150 }
 0x3b1   :  { %v4522_v19 = vsel %vm4422_vm6, %v4521_v1, %v4517_v43  ;;  %v4315_v60 = vmax.f32 %v4139_v16, %v4151_v37  ;;  %v9430_v12 = vpop.xlane.xlu1 %4159 }
 0x3b3   :  { %v4626_v35 = vrot.slane %v4315_v60, %v9135_v30 }
 0x3b4   :  { %v4172_v47 = vpop.xlane.xlu0 %4171 }
 0x3b5   :  { %v4627_v18 = vsel %vm4436_vm8, %v4626_v35, %v4622_v26  ;;  %v4318_v27 = vmax.f32 %v9430_v12, %v4172_v47  ;;  %v4178_v11 = vpop.xlane.xlu1 %4177  ;;  %v4316_v26 = vmax.f32 %v9376_v32, %v9382_v56 }
 0x3b6   :  { %v9443_v48 = vsel %vm4725_vm10, %v4627_v18, %v4737_v45  ;;  %v4483_v45 = vrot.slane %v4285_v2, %v8915_v25 }
 0x3b7   :  { %v4631_v50 = vrot.slane %v4316_v26, %v8911_v8 }
 0x3b8   :  { %v4181_v6 = vpop.xlane.xlu0 %4180  ;;  %v4484_v55 = vsel %vm4422_vm6, %v4483_v45, %v4479_v13 }
 0x3b9   :  { %v4190_v24 = vpop.xlane.xlu1 %4189  ;;  %v4489_v20 = vsel %vm4429_vm7, %v4488_v44, %v4484_v55 }
 0x3ba   :  { %v4320_v63 = vmax.f32 %v4178_v11, %v4190_v24  ;;  %v4494_v22 = vsel %vm4436_vm8, %v4493_v3, %v4489_v20 }
 0x3bb   :  { %v4728_v43 = vsel %vm4727_vm12, %v4494_v22, %v9334_v33  ;;  %v4635_v33 = vrot.slane %v4317_v41, %v8915_v25 }
 0x3bc   :  { %v4193_v53 = vpop.xlane.xlu0 %4192  ;;  %v4650_v51 = vrot.slane %v4320_v63, %v8911_v8 }
 0x3bd   :  { %v4321_v0 = vmax.f32 %v4181_v6, %v4193_v53  ;;  %v3995_v34 = vpop.xlane.xlu1 %3994  ;;  %v4640_v6 = vrot.slane %v4318_v27, %v8972_v17  ;;  %v4636_v46 = vsel %vm4422_vm6, %v4635_v33, %v4631_v50 }
 0x3bf   :  { %v4654_v21 = vrot.slane %v4321_v0, %v8915_v25  ;;  %v4641_v56 = vsel %vm4429_vm7, %v4640_v6, %v4636_v46 }
 0x3c0   :  { %v4007_v49 = vpop.xlane.xlu0 %4006 }
 0x3c1   :  { %v4655_v5 = vsel %vm4422_vm6, %v4654_v21, %v4650_v51  ;;  %v4291_v9 = vmax.f32 %v3995_v34, %v4007_v49  ;;  %v4016_v10 = vpop.xlane.xlu1 %4015 }
 0x3c3   :  { %v4512_v62 = vrot.slane %v4291_v9, %v9135_v30 }
 0x3c4   :  { %v4028_v42 = vpop.xlane.xlu0 %4027 }
 0x3c5   :  { %v4513_v57 = vsel %vm4436_vm8, %v4512_v62, %v4508_v40  ;;  %v4294_v16 = vmax.f32 %v4016_v10, %v4028_v42  ;;  %v4034_v39 = vpop.xlane.xlu1 %4033 }
 0x3c6   :  { %v4730_v1 = vsel %vm4729_vm13, %v4513_v57, %v4728_v43 }
 0x3c7   :  { %v4526_v52 = vrot.slane %v4294_v16, %v8972_v17 }
 0x3c8   :  { %v4037_v37 = vpop.xlane.xlu0 %4036 }
 0x3c9   :  { %v4527_v14 = vsel %vm4429_vm7, %v4526_v52, %v4522_v19  ;;  %v4046_v60 = vpop.xlane.xlu1 %4045 }
 0x3ca   :  { %v4296_v12 = vmax.f32 %v4034_v39, %v4046_v60 }
 0x3cc   :  { %v4049_v35 = vpop.xlane.xlu0 %4048  ;;  %v4536_v11 = vrot.slane %v4296_v12, %v8911_v8 }
 0x3cd   :  { %v4297_v47 = vmax.f32 %v4037_v37, %v4049_v35  ;;  %v4163_v18 = vpop.xlane.xlu1 %4162 }
 0x3cf   :  { %v4540_v2 = vrot.slane %v4297_v47, %v8915_v25 }
 0x3d0   :  { %v4175_v19 = vpop.xlane.xlu0 %4174 }
 0x3d1   :  { %v4541_v24 = vsel %vm4422_vm6, %v4540_v2, %v4536_v11  ;;  %v4319_v36 = vmax.f32 %v4163_v18, %v4175_v19  ;;  %v4184_v23 = vpop.xlane.xlu1 %4183 }
 0x3d3   :  { %v4645_v32 = vrot.slane %v4319_v36, %v9135_v30 }
 0x3d4   :  { %v4196_v29 = vpop.xlane.xlu0 %4195 }
 0x3d5   :  { %v4646_v63 = vsel %vm4436_vm8, %v4645_v32, %v4641_v56  ;;  %v4322_v59 = vmax.f32 %v4184_v23, %v4196_v29  ;;  %v4202_v45 = vpop.xlane.xlu1 %4201 }
 0x3d6   :  { %v4739_v27 = vsel %vm4727_vm12, %v4646_v63, %v9443_v48 }
 0x3d7   :  { %v4659_v31 = vrot.slane %v4322_v59, %v8972_v17 }
 0x3d8   :  { %v4205_v53 = vpop.xlane.xlu0 %4204 }
 0x3d9   :  { %v4660_v44 = vsel %vm4429_vm7, %v4659_v31, %v4655_v5  ;;  %v4214_v4 = vpop.xlane.xlu1 %4213 }
 0x3da   :  { %v4324_v0 = vmax.f32 %v4202_v45, %v4214_v4 }
 0x3dc   :  { %v4217_v34 = vpop.xlane.xlu0 %4216  ;;  %v4669_v61 = vrot.slane %v4324_v0, %v8911_v8 }
 0x3dd   :  { %v4325_v13 = vmax.f32 %v4205_v53, %v4217_v34  ;;  %v4019_v3 = vpop.xlane.xlu1 %4018 }
 0x3df   :  { %v4673_v51 = vrot.slane %v4325_v13, %v8915_v25 }
 0x3e0   :  { %v4031_v21 = vpop.xlane.xlu0 %4030 }
 0x3e1   :  { %v4674_v55 = vsel %vm4422_vm6, %v4673_v51, %v4669_v61  ;;  %v4295_v54 = vmax.f32 %v4019_v3, %v4031_v21  ;;  %v4040_v49 = vpop.xlane.xlu1 %4039 }
 0x3e3   :  { %v4531_v48 = vrot.slane %v4295_v54, %v9135_v30 }
 0x3e4   :  { %v4052_v20 = vpop.xlane.xlu0 %4051 }
 0x3e5   :  { %v4532_v15 = vsel %vm4436_vm8, %v4531_v48, %v4527_v14  ;;  %v4058_v5 = vpop.xlane.xlu1 %4057  ;;  %v4298_v12 = vmax.f32 %v4040_v49, %v4052_v20 }
 0x3e6   :  { %v4732_v9 = vsel %vm4731_vm14, %v4532_v15, %v4730_v1 }
 0x3e7   :  { %v4545_v35 = vrot.slane %v4298_v12, %v8972_v17 }
 0x3e8   :  { %v4061_v10 = vpop.xlane.xlu0 %4060 }
 0x3e9   :  { %v4070_v22 = vpop.xlane.xlu1 %4069  ;;  %v4546_v11 = vsel %vm4429_vm7, %v4545_v35, %v4541_v24 }
 0x3ea   :  { %v4300_v34 = vmax.f32 %v4058_v5, %v4070_v22 }
 0x3ec   :  { %v4073_v28 = vpop.xlane.xlu0 %4072  ;;  %v4555_v21 = vrot.slane %v4300_v34, %v8911_v8 }
 0x3ed   :  { %v4187_v62 = vpop.xlane.xlu1 %4186 }
 0x3f0   :  { %v4199_v40 = vpop.xlane.xlu0 %4198 }
 0x3f1   :  { %v4323_v42 = vmax.f32 %v4187_v62, %v4199_v40  ;;  %v4208_v57 = vpop.xlane.xlu1 %4207 }
 0x3f3   :  { %v4664_v16 = vrot.slane %v4323_v42, %v9135_v30 }
 0x3f4   :  { %v4220_v39 = vpop.xlane.xlu0 %4219 }
 0x3f5   :  { %v4665_v43 = vsel %vm4436_vm8, %v4664_v16, %v4660_v44  ;;  %v4226_v52 = vpop.xlane.xlu1 %4225  ;;  %v4326_v2 = vmax.f32 %v4208_v57, %v4220_v39  ;;  %v4301_v44 = vmax.f32 %v4061_v10, %v4073_v28 }
 0x3f6   :  { %v4740_v37 = vsel %vm4729_vm13, %v4665_v43, %v4739_v27 }
 0x3f7   :  { %v4678_v23 = vrot.slane %v4326_v2, %v8972_v17  ;;  %v4559_v3 = vrot.slane %v4301_v44, %v8915_v25 }
 0x3f8   :  { %v4229_v60 = vpop.xlane.xlu0 %4228 }
 0x3f9   :  { %v4238_v14 = vpop.xlane.xlu1 %4237  ;;  %v4679_v63 = vsel %vm4429_vm7, %v4678_v23, %v4674_v55  ;;  %v4560_v49 = vsel %vm4422_vm6, %v4559_v3, %v4555_v21 }
 0x3fa   :  { %v4328_v22 = vmax.f32 %v4226_v52, %v4238_v14 }
 0x3fc   :  { %v4241_v41 = vpop.xlane.xlu0 %4240 }
 0x3fd   :  { %v4043_v1 = vpop.xlane.xlu1 %4042  ;;  %v4329_v20 = vmax.f32 %v4229_v60, %v4241_v41  ;;  %v4688_v60 = vrot.slane %v4328_v22, %v8911_v8 }
 0x3ff   :  { %v4692_v57 = vrot.slane %v4329_v20, %v8915_v25 }
 0x400   :  { %v4055_v26 = vpop.xlane.xlu0 %4054 }
 0x401   :  { %v4299_v47 = vmax.f32 %v4043_v1, %v4055_v26  ;;  %v4064_v18 = vpop.xlane.xlu1 %4063  ;;  %v4693_v14 = vsel %vm4422_vm6, %v4692_v57, %v4688_v60 }
 0x403   :  { %v4550_v33 = vrot.slane %v4299_v47, %v9135_v30 }
 0x404   :  { %v4076_v6 = vpop.xlane.xlu0 %4075 }
 0x405   :  { %v4211_v19 = vpop.xlane.xlu1 %4210  ;;  %v4551_v50 = vsel %vm4436_vm8, %v4550_v33, %v4546_v11  ;;  %v4302_v4 = vmax.f32 %v4064_v18, %v4076_v6 }
 0x406   :  { %v4734_v36 = vsel %vm4733_vm15, %v4551_v50, %v4732_v9 }
 0x407   :  { %v4564_v61 = vrot.slane %v4302_v4, %v8972_v17 }
 0x408   :  { %v4223_v46 = vpop.xlane.xlu0 %4222 }
 0x409   :  { %v4327_v32 = vmax.f32 %v4211_v19, %v4223_v46  ;;  %v4232_v56 = vpop.xlane.xlu1 %4231  ;;  %v4565_v9 = vsel %vm4429_vm7, %v4564_v61, %v4560_v49 }
 0x40b   :  { %v4683_v29 = vrot.slane %v4327_v32, %v9135_v30 }
 0x40c   :  { %v4244_v59 = vpop.xlane.xlu0 %4243 }
 0x40d   :  { %v4684_v45 = vsel %vm4436_vm8, %v4683_v29, %v4679_v63  ;;  %v4250_v24 = vpop.xlane.xlu1 %4249  ;;  %v4330_v5 = vmax.f32 %v4232_v56, %v4244_v59 }
 0x40e   :  { %v4741_v27 = vsel %vm4731_vm14, %v4684_v45, %v4740_v37 }
 0x40f   :  { %v4697_v39 = vrot.slane %v4330_v5, %v8972_v17 }
 0x410   :  { %v4253_v31 = vpop.xlane.xlu0 %4252 }
 0x411   :  { %v4262_v53 = vpop.xlane.xlu1 %4261  ;;  %v4698_v26 = vsel %vm4429_vm7, %v4697_v39, %v4693_v14 }
 0x412   :  { %v4332_v43 = vmax.f32 %v4250_v24, %v4262_v53 }
 0x414   :  { %v4265_v0 = vpop.xlane.xlu0 %4264  ;;  %v4707_v47 = vrot.slane %v4332_v43, %v8911_v8 }
 0x415   :  { %v4067_v13 = vpop.xlane.xlu1 %4066  ;;  %v4333_v42 = vmax.f32 %v4253_v31, %v4265_v0 }
 0x417   :  { %v4711_v52 = vrot.slane %v4333_v42, %v8915_v25 }
 0x418   :  { %v4079_v51 = vpop.xlane.xlu0 %4078 }
 0x419   :  { %v4303_v55 = vmax.f32 %v4067_v13, %v4079_v51  ;;  %v4235_v54 = vpop.xlane.xlu1 %4234  ;;  %v4712_v11 = vsel %vm4422_vm6, %v4711_v52, %v4707_v47 }
 0x41b   :  { %v4569_v48 = vrot.slane %v4303_v55, %v9135_v30 }
 0x41c   :  { %v4247_v15 = vpop.xlane.xlu0 %4246 }
 0x41d   :  { %v4570_v10 = vsel %vm4436_vm8, %v4569_v48, %v4565_v9  ;;  %v4331_v28 = vmax.f32 %v4235_v54, %v4247_v15  ;;  %v4256_v62 = vpop.xlane.xlu1 %4255 }
 0x41e   :  { %v4736_v40 = vsel %vm4735_vm0, %v4570_v10, %v4734_v36 }
 0x41f   :  { %6055 = vmatprep.mubr.msk.f32.mxu0 %vm755_vm3, %v4736_v40  ;;  %v4702_v12 = vrot.slane %v4331_v28, %v9135_v30 }
 0x420   :  { %v4268_v16 = vpop.xlane.xlu0 %4267 }
 0x421   :  { %v4334_v37 = vmax.f32 %v4256_v62, %v4268_v16  ;;  %v4259_v1 = vpop.xlane.xlu1 %4258  ;;  %v4703_v33 = vsel %vm4436_vm8, %v4702_v12, %v4698_v26 }
 0x422   :  { %v4742_v19 = vsel %vm4733_vm15, %v4703_v33, %v4741_v27 }
 0x423   :  { %v4716_v41 = vrot.slane %v4334_v37, %v8972_v17 }
 0x424   :  { %v4271_v35 = vpop.xlane.xlu0 %4270 }
 0x425   :  { %v4335_v18 = vmax.f32 %v4259_v1, %v4271_v35  ;;  %v4717_v6 = vsel %vm4429_vm7, %v4716_v41, %v4712_v11 }
 0x427   :  { %v4721_v2 = vrot.slane %v4335_v18, %v9135_v30  ;;  %v5983_v30 = vld [vmem:[%s9696_s5] ss:$0 sm:$0xff]  ;;  %s10191_s5 = smov 16  }
 0x429   :  { %v4722_v25 = vsel %vm4436_vm8, %v4721_v2, %v4717_v6 }
 0x42a   :  { %v4743_v17 = vsel %vm4735_vm0, %v4722_v25, %v4742_v19 }
 0x42b   :  { %6056 = vmatmul.mubr.msk.f32.vlgmr.msra.gmra.mrb[0].mxu0 %vm755_vm3, %v4743_v17 }
 0x42c   :  { %6153 = vmatpush3.bf16.msra.mxu0 %v9415_v38  ;;  %6076 = vmatprep.mubr.msk.f32.mxu0 %vm6387_vm11, %v6388_v58 }
 0x42d   :  { %6157 = vmatprep.subr.bf16.mxu0 %v6386_v7 }
 0x468   :  { %v4933_v8 = vpop.f32.mrb[0].mxu1 }
 0x469   :  { %v6064_v50 = vpop.f32.mrb[1].mxu1 }
 0x4fe   :  { %v6057_v36 = vpop.f32.mrb[0].mxu0 }
 0x4ff   :  { %v4820_v23 = vadd.f32 %v6057_v36, %v5983_v30  ;;  %v4814_v46 = vpop.f32.mrb[1].mxu0 }
 0x500   :  { %v4815_v32 = vadd.f32 %v5983_v30, %v4814_v46 }
 0x501   :  { %v4824_v56 = vrot.slane %v4820_v23, 7  ;;  %v4834_v29 = vrot.slane %v4820_v23, 1  ;;  %v4839_v63 = vrot.slane %v4820_v23, 2  ;;  %v4844_v59 = vrot.slane %v4820_v23, 3 }
 0x502   :  { %v4829_v45 = vrot.slane %v4815_v32, 1  ;;  %v4832_v24 = vrot.slane %v4815_v32, 2  ;;  %v4837_v27 = vrot.slane %v4815_v32, 3  ;;  %v4842_v31 = vrot.slane %v4815_v32, 4 }
 0x503   :  { %v4827_v53 = vsel %vm4826_vm1, %v4815_v32, %v4824_v56  ;;  %v4847_v44 = vrot.slane %v4815_v32, 5  ;;  %v4849_v4 = vrot.slane %v4820_v23, 4  ;;  %v4852_v0 = vrot.slane %v4815_v32, 6 }
 0x504   :  { %v4937_v34 = vadd.f32 %v4933_v8, %v4827_v53  ;;  %v4831_v13 = vsel %vm4826_vm1, %v4829_v45, %v4820_v23  ;;  %v9554_v3 = vsel %vm4826_vm1, %v4832_v24, %v4834_v29  ;;  %v9557_v61 = vsel %vm4826_vm1, %v4837_v27, %v4839_v63 }
 0x505   :  { %v9560_v51 = vsel %vm4826_vm1, %v4842_v31, %v4844_v59  ;;  %v9563_v21 = vsel %vm4826_vm1, %v4847_v44, %v4849_v4  ;;  %v4854_v55 = vrot.slane %v4820_v23, 5  ;;  %v4857_v54 = vrot.slane %v4815_v32, 7 }
 0x506   :  { %6221 = vtanh.f32 %v4937_v34  ;;  %v4859_v49 = vrot.slane %v4820_v23, 6  ;;  %v5986_v9 = vmul.f32 -1.442695, %v4937_v34 }
 0x507   :  { %v9566_v48 = vsel %vm4826_vm1, %v4852_v0, %v4854_v55 }
 0x508   :  { %v9569_v20 = vsel %vm4826_vm1, %v4857_v54, %v4859_v49  ;;  %6223 = vpow2.f32 %v5986_v9 }
 0x510   :  { %v6222_v15 = vpop.eup %6221 }
 0x511   :  { %4947 = vrot.lane.b32.xlu1 %v6222_v15, %s6377_s19 }
 0x512   :  { %v6224_v5 = vpop.eup %6223 }
 0x513   :  { %v4941_v10 = vadd.f32 1.0, %v6224_v5 }
 0x515   :  { %6225 = vrcp.f32 %v4941_v10 }
 0x51f   :  { %v6226_v22 = vpop.eup %6225 }
 0x520   :  { %v4945_v40 = vmul.f32 0.0, %v6226_v22 }
 0x583   :  { %v4948_v28 = vpop.permute.xlu1 %4947 }
 0x584   :  { %v4950_v62 = vmul.f32 %v6226_v22, %v4948_v28 }
 0x586   :  { %4952 = vrot.lane.b32.xlu0 %v4950_v62, %s10191_s5 }
 0x5f8   :  { %v4953_v42 = vpop.permute.xlu0 %4952 }
 0x5f9   :  { %v4955_v57 = vadd.f32 %v4953_v42, %v4945_v40 }
 0x5fb   :  { %6227 = vtanh.f32 %v4955_v57 }
 0x605   :  { %v6228_v16 = vpop.eup %6227 }
 0x606   :  { %4958 = vrot.lane.b32.xlu1 %v6228_v16, %s10191_s5 }
 0x678   :  { %v4959_v39 = vpop.permute.xlu1 %4958 }
 0x679   :  { %v4961_v43 = vmul.f32 %v6226_v22, %v4959_v39 }
 0x67b   :  { %4963 = vrot.lane.b32.xlu1 %v4961_v43, %s9971_s24 }
 0x6ed   :  { %v4964_v37 = vpop.permute.xlu1 %4963 }
 0x6ee   :  { %6070 = vmatmul.mubr.msk.f32.vlgmr.msra.gmra.mrb[2].mxu1 %vm752_vm2, %v4964_v37 }
 0x6ef   :  { %6156 = vmatpush3.bf16.msra.mxu1 %v9415_v38  ;;  %6083 = vmatprep.mubr.msk.f32.mxu1 %vm6387_vm11, %v6388_v58 }
 0x6f0   :  { %6160 = vmatprep.subr.bf16.mxu1 %v6386_v7 }
 0x7c1   :  { %v5033_v60 = vpop.f32.mrb[2].mxu1 }
 0x7c2   :  { %v5037_v12 = vadd.f32 %v5033_v60, %v4831_v13  ;;  %v6071_v52 = vpop.f32.mrb[3].mxu1 }
 0x7c4   :  { %6229 = vtanh.f32 %v5037_v12  ;;  %v5988_v41 = vmul.f32 -1.442695, %v5037_v12 }
 0x7c6   :  { %6231 = vpow2.f32 %v5988_v41 }
 0x7ce   :  { %v6230_v14 = vpop.eup %6229 }
 0x7cf   :  { %5047 = vrot.lane.b32.xlu0 %v6230_v14, %s6377_s19 }
 0x7d0   :  { %v6232_v1 = vpop.eup %6231 }
 0x7d1   :  { %v5041_v35 = vadd.f32 1.0, %v6232_v1 }
 0x7d3   :  { %6233 = vrcp.f32 %v5041_v35 }
 0x7dd   :  { %v6234_v26 = vpop.eup %6233 }
 0x7de   :  { %v5045_v33 = vmul.f32 %v6234_v26, %v4955_v57 }
 0x841   :  { %v5048_v47 = vpop.permute.xlu0 %5047 }
 0x842   :  { %v5050_v18 = vmul.f32 %v6234_v26, %v5048_v47 }
 0x844   :  { %5052 = vrot.lane.b32.xlu1 %v5050_v18, %s10191_s5 }
 0x8b6   :  { %v5053_v11 = vpop.permute.xlu1 %5052 }
 0x8b7   :  { %v5055_v2 = vadd.f32 %v5053_v11, %v5045_v33 }
 0x8b9   :  { %6235 = vtanh.f32 %v5055_v2 }
 0x8c3   :  { %v6236_v6 = vpop.eup %6235 }
 0x8c4   :  { %5058 = vrot.lane.b32.xlu0 %v6236_v6, %s10191_s5 }
 0x936   :  { %v5059_v25 = vpop.permute.xlu0 %5058 }
 0x937   :  { %v5061_v19 = vmul.f32 %v6234_v26, %v5059_v25 }
 0x939   :  { %5063 = vrot.lane.b32.xlu1 %v5061_v19, %s9971_s24 }
 0x9ab   :  { %v5064_v17 = vpop.permute.xlu1 %5063 }
 0x9ac   :  { %6077 = vmatmul.mubr.msk.f32.vlgmr.msra.gmra.mrb[2].mxu0 %vm752_vm2, %v5064_v17 }
 0x9ad   :  { %6159 = vmatpush3.bf16.msra.mxu0 %v9415_v38  ;;  %6090 = vmatprep.mubr.msk.f32.mxu0 %vm6387_vm11, %v6388_v58 }
 0x9ae   :  { %6163 = vmatprep.subr.bf16.mxu0 %v6386_v7 }
 0xa7f   :  { %v5133_v8 = vpop.f32.mrb[2].mxu0 }
 0xa80   :  { %v5137_v50 = vadd.f32 %v5133_v8, %v9554_v3  ;;  %v6078_v30 = vpop.f32.mrb[3].mxu0 }
 0xa82   :  { %6237 = vtanh.f32 %v5137_v50  ;;  %v5990_v23 = vmul.f32 -1.442695, %v5137_v50 }
 0xa84   :  { %6239 = vpow2.f32 %v5990_v23 }
 0xa8c   :  { %v6238_v36 = vpop.eup %6237 }
 0xa8d   :  { %5147 = vrot.lane.b32.xlu0 %v6238_v36, %s6377_s19 }
 0xa8e   :  { %v6240_v46 = vpop.eup %6239 }
 0xa8f   :  { %v5141_v32 = vadd.f32 1.0, %v6240_v46 }
 0xa91   :  { %6241 = vrcp.f32 %v5141_v32 }
 0xa9b   :  { %v6242_v56 = vpop.eup %6241 }
 0xa9c   :  { %v5145_v59 = vmul.f32 %v6242_v56, %v5055_v2 }
 0xaff   :  { %v5148_v29 = vpop.permute.xlu0 %5147 }
 0xb00   :  { %v5150_v63 = vmul.f32 %v6242_v56, %v5148_v29 }
 0xb02   :  { %5152 = vrot.lane.b32.xlu1 %v5150_v63, %s10191_s5 }
 0xb74   :  { %v5153_v45 = vpop.permute.xlu1 %5152 }
 0xb75   :  { %v5155_v24 = vadd.f32 %v5153_v45, %v5145_v59 }
 0xb77   :  { %6243 = vtanh.f32 %v5155_v24 }
 0xb81   :  { %v6244_v27 = vpop.eup %6243 }
 0xb82   :  { %5158 = vrot.lane.b32.xlu0 %v6244_v27, %s10191_s5 }
 0xbf4   :  { %v5159_v31 = vpop.permute.xlu0 %5158 }
 0xbf5   :  { %v5161_v53 = vmul.f32 %v6242_v56, %v5159_v31 }
 0xbf7   :  { %5163 = vrot.lane.b32.xlu1 %v5161_v53, %s9971_s24 }
 0xc69   :  { %v5164_v44 = vpop.permute.xlu1 %5163 }
 0xc6a   :  { %6084 = vmatmul.mubr.msk.f32.vlgmr.msra.gmra.mrb[4].mxu1 %vm752_vm2, %v5164_v44 }
 0xc6b   :  { %6162 = vmatpush3.bf16.msra.mxu1 %v9415_v38  ;;  %6097 = vmatprep.mubr.msk.f32.mxu1 %vm6387_vm11, %v6388_v58 }
 0xc6c   :  { %6166 = vmatprep.subr.bf16.mxu1 %v6386_v7 }
 0xd3d   :  { %v5233_v4 = vpop.f32.mrb[4].mxu1 }
 0xd3e   :  { %v5237_v0 = vadd.f32 %v5233_v4, %v9557_v61  ;;  %v6085_v34 = vpop.f32.mrb[5].mxu1 }
 0xd40   :  { %6245 = vtanh.f32 %v5237_v0  ;;  %v5992_v3 = vmul.f32 -1.442695, %v5237_v0 }
 0xd42   :  { %6247 = vpow2.f32 %v5992_v3 }
 0xd4a   :  { %v6246_v13 = vpop.eup %6245 }
 0xd4b   :  { %5247 = vrot.lane.b32.xlu0 %v6246_v13, %s6377_s19 }
 0xd4c   :  { %v6248_v55 = vpop.eup %6247 }
 0xd4d   :  { %v5241_v54 = vadd.f32 1.0, %v6248_v55 }
 0xd4f   :  { %6249 = vrcp.f32 %v5241_v54 }
 0xd59   :  { %v6250_v49 = vpop.eup %6249 }
 0xd5a   :  { %v5245_v5 = vmul.f32 %v6250_v49, %v5155_v24 }
 0xdbd   :  { %v5248_v15 = vpop.permute.xlu0 %5247 }
 0xdbe   :  { %v5250_v9 = vmul.f32 %v6250_v49, %v5248_v15 }
 0xdc0   :  { %5252 = vrot.lane.b32.xlu1 %v5250_v9, %s10191_s5 }
 0xe32   :  { %v5253_v10 = vpop.permute.xlu1 %5252 }
 0xe33   :  { %v5255_v22 = vadd.f32 %v5253_v10, %v5245_v5 }
 0xe35   :  { %6251 = vtanh.f32 %v5255_v22 }
 0xe3f   :  { %v6252_v61 = vpop.eup %6251 }
 0xe40   :  { %5258 = vrot.lane.b32.xlu0 %v6252_v61, %s10191_s5 }
 0xeb2   :  { %v5259_v28 = vpop.permute.xlu0 %5258 }
 0xeb3   :  { %v5261_v62 = vmul.f32 %v6250_v49, %v5259_v28 }
 0xeb5   :  { %5263 = vrot.lane.b32.xlu1 %v5261_v62, %s9971_s24 }
 0xf27   :  { %v5264_v40 = vpop.permute.xlu1 %5263 }
 0xf28   :  { %6091 = vmatmul.mubr.msk.f32.vlgmr.msra.gmra.mrb[4].mxu0 %vm752_vm2, %v5264_v40 }
 0xf29   :  { %6165 = vmatpush3.bf16.msra.mxu0 %v9415_v38  ;;  %6104 = vmatprep.mubr.msk.f32.mxu0 %vm6387_vm11, %v6388_v58 }
 0xf2a   :  { %6169 = vmatprep.subr.bf16.mxu0 %v6386_v7 }
 0xffb   :  { %v5333_v42 = vpop.f32.mrb[4].mxu0 }
 0xffc   :  { %v5337_v57 = vadd.f32 %v5333_v42, %v9560_v51  ;;  %v6092_v16 = vpop.f32.mrb[5].mxu0 }
 0xffe   :  { %6253 = vtanh.f32 %v5337_v57  ;;  %v5994_v43 = vmul.f32 -1.442695, %v5337_v57 }
0x1000   :  { %6255 = vpow2.f32 %v5994_v43 }
0x1008   :  { %v6254_v39 = vpop.eup %6253 }
0x1009   :  { %5347 = vrot.lane.b32.xlu0 %v6254_v39, %s6377_s19  ;;  %v5663_v39 = vld [vmem:[%s9697_s6 + $0x8] sm:$0xff] }
0x100a   :  { %v6256_v37 = vpop.eup %6255 }
0x100b   :  { %v5341_v60 = vadd.f32 1.0, %v6256_v37 }
0x100d   :  { %6257 = vrcp.f32 %v5341_v60  ;;  %v5747_v60 = vld [vmem:[%s9699_s8] sm:$0xff] }
0x1017   :  { %v6258_v12 = vpop.eup %6257 }
0x1018   :  { %v5345_v41 = vmul.f32 %v6258_v12, %v5255_v22 }
0x107b   :  { %v5348_v52 = vpop.permute.xlu0 %5347 }
0x107c   :  { %v5350_v14 = vmul.f32 %v6258_v12, %v5348_v52 }
0x107e   :  { %5352 = vrot.lane.b32.xlu1 %v5350_v14, %s10191_s5 }
0x10f0   :  { %v5353_v1 = vpop.permute.xlu1 %5352 }
0x10f1   :  { %v5355_v35 = vadd.f32 %v5353_v1, %v5345_v41 }
0x10f3   :  { %6259 = vtanh.f32 %v5355_v35 }
0x10fd   :  { %v6260_v51 = vpop.eup %6259 }
0x10fe   :  { %5358 = vrot.lane.b32.xlu0 %v6260_v51, %s10191_s5  ;;  %v5750_v51 = vld [vmem:[%s9699_s8 + $0x18] sm:$0xff] }
0x1170   :  { %v5359_v26 = vpop.permute.xlu0 %5358 }
0x1171   :  { %v5361_v47 = vmul.f32 %v6258_v12, %v5359_v26  ;;  %v5748_v12 = vld [vmem:[%s9699_s8 + $0x8] sm:$0xff] }
0x1172   :  { %v6173_v52 = vpack.c.bf16 %v5748_v12, %v5747_v60 }
0x1173   :  { %5363 = vrot.lane.b32.xlu1 %v5361_v47, %s9971_s24  ;;  %v6001_v47 = vld [vmem:[%s9698_s7] ss:$0 sm:$0xff]  ;;  %s6389_s7 = smov [#allocation7]  }
0x11e5   :  { %v5364_v18 = vpop.permute.xlu1 %5363 }
0x11e6   :  { %6098 = vmatmul.mubr.msk.f32.vlgmr.msra.gmra.mrb[6].mxu1 %vm752_vm2, %v5364_v18 }
0x11e7   :  { %6168 = vmatpush3.bf16.msra.mxu1 %v9415_v38  ;;  %6111 = vmatprep.mubr.msk.f32.mxu1 %vm6387_vm11, %v6388_v58 }
0x11e8   :  { %6172 = vmatprep.subr.bf16.mxu1 %v6386_v7 }
0x12b9   :  { %v5433_v33 = vpop.f32.mrb[6].mxu1 }
0x12ba   :  { %v5437_v11 = vadd.f32 %v5433_v33, %v9563_v21  ;;  %v6099_v2 = vpop.f32.mrb[7].mxu1 }
0x12bb   :  { %v6003_v2 = vld [vmem:[%s9700_s9] ss:$0 sm:$0xff]  ;;  %s5932_s9 = sshll.u32 %s6389_s7, 4  ;;  %s5933_s9 = int_to_ptr.vmem [resolvable:$true] %s5932_s9 }
0x12bc   :  { %6261 = vtanh.f32 %v5437_v11  ;;  %v5996_v25 = vmul.f32 -1.442695, %v5437_v11  ;;  %p6324_p11 = scmp.lt.s32.totalorder %s5933_s9, %s5933_s9 }
0x12be   :  { %6263 = vpow2.f32 %v5996_v25 }
0x12c6   :  { %v6262_v6 = vpop.eup %6261 }
0x12c7   :  { %5447 = vrot.lane.b32.xlu0 %v6262_v6, %s6377_s19 }
0x12c8   :  { %v6264_v19 = vpop.eup %6263 }
0x12c9   :  { %v5441_v17 = vadd.f32 1.0, %v6264_v19 }
0x12cb   :  { %6265 = vrcp.f32 %v5441_v17  ;;  %v6005_v17 = vld [vmem:[%s9702_s11] ss:$0 sm:$0xff]  ;;  %s6319_s11 = scalar_lea.vmem %s5933_s9, 32 }
0x12cc   :  { %p6320_p10 = scmp.ne.s32.totalorder %s5933_s9, %s6319_s11  ;;  %p6325_p12 = scmp.lt.s32.totalorder %s6319_s11, %s6319_s11 }
0x12ce   :  { %p6326_p13 = por %p6325_p12, %p6324_p11 }
0x12d0   :  { %p6327_p0 = pnand %p6326_p13, %p6320_p10 }
0x12d5   :  { %v6266_v8 = vpop.eup %6265 }
0x12d6   :  { %v5445_v30 = vmul.f32 %v6266_v8, %v5355_v35  ;;  %v5749_v35 = vld [vmem:[%s9699_s8 + $0x10] sm:$0xff] }
0x12d7   :  { %v6176_v26 = vpack.c.bf16 %v5750_v51, %v5749_v35 }
0x1339   :  { %v5448_v38 = vpop.permute.xlu0 %5447 }
0x133a   :  { %v5450_v50 = vmul.f32 %v6266_v8, %v5448_v38 }
0x133c   :  { %5452 = vrot.lane.b32.xlu1 %v5450_v50, %s10191_s5 }
0x13ae   :  { %v5453_v36 = vpop.permute.xlu1 %5452 }
0x13af   :  { %v5455_v23 = vadd.f32 %v5453_v36, %v5445_v30 }
0x13b1   :  { %6267 = vtanh.f32 %v5455_v23 }
0x13bb   :  { %v6268_v21 = vpop.eup %6267 }
0x13bc   :  { %5458 = vrot.lane.b32.xlu0 %v6268_v21, %s10191_s5 }
0x142e   :  { %v5459_v46 = vpop.permute.xlu0 %5458 }
0x142f   :  { %v5461_v32 = vmul.f32 %v6266_v8, %v5459_v46 }
0x1431   :  { %5463 = vrot.lane.b32.xlu1 %v5461_v32, %s9971_s24 }
0x14a3   :  { %v5464_v56 = vpop.permute.xlu1 %5463 }
0x14a4   :  { %6105 = vmatmul.mubr.msk.f32.vlgmr.msra.gmra.mrb[6].mxu0 %vm752_vm2, %v5464_v56 }
0x14a5   :  { %6118 = vmatprep.mubr.msk.f32.mxu0 %vm6387_vm11, %v6388_v58 }
0x1577   :  { %v5533_v29 = vpop.f32.mrb[6].mxu0 }
0x1578   :  { %v5537_v63 = vadd.f32 %v5533_v29, %v9566_v48  ;;  %v6106_v59 = vpop.f32.mrb[7].mxu0 }
0x157a   :  { %6269 = vtanh.f32 %v5537_v63  ;;  %v5998_v24 = vmul.f32 -1.442695, %v5537_v63 }
0x157c   :  { %6271 = vpow2.f32 %v5998_v24 }
0x1584   :  { %v6270_v45 = vpop.eup %6269 }
0x1585   :  { %5547 = vrot.lane.b32.xlu0 %v6270_v45, %s6377_s19 }
0x1586   :  { %v6272_v27 = vpop.eup %6271 }
0x1587   :  { %v5541_v31 = vadd.f32 1.0, %v6272_v27 }
0x1589   :  { %6273 = vrcp.f32 %v5541_v31 }
0x1593   :  { %v6274_v53 = vpop.eup %6273 }
0x1594   :  { %v5545_v0 = vmul.f32 %v6274_v53, %v5455_v23 }
0x15f7   :  { %v5548_v44 = vpop.permute.xlu0 %5547 }
0x15f8   :  { %v5550_v4 = vmul.f32 %v6274_v53, %v5548_v44 }
0x15fa   :  { %5552 = vrot.lane.b32.xlu1 %v5550_v4, %s10191_s5 }
0x166c   :  { %v5553_v34 = vpop.permute.xlu1 %5552 }
0x166d   :  { %v5555_v13 = vadd.f32 %v5553_v34, %v5545_v0 }
0x166f   :  { %6275 = vtanh.f32 %v5555_v13 }
0x1679   :  { %v6276_v48 = vpop.eup %6275 }
0x167a   :  { %5558 = vrot.lane.b32.xlu0 %v6276_v48, %s10191_s5 }
0x16ec   :  { %v5559_v3 = vpop.permute.xlu0 %5558 }
0x16ed   :  { %v5561_v55 = vmul.f32 %v6274_v53, %v5559_v3 }
0x16ef   :  { %5563 = vrot.lane.b32.xlu1 %v5561_v55, %s9971_s24 }
0x1761   :  { %v5564_v54 = vpop.permute.xlu1 %5563 }
0x1762   :  { %6112 = vmatmul.mubr.msk.f32.vlgmr.msra.gmra.mrb[8].mxu1 %vm752_vm2, %v5564_v54 }
0x1763   :  { %6129 = vmatprep.mubr.msk.f32.mxu1 %vm6387_vm11, %v6388_v58  ;;  %6174 = vmatpush3.bf16.msra.mxu1 %v6173_v52 }
0x1764   :  { %6175 = vmatprep.subr.bf16.mxu1 %v6386_v7  ;;  %v5831_v7 = vld [vmem:[%s9701_s10] sm:$0xff] }
0x1767   :  { %6177 = vmatpush3.bf16.msra.mxu1 %v6176_v26 }
0x1835   :  { %v5633_v49 = vpop.f32.mrb[8].mxu1 }
0x1836   :  { %v5637_v15 = vadd.f32 %v5633_v49, %v9569_v20  ;;  %v6113_v9 = vpop.f32.mrb[9].mxu1  ;;  %v5662_v20 = vld [vmem:[%s9697_s6] sm:$0xff] }
0x1837   :  { %v6170_v43 = vpack.c.bf16 %v5663_v39, %v5662_v20 }
0x1838   :  { %6277 = vtanh.f32 %v5637_v15  ;;  %v6000_v10 = vmul.f32 -1.442695, %v5637_v15 }
0x1839   :  { %6171 = vmatpush3.bf16.msra.mxu0 %v6170_v43 }
0x183a   :  { %6279 = vpow2.f32 %v6000_v10  ;;  %6132 = vmatprep.subr.mxu0 %v6388_v58 }
0x1842   :  { %v6278_v5 = vpop.eup %6277 }
0x1843   :  { %5647 = vrot.lane.b32.xlu0 %v6278_v5, %s6377_s19 }
0x1844   :  { %v6280_v22 = vpop.eup %6279 }
0x1845   :  { %v5641_v61 = vadd.f32 1.0, %v6280_v22 }
0x1847   :  { %6281 = vrcp.f32 %v5641_v61 }
0x1851   :  { %v6282_v28 = vpop.eup %6281 }
0x1852   :  { %v5645_v42 = vmul.f32 %v6282_v28, %v5555_v13 }
0x18b5   :  { %v5648_v62 = vpop.permute.xlu0 %5647 }
0x18b6   :  { %v5650_v40 = vmul.f32 %v6282_v28, %v5648_v62 }
0x18b8   :  { %5652 = vrot.lane.b32.xlu1 %v5650_v40, %s10191_s5 }
0x192a   :  { %v5653_v57 = vpop.permute.xlu1 %5652 }
0x192b   :  { %v5655_v16 = vadd.f32 %v5653_v57, %v5645_v42 }
0x192d   :  { %6283 = vtanh.f32 %v5655_v16 }
0x1937   :  { %v6284_v37 = vpop.eup %6283 }
0x1938   :  { %5658 = vrot.lane.b32.xlu0 %v6284_v37, %s10191_s5 }
0x19aa   :  { %v5659_v14 = vpop.permute.xlu0 %5658 }
0x19ab   :  { %v5661_v41 = vmul.f32 %v6282_v28, %v5659_v14 }
0x19ad   :  { %5672 = vrot.lane.b32.xlu1 %v5661_v41, %s9971_s24 }
0x1a1f   :  { %v5673_v1 = vpop.permute.xlu1 %5672 }
0x1a20   :  { %6119 = vmatmul.mubr.msk.f32.vlgmr.msra.gmra.mrb[8].mxu0 %vm752_vm2, %v5673_v1  ;;  %vm5839_vm2 = vcmask 64512  }
0x1a21   :  { %6134 = vmatprep.mubr.msk.f32.mxu0 %vm6387_vm11, %v6388_v58  ;;  %6133 = vmatpush3.msra.mxu0 %v5831_v7 }
0x1af3   :  { %v5742_v58 = vpop.f32.mrb[8].mxu0 }
0x1af4   :  { %v5743_v18 = vadd.f32 %v6001_v47, %v5742_v58  ;;  %v6120_v33 = vpop.f32.mrb[9].mxu0 }
0x1af6   :  { %v5746_v11 = vmax.f32 %v5743_v18, 0.0 }
0x1af8   :  { %6130 = vmatmul.mubr.msk.f32.vlgmr.msra.gmra.mrb[10].mxu1 %vm755_vm3, %v5746_v11 }
0x1bcb   :  { %v5827_v6 = vpop.f32.mrb[10].mxu1 }
0x1bcc   :  { %v5828_v25 = vadd.f32 %v6003_v2, %v5827_v6  ;;  %v6131_v19 = vpop.f32.mrb[11].mxu1 }
0x1bce   :  { %6135 = vmatmul.mubr.msk.f32.vlgmr.msra.gmra.mrb[10].mxu0 %vm5839_vm2, %v5828_v25 }
0x1ca1   :  { %v5909_v8 = vpop.f32.mrb[10].mxu0 }
0x1ca2   :  { %v5910_v38 = vadd.f32 %v6005_v17, %v5909_v8  ;;  %v6136_v50 = vpop.f32.mrb[11].mxu0 }
0x1ca4   :  { %v5914_v30 = vsel %vm5913_vm4, %v5910_v38, -inf }
0x1ca5   :  { %5915 = vmax.xlane.f32.xlu0 %v5914_v30 }
0x1d32   :  { %v5916_v36 = vpop.xlane.xlu0 %5915 }
0x1d33   :  { %v5917_v23 = vsub.f32 %v5910_v38, %v5916_v36 }
0x1d35   :  { %v5918_v21 = vmul.f32 1.442695, %v5917_v23 }
0x1d37   :  { %6285 = vpow2.f32 %v5918_v21 }
0x1d41   :  { %v6286_v46 = vpop.eup %6285 }
0x1d42   :  { %v5920_v32 = vsel %vm5913_vm4, %v6286_v46, 0.0 }
0x1d43   :  { %5921 = vadd.xlane.f32.xlu1 %v5920_v32 }
0x1dd0   :  { %v5922_v56 = vpop.xlane.xlu1 %5921 }
0x1dd1   :  { %6287 = vrcp.f32 %v5922_v56 }
0x1ddb   :  { %v6288_v29 = vpop.eup %6287 }
0x1ddc   :  { %v5924_v63 = vmul.f32 %v6288_v29, %v6286_v46 }
0x1dde   :  { %5925 = vst.msk [vmem:[#allocation7] sm:$0x3] %vm5913_vm4, %v5924_v63 }
0x1ddf   :  { %6330 = shalt.err (!%p6327_p0)
}
0x1de0   :  { %s6331_s14 = scalar_lea.hbm %s9703_s12, 32 }
0x1de1   :  { %p6332_p1 = scmp.ne.s32.totalorder %s9703_s12, %s6331_s14  ;;  %p6335_p2 = scmp.lt.u32.totalorder %s6331_s14, %s9703_s12 }
0x1de3   :  { %p6337_p3 = pnand %p6335_p2, %p6332_p1 }
0x1de5   :  { %6340 = shalt.err (!%p6337_p3)
}
0x1de6   :  { %5935 = dma.vmem_to_hbm [thread:$0]  %s5933_s9, 32, %s9703_s12, [#allocation3]  }
0x1de7   :  { %6345 = dma.done.wait [#allocation3], 32  }
0x1de8   :  { %6346 = vsyncadd [#allocation3], 4294967264 }
0x1de9   :  { %5939 = vsyncpa [#allocation3], 1 }
0x1dea   :  { %5940 = vsyncpa [#allocation4], 1 }
0x1deb   :  { %5941 = vsyncpa [#allocation6], 1 }

</bundles_post_ra>
